<compile_context>
chip_gen: v6e
topology: v6e:2x2x1
jax: 0.10.0
libtpu: 0.0.40
codegen_flags: <defaults>
</compile_context>

<pallas_src>
import functools
import math

import jax
import jax.numpy as jnp
import numpy as np
from jax.experimental import pallas as pl
from jax.experimental.pallas import tpu as pltpu

_TB_MAX = 256  # batch-tile cap: 256 rows x 512 lanes x f32 ~ 0.5 MiB / block


def _dot(a, b):
    # f32 x f32 MXU matmul with f32 accumulation (exact multi-pass path).
    return jnp.dot(a, b, preferred_element_type=jnp.float32,
                   precision=jax.lax.Precision.HIGHEST)


def _dc_kernel(x_ref, usk_ref, m_ref, c2_ref, s2_ref, img_ref, ksp_ref):
    """One batch tile per grid step; all intermediates stay in VMEM/vregs.

    x_ref   : (TB, HW)    predicted image (channel 0), flattened
    usk_ref : (TB, 2*HW)  measured k-space, [real(HW) || imag(HW)]
    m_ref   : (TB, HW)    sampling mask (shared by re/im)
    c2_ref  : (HW, HW)    Re(F2),  F2 = D_H kron D_W  (orthonormal 2-D DFT)
    s2_ref  : (HW, HW)    -Im(F2)  (so F2 = C2 - i*S2, symmetric)
    img_ref : (TB, HW)    Re(IFFT2(updated k-space)), flattened
    ksp_ref : (TB, 2*HW)  updated k-space, [real(HW) || imag(HW)]
    """
    x = x_ref[...]
    m = m_ref[...]
    c2 = c2_ref[...]
    s2 = s2_ref[...]
    hw = x.shape[-1]

    uskr = usk_ref[:, :hw]       # aligned 128-multiple lane slices (free)
    uski = usk_ref[:, hw:]

    # Forward orthonormal 2-D DFT of the real image: K = x @ (C2 - i*S2).
    kr = _dot(x, c2)
    ki = -_dot(x, s2)

    # Data consistency: keep measured samples, fill the rest with prediction.
    keep = 1.0 - m
    ur = m * uskr + keep * kr
    ui = m * uski + keep * ki

    # Inverse orthonormal 2-D DFT, real part: Re((Ur + i*Ui) @ (C2 + i*S2)).
    img_ref[...] = _dot(ur, c2) - _dot(ui, s2)

    ksp_ref[:, :hw] = ur
    ksp_ref[:, hw:] = ui


@functools.lru_cache(maxsize=None)
def _dft2_operator(h, w):
    """Real/imag parts of the orthonormal 2-D DFT operator on flattened (h*w,)
    images: F2 = D_H kron D_W with D_n[j,k] = exp(-2*pi*i*j*k/n)/sqrt(n).
    Returns (C2, S2) float32 with F2 = C2 - i*S2 (both symmetric)."""
    jh = np.arange(h)
    jw = np.arange(w)
    dh = np.exp(-2j * np.pi * np.outer(jh, jh) / h) / math.sqrt(h)
    dw = np.exp(-2j * np.pi * np.outer(jw, jw) / w) / math.sqrt(w)
    f2 = np.kron(dh, dw)                                   # (h*w, h*w)
    return (np.ascontiguousarray(f2.real, dtype=np.float32),
            np.ascontiguousarray(-f2.imag, dtype=np.float32))


def _tile_batch(n):
    """Pick (tile, num_blocks, padded_n). Tile is a multiple of 8 (or the full
    batch), capped at _TB_MAX, and aims for >= 2 blocks once n >= 16 so v7x
    can split blocks across its two TensorCores."""
    if n < 16:
        return n, 1, n
    tb = min(_TB_MAX, ((n + 15) // 16) * 8)   # ~ceil(n/2) rounded up to 8
    nb = -(-n // tb)
    return tb, nb, nb * tb


@jax.jit
def data_consistency_pallas(predicted_img, us_kspace, us_mask):
    """predicted_img: (N, C, H, W); us_kspace: (N, 2, H, W) as [real, imag];
    us_mask: (N, 1, H, W).  Returns:
      updated_img   : (N, 1, H, W) float32  -- Re(IFFT2(updated k-space))
      updated_kspace: (N, H, W, 2) float32  -- [real, imag] last (torch layout)
    """
    n, _, h, w = predicted_img.shape
    hw = h * w

    # Lane-dense slabs (one fused XLA relayout each; layout plumbing so every
    # kernel block has a >=128-multiple last dim).
    x = predicted_img[:, 0].reshape(n, hw).astype(jnp.float32)
    usk = us_kspace.astype(jnp.float32).reshape(n, 2 * hw)     # [re || im]
    m = us_mask[:, 0].reshape(n, hw).astype(jnp.float32)

    tb, nb, n_pad = _tile_batch(n)
    if n_pad != n:
        pad = ((0, n_pad - n), (0, 0))
        x = jnp.pad(x, pad)
        usk = jnp.pad(usk, pad)
        m = jnp.pad(m, pad)

    c2_np, s2_np = _dft2_operator(h, w)
    c2 = jnp.asarray(c2_np)
    s2 = jnp.asarray(s2_np)

    row_spec = pl.BlockSpec((tb, hw), lambda i: (i, 0))
    row2_spec = pl.BlockSpec((tb, 2 * hw), lambda i: (i, 0))
    const_spec = pl.BlockSpec((hw, hw), lambda i: (0, 0))      # VMEM-resident

    img_flat, ksp_flat = pl.pallas_call(
        _dc_kernel,
        out_shape=(
            jax.ShapeDtypeStruct((n_pad, hw), jnp.float32),
            jax.ShapeDtypeStruct((n_pad, 2 * hw), jnp.float32),
        ),
        grid_spec=pltpu.PrefetchScalarGridSpec(
            num_scalar_prefetch=0,
            grid=(nb,),
            in_specs=[row_spec, row2_spec, row_spec, const_spec, const_spec],
            out_specs=[row_spec, row2_spec],
        ),
        compiler_params=pltpu.CompilerParams(
            dimension_semantics=("parallel",)),
    )(x, usk, m, c2, s2)

    updated_img = img_flat[:n].reshape(n, 1, h, w)
    # (N, 2, H, W) -> (N, H, W, 2): single fused XLA transpose, required only
    # because the module's contract is a (..., 2)-last k-space tensor.
    updated_kspace = ksp_flat[:n].reshape(n, 2, h, w).transpose(0, 2, 3, 1)
    return updated_img, updated_kspace


# ---------------- reference (plain JAX / XLA FFT) for verification ----------
def data_consistency_ref(predicted_img, us_kspace, us_mask):
    x = predicted_img[:, 0].astype(jnp.float32)
    K = jnp.fft.fft2(x, norm="ortho")                     # rfft(.., True, False)
    usk = us_kspace[:, 0] + 1j * us_kspace[:, 1]
    mask = us_mask[:, 0]
    upd = mask * usk + (1.0 - mask) * K
    img = jnp.real(jnp.fft.ifft2(upd, norm="ortho"))      # ifft(.., 2, True)
    kspace = jnp.stack([jnp.real(upd), jnp.imag(upd)], axis=-1)
    return img[:, None].astype(jnp.float32), kspace.astype(jnp.float32)


if __name__ == "__main__":
    N, C, H, W = 2, 1, 16, 16

    key = jax.random.PRNGKey(0)
    k_img, k_ksp, k_mask = jax.random.split(key, 3)

    predicted_img = jax.random.normal(k_img, (N, C, H, W), jnp.float32)
    us_kspace = jax.random.normal(k_ksp, (N, 2, H, W), jnp.float32)
    us_mask = (jax.random.uniform(k_mask, (N, 1, H, W))
               < 0.4).astype(jnp.float32)

    img, kspace = data_consistency_pallas(predicted_img, us_kspace, us_mask)
    img = jax.block_until_ready(img)
    kspace = jax.block_until_ready(kspace)

    ref_img, ref_kspace = data_consistency_ref(predicted_img, us_kspace,
                                               us_mask)
    ref_img = jax.block_until_ready(ref_img)

    assert img.shape == (N, 1, H, W), img.shape
    assert kspace.shape == (N, H, W, 2), kspace.shape
    err_img = float(jnp.max(jnp.abs(img - ref_img)))
    err_k = float(jnp.max(jnp.abs(kspace - ref_kspace)))
    assert err_img < 1e-3 and err_k < 1e-3, (err_img, err_k)

    print("KERNEL_OK")
</pallas_src>

<mosaic_0001>
module attributes {stable_mosaic.version = 11 : i64} {
  func.func @_dc_kernel(%arg0: i32, %arg1: memref<2x256xf32, #tpu.memory_space<vmem>>, %arg2: memref<2x512xf32, #tpu.memory_space<vmem>>, %arg3: memref<2x256xf32, #tpu.memory_space<vmem>>, %arg4: memref<256x256xf32, #tpu.memory_space<vmem>>, %arg5: memref<256x256xf32, #tpu.memory_space<vmem>>, %arg6: memref<2x256xf32, #tpu.memory_space<vmem>>, %arg7: memref<2x512xf32, #tpu.memory_space<vmem>>) attributes {dimension_semantics = [#tpu.dimension_semantics<parallel>], iteration_bounds = array<i64: 1>, scalar_prefetch = 0 : i64, scratch_operands = 0 : i64, tpu.core_type = #tpu.core_type<tc>, window_params = [{transform_indices = @transform_0, window_bounds = array<i64: 2, 256>}, {transform_indices = @transform_1, window_bounds = array<i64: 2, 512>}, {transform_indices = @transform_2, window_bounds = array<i64: 2, 256>}, {pipeline_mode = #tpu.pipeline_mode<synchronous>, transform_indices = @transform_3, window_bounds = array<i64: 256, 256>}, {pipeline_mode = #tpu.pipeline_mode<synchronous>, transform_indices = @transform_4, window_bounds = array<i64: 256, 256>}, {transform_indices = @transform_5, window_bounds = array<i64: 2, 256>}, {transform_indices = @transform_6, window_bounds = array<i64: 2, 512>}]} {
    %c0 = arith.constant 0 : index
    %c0_0 = arith.constant 0 : index
    %0 = vector.load %arg1[%c0, %c0_0] : memref<2x256xf32, #tpu.memory_space<vmem>>, vector<2x256xf32>
    %c0_1 = arith.constant 0 : index
    %c0_2 = arith.constant 0 : index
    %1 = vector.load %arg3[%c0_1, %c0_2] : memref<2x256xf32, #tpu.memory_space<vmem>>, vector<2x256xf32>
    %c0_3 = arith.constant 0 : index
    %c0_4 = arith.constant 0 : index
    %2 = vector.load %arg4[%c0_3, %c0_4] : memref<256x256xf32, #tpu.memory_space<vmem>>, vector<256x256xf32>
    %c0_5 = arith.constant 0 : index
    %c0_6 = arith.constant 0 : index
    %3 = vector.load %arg5[%c0_5, %c0_6] : memref<256x256xf32, #tpu.memory_space<vmem>>, vector<256x256xf32>
    %c0_7 = arith.constant 0 : index
    %c0_8 = arith.constant 0 : index
    %4 = vector.load %arg2[%c0_7, %c0_8] : memref<2x512xf32, #tpu.memory_space<vmem>>, vector<2x256xf32>
    %c0_9 = arith.constant 0 : index
    %c256 = arith.constant 256 : index
    %5 = vector.load %arg2[%c0_9, %c256] : memref<2x512xf32, #tpu.memory_space<vmem>>, vector<2x256xf32>
    %cst = arith.constant dense<0.000000e+00> : vector<2x256xf32>
    %6 = tpu.matmul %0, %2, %cst {dimension_numbers = #tpu.dot_dimension_numbers<[1], [0], [0], [1], [0, 0, 1, 1], [], []>, precision = #tpu.contract_precision<fp32>} : vector<2x256xf32>, vector<256x256xf32>, vector<2x256xf32> -> vector<2x256xf32>
    %cst_10 = arith.constant dense<0.000000e+00> : vector<2x256xf32>
    %7 = tpu.matmul %0, %3, %cst_10 {dimension_numbers = #tpu.dot_dimension_numbers<[1], [0], [0], [1], [0, 0, 1, 1], [], []>, precision = #tpu.contract_precision<fp32>} : vector<2x256xf32>, vector<256x256xf32>, vector<2x256xf32> -> vector<2x256xf32>
    %cst_11 = arith.constant 0.000000e+00 : f32
    %8 = vector.broadcast %cst_11 : f32 to vector<2x256xf32>
    %9 = arith.subf %8, %7 : vector<2x256xf32>
    %cst_12 = arith.constant 1.000000e+00 : f32
    %10 = vector.broadcast %cst_12 : f32 to vector<2x256xf32>
    %11 = arith.subf %10, %1 : vector<2x256xf32>
    %12 = arith.mulf %1, %4 : vector<2x256xf32>
    %13 = arith.mulf %11, %6 : vector<2x256xf32>
    %14 = arith.addf %12, %13 : vector<2x256xf32>
    %15 = arith.mulf %1, %5 : vector<2x256xf32>
    %16 = arith.mulf %11, %9 : vector<2x256xf32>
    %17 = arith.addf %15, %16 : vector<2x256xf32>
    %cst_13 = arith.constant dense<0.000000e+00> : vector<2x256xf32>
    %18 = tpu.matmul %14, %2, %cst_13 {dimension_numbers = #tpu.dot_dimension_numbers<[1], [0], [0], [1], [0, 0, 1, 1], [], []>, precision = #tpu.contract_precision<fp32>} : vector<2x256xf32>, vector<256x256xf32>, vector<2x256xf32> -> vector<2x256xf32>
    %cst_14 = arith.constant dense<0.000000e+00> : vector<2x256xf32>
    %19 = tpu.matmul %17, %3, %cst_14 {dimension_numbers = #tpu.dot_dimension_numbers<[1], [0], [0], [1], [0, 0, 1, 1], [], []>, precision = #tpu.contract_precision<fp32>} : vector<2x256xf32>, vector<256x256xf32>, vector<2x256xf32> -> vector<2x256xf32>
    %20 = arith.subf %18, %19 : vector<2x256xf32>
    %c0_15 = arith.constant 0 : index
    %c0_16 = arith.constant 0 : index
    %21 = vector.load %arg6[%c0_15, %c0_16] : memref<2x256xf32, #tpu.memory_space<vmem>>, vector<2x256xf32>
    tpu.vector_store %arg6[%c0_15, %c0_16], %20 {strides = array<i32>} : memref<2x256xf32, #tpu.memory_space<vmem>>, vector<2x256xf32>,
    %c0_17 = arith.constant 0 : index
    %c0_18 = arith.constant 0 : index
    %22 = vector.load %arg7[%c0_17, %c0_18] : memref<2x512xf32, #tpu.memory_space<vmem>>, vector<2x256xf32>
    tpu.vector_store %arg7[%c0_17, %c0_18], %14 {strides = array<i32>} : memref<2x512xf32, #tpu.memory_space<vmem>>, vector<2x256xf32>,
    %c0_19 = arith.constant 0 : index
    %c256_20 = arith.constant 256 : index
    %23 = vector.load %arg7[%c0_19, %c256_20] : memref<2x512xf32, #tpu.memory_space<vmem>>, vector<2x256xf32>
    tpu.vector_store %arg7[%c0_19, %c256_20], %17 {strides = array<i32>} : memref<2x512xf32, #tpu.memory_space<vmem>>, vector<2x256xf32>,
    return
  }
  func.func @transform_0(%arg0: i32) -> (i32, i32) {
    %c0_i32 = arith.constant 0 : i32
    %c0_i32_0 = arith.constant 0 : i32
    return %arg0, %c0_i32 : i32, i32
  }
  func.func @transform_1(%arg0: i32) -> (i32, i32) {
    %c0_i32 = arith.constant 0 : i32
    %c0_i32_0 = arith.constant 0 : i32
    return %arg0, %c0_i32 : i32, i32
  }
  func.func @transform_2(%arg0: i32) -> (i32, i32) {
    %c0_i32 = arith.constant 0 : i32
    %c0_i32_0 = arith.constant 0 : i32
    return %arg0, %c0_i32 : i32, i32
  }
  func.func @transform_3(%arg0: i32) -> (i32, i32) {
    %c0_i32 = arith.constant 0 : i32
    %c0_i32_0 = arith.constant 0 : i32
    %c0_i32_1 = arith.constant 0 : i32
    return %c0_i32, %c0_i32_0 : i32, i32
  }
  func.func @transform_4(%arg0: i32) -> (i32, i32) {
    %c0_i32 = arith.constant 0 : i32
    %c0_i32_0 = arith.constant 0 : i32
    %c0_i32_1 = arith.constant 0 : i32
    return %c0_i32, %c0_i32_0 : i32, i32
  }
  func.func @transform_5(%arg0: i32) -> (i32, i32) {
    %c0_i32 = arith.constant 0 : i32
    %c0_i32_0 = arith.constant 0 : i32
    return %arg0, %c0_i32 : i32, i32
  }
  func.func @transform_6(%arg0: i32) -> (i32, i32) {
    %c0_i32 = arith.constant 0 : i32
    %c0_i32_0 = arith.constant 0 : i32
    return %arg0, %c0_i32 : i32, i32
  }
}

</mosaic_0001>

<bundles_post_ra>
// kernel: squeeze.2
= control target key start
LH: loop header
LB: loop body
LE: loop exit
PB: predicated region body
PF: predicated region fallthrough
CT: control target
= control target key end

     0   :  { %s8_s6 = smov 3  ;;  %s11_s7 = smov 12  ;;  %vm13_vm0 = vcmask 1043458   ;;  %vm3_vm1 = vcmask 130048   ;;  %vm17_vm2 = vcmask 1048448   ;;  %vm31_vm3 = vcmask 917248   ;;  %s216_s0 = inlined_call_operand.vmem [shape: f32[2,1,16,16], index: 0, kind: input, shape index: {}]   ;;  %s217_s1 = inlined_call_operand.vmem [shape: f32[2,256], index: 1, kind: output, shape index: {}]  }
   0x1   :  { %v119_v0 = vld [vmem:[%s216_s0 + $0x7] ss:$16 sm:%s8_s6]   ;;  %v120_v1 = vld [vmem:[%s216_s0 - $0x11] ss:$16 sm:%s11_s7]   ;;  %s36_s12 = smov 3  ;;  %s39_s15 = smov 12 }
   0x2   :  { %v14_v2 = vsel %vm13_vm0, %v120_v1, %v119_v0  ;;  %v123_v3 = vld [vmem:[%s216_s0 + $0x5] ss:$16 sm:%s36_s12]   ;;  %s141_s16 = smov 112   ;;  %v124_v4 = vld [vmem:[%s216_s0 - $0x13] ss:$16 sm:%s39_s15]   ;;  %s22_s19 = smov 3 }
   0x3   :  { %15 = vrot.lane.b32.xlu0 %v14_v2, %s141_s16  ;;  %s25_s20 = smov 12  ;;  %v42_v5 = vsel %vm13_vm0, %v124_v4, %v123_v3  ;;  %v121_v6 = vld [vmem:[%s216_s0 + $0x6] ss:$16 sm:%s22_s19]   ;;  %s50_s25 = smov 3  ;;  %vm45_vm4 = vcmask 786048   ;;  %vm59_vm5 = vcmask 654848  }
   0x4   :  { %v122_v7 = vld [vmem:[%s216_s0 - $0x12] ss:$16 sm:%s25_s20]   ;;  %s142_s26 = smov 80   ;;  %v125_v9 = vld [vmem:[%s216_s0 + $0x4] ss:$16 sm:%s50_s25]   ;;  %s53_s29 = smov 12 }
   0x5   :  { %43 = vrot.lane.b32.xlu1 %v42_v5, %s142_s26  ;;  %v28_v8 = vsel %vm13_vm0, %v122_v7, %v121_v6  ;;  %v126_v10 = vld [vmem:[%s216_s0 - $0x14] ss:$16 sm:%s53_s29]   ;;  %s64_s3 = smov 3  ;;  %s67_s4 = smov 12  ;;  %vm73_vm6 = vcmask 523648   ;;  %vm87_vm7 = vcmask 392448  }
   0x6   :  { %s143_s5 = smov 96   ;;  %v56_v11 = vsel %vm13_vm0, %v126_v10, %v125_v9  ;;  %v127_v12 = vld [vmem:[%s216_s0 + $0x3] ss:$16 sm:%s64_s3]   ;;  %s78_s8 = smov 3  ;;  %v128_v13 = vld [vmem:[%s216_s0 - $0x15] ss:$16 sm:%s67_s4]  }
   0x7   :  { %29 = vrot.lane.b32.xlu0 %v28_v8, %s143_s5  ;;  %v129_v14 = vld [vmem:[%s216_s0 + $0x2] ss:$16 sm:%s78_s8]   ;;  %s81_s13 = smov 12  ;;  %s144_s14 = smov 64   ;;  %v70_v15 = vsel %vm13_vm0, %v128_v13, %v127_v12  ;;  %vm101_vm8 = vcmask 261248  }
   0x8   :  { %v130_v16 = vld [vmem:[%s216_s0 - $0x16] ss:$16 sm:%s81_s13]   ;;  %s92_s17 = smov 3  ;;  %s95_s18 = smov 12 }
   0x9   :  { %57 = vrot.lane.b32.xlu1 %v56_v11, %s144_s14  ;;  %v84_v17 = vsel %vm13_vm0, %v130_v16, %v129_v14  ;;  %v131_v18 = vld [vmem:[%s216_s0 + $0x1] ss:$16 sm:%s92_s17]   ;;  %s145_s23 = smov 48   ;;  %v2_v20 = vld [vmem:[%s216_s0] ss:$8 sm:$0xf]  }
   0xa   :  { %v132_v19 = vld [vmem:[%s216_s0 - $0x17] ss:$16 sm:%s95_s18]   ;;  %4 = vst.msk [vmem:[#allocation0] ss:$8 sm:$0x3] %vm3_vm1, %v2_v20   ;;  %s146_s0 = smov 32  }
   0xb   :  { %71 = vrot.lane.b32.xlu0 %v70_v15, %s145_s23  ;;  %v98_v21 = vsel %vm13_vm0, %v132_v19, %v131_v18  ;;  %6 = vst.msk [vmem:[#allocation0 - $0xf] ss:$8 sm:$0xc] %vm3_vm1, %v2_v20   ;;  %s147_s26 = smov 16  }
   0xd   :  { %85 = vrot.lane.b32.xlu1 %v84_v17, %s146_s0 }
   0xf   :  { %99 = vrot.lane.b32.xlu0 %v98_v21, %s147_s26 }
  0x75   :  { %v16_v22 = vpop.permute.xlu0 %15  }
  0x76   :  { %18 = vst.msk [vmem:[#allocation0] sm:$0x3] %vm17_vm2, %v16_v22   ;;  %20 = vst.msk [vmem:[#allocation0 + $0x6] sm:$0xc] %vm17_vm2, %v16_v22  }
  0x77   :  { %v44_v23 = vpop.permute.xlu1 %43  }
  0x79   :  { %v30_v24 = vpop.permute.xlu0 %29  }
  0x7a   :  { %32 = vst.msk [vmem:[#allocation0] sm:$0x3] %vm31_vm3, %v30_v24   ;;  %34 = vst.msk [vmem:[#allocation0 + $0x6] sm:$0xc] %vm31_vm3, %v30_v24  }
  0x7b   :  { %46 = vst.msk [vmem:[#allocation0] sm:$0x3] %vm45_vm4, %v44_v23   ;;  %48 = vst.msk [vmem:[#allocation0 + $0x6] sm:$0xc] %vm45_vm4, %v44_v23   ;;  %v58_v25 = vpop.permute.xlu1 %57  }
  0x7c   :  { %60 = vst.msk [vmem:[#allocation0] sm:$0x3] %vm59_vm5, %v58_v25   ;;  %62 = vst.msk [vmem:[#allocation0 + $0x6] sm:$0xc] %vm59_vm5, %v58_v25  }
  0x7d   :  { %v72_v26 = vpop.permute.xlu0 %71  }
  0x7e   :  { %74 = vst.msk [vmem:[#allocation0] sm:$0x3] %vm73_vm6, %v72_v26   ;;  %76 = vst.msk [vmem:[#allocation0 + $0x6] sm:$0xc] %vm73_vm6, %v72_v26  }
  0x7f   :  { %v86_v27 = vpop.permute.xlu1 %85  }
  0x80   :  { %88 = vst.msk [vmem:[#allocation0] sm:$0x3] %vm87_vm7, %v86_v27   ;;  %90 = vst.msk [vmem:[#allocation0 + $0x6] sm:$0xc] %vm87_vm7, %v86_v27  }
  0x81   :  { %v100_v28 = vpop.permute.xlu0 %99  }
  0x82   :  { %102 = vst.msk [vmem:[#allocation0] sm:$0x3] %vm101_vm8, %v100_v28   ;;  %104 = vst.msk [vmem:[#allocation0 + $0x6] sm:$0xc] %vm101_vm8, %v100_v28  }
  0x89   :  { %v109_v29 = vld [vmem:[#allocation0] sm:$0x3]  ;;  %v114_v30 = vld [vmem:[#allocation0 + $0x8] sm:$0x3] }
  0x8a   :  { %112 = vst [vmem:[%s217_s1] sm:$0x3] %v109_v29  ;;  %133 = vst [vmem:[%s217_s1 + $0x2] sm:$0x3] %v114_v30 }

// kernel: data_consistency_pallas.1
= control target key start
LH: loop header
LB: loop body
LE: loop exit
PB: predicated region body
PF: predicated region fallthrough
CT: control target
= control target key end

     0   :  { %12 = vsyncpa [#allocation3], 0  ;;  %s8953_s0 = inlined_call_operand.vmem [shape: f32[2,256], index: 0, kind: input, shape index: {}]   ;;  %s8954_s1 = inlined_call_operand.vmem [shape: f32[2,512], index: 1, kind: input, shape index: {}]   ;;  %s8955_s2 = inlined_call_operand.vmem [shape: f32[2,256], index: 2, kind: input, shape index: {}]   ;;  %s8956_s3 = inlined_call_operand.hbm [shape: f32[256,256], index: 3, kind: input, shape index: {}]   ;;  %s8957_s4 = inlined_call_operand.hbm [shape: f32[256,256], index: 4, kind: input, shape index: {}]   ;;  %s8958_s5 = inlined_call_operand.vmem [shape: f32[2,256], index: 5, kind: output, shape index: {0}]   ;;  %s8959_s6 = inlined_call_operand.vmem [shape: f32[2,512], index: 6, kind: output, shape index: {1}]  }
   0x1   :  { %13 = vsyncpa [#allocation5], 0  ;;  %s5459_s21 = smov [#allocation2]  }
   0x2   :  { %s25_s22 = sshll.u32 %s5459_s21, 4  ;;  %s26_s22 = int_to_ptr.vmem [resolvable:$true] %s25_s22 }
   0x3   :  { %s5423_s23 = scalar_lea.vmem %s26_s22, 8192  ;;  %p5428_p1 = scmp.lt.s32.totalorder %s26_s22, %s26_s22 }
   0x4   :  { %p5424_p0 = scmp.ne.s32.totalorder %s26_s22, %s5423_s23  ;;  %p5429_p2 = scmp.lt.s32.totalorder %s5423_s23, %s5423_s23 }
   0x6   :  { %p5430_p3 = por %p5429_p2, %p5428_p1 }
   0x8   :  { %p5431_p4 = pnand %p5430_p3, %p5424_p0 }
   0xa   :  { %5434 = shalt.err (!%p5431_p4)
}
   0xb   :  { %s5460_s24 = smov 256   ;;  %s5461_s25 = smov 16  }
   0xc   :  { %31 = dma.hbm_to_vmem [thread:$0]  %s8956_s3, 8192, %s26_s22, [#allocation3], %s5460_s24, %s5460_s24, %s5461_s25  }
   0xd   :  { %s5462_s28 = smov [#allocation4]  }
   0xe   :  { %s37_s29 = sshll.u32 %s5462_s28, 4  ;;  %s38_s29 = int_to_ptr.vmem [resolvable:$true] %s37_s29 }
   0xf   :  { %s5443_s30 = scalar_lea.vmem %s38_s29, 8192  ;;  %p5448_p6 = scmp.lt.s32.totalorder %s38_s29, %s38_s29 }
  0x10   :  { %p5444_p5 = scmp.ne.s32.totalorder %s38_s29, %s5443_s30  ;;  %p5449_p7 = scmp.lt.s32.totalorder %s5443_s30, %s5443_s30 }
  0x12   :  { %p5450_p8 = por %p5449_p7, %p5448_p6 }
  0x14   :  { %p5451_p9 = pnand %p5450_p8, %p5444_p5 }
  0x16   :  { %5454 = shalt.err (!%p5451_p9)
}
  0x17   :  { %43 = dma.hbm_to_vmem [thread:$0]  %s8957_s4, 8192, %s38_s29, [#allocation5], %s5460_s24, %s5460_s24, %s5461_s25  }
  0x18   :  { %5455 = dma.done.wait [#allocation3], 8192  }
  0x19   :  { %5456 = vsyncadd [#allocation3], 4294959104 }
  0x1a   :  { %5457 = dma.done.wait [#allocation5], 8192  }
  0x1b   :  { %5458 = vsyncadd [#allocation5], 4294959104  ;;  %v83_v0 = vld [vmem:[#allocation2 + $0xf8] sm:$0xff]  ;;  %v82_v1 = vld [vmem:[#allocation2 + $0xf0] sm:$0xff] }
  0x1c   :  { %v81_v2 = vld [vmem:[#allocation2 + $0xe8] sm:$0xff]  ;;  %v5505_v3 = vand.u32 4294901760, %v83_v0  ;;  %v5507_v4 = vand.u32 4294901760, %v82_v1  ;;  %v80_v6 = vld [vmem:[#allocation2 + $0xe0] sm:$0xff]  ;;  %v79_v7 = vld [vmem:[#allocation2 + $0xd8] sm:$0xff] }
  0x1d   :  { %v5509_v5 = vand.u32 4294901760, %v81_v2  ;;  %v78_v8 = vld [vmem:[#allocation2 + $0xd0] sm:$0xff]  ;;  %v5511_v9 = vand.u32 4294901760, %v80_v6  ;;  %v5513_v10 = vand.u32 4294901760, %v79_v7  ;;  %v77_v12 = vld [vmem:[#allocation2 + $0xc8] sm:$0xff]  ;;  %v76_v13 = vld [vmem:[#allocation2 + $0xc0] sm:$0xff] }
  0x1e   :  { %9907 = vst [vmem:[#allocation8_spill] sm:$0xff] %v5505_v3  ;;  %9908 = vst [vmem:[#allocation9_spill] sm:$0xff] %v5507_v4  ;;  %v5515_v11 = vand.u32 4294901760, %v78_v8  ;;  %v75_v14 = vld [vmem:[#allocation2 + $0xb8] sm:$0xff]  ;;  %194 = vmatprep.subr.mxu0 %v5505_v3  ;;  %v5518_v15 = vand.u32 4294901760, %v77_v12  ;;  %v5520_v16 = vand.u32 4294901760, %v76_v13  ;;  %v5525_v18 = vsub.f32 %v83_v0, %v5505_v3 }
  0x1f   :  { %9909 = vst [vmem:[#allocation10_spill] sm:$0xff] %v5509_v5  ;;  %9910 = vst [vmem:[#allocation11_spill] sm:$0xff] %v5511_v9  ;;  %v5522_v17 = vand.u32 4294901760, %v75_v14  ;;  %v5527_v19 = vld [vmem:[#allocation2 + $0xb0] sm:$0xff]  ;;  %v5529_v20 = vld [vmem:[#allocation2 + $0xa8] sm:$0xff]  ;;  %196 = vmatpush1.msra.mxu0 %v5507_v4  ;;  %v5538_v23 = vsub.f32 %v82_v1, %v5507_v4  ;;  %v5544_v25 = vsub.f32 %v81_v2, %v5509_v5 }
  0x20   :  { %9911 = vst [vmem:[#allocation12_spill] sm:$0xff] %v5513_v10  ;;  %9912 = vst [vmem:[#allocation13_spill] sm:$0xff] %v5515_v11  ;;  %v5531_v21 = vld [vmem:[#allocation2 + $0xa0] sm:$0xff]  ;;  %v5535_v22 = vand.u32 4294901760, %v5527_v19  ;;  %v5541_v24 = vand.u32 4294901760, %v5529_v20  ;;  %v5546_v26 = vld [vmem:[#allocation2 + $0x98] sm:$0xff]  ;;  %198 = vmatprep.subr.mxu0 %v5509_v5  ;;  %v5560_v31 = vsub.f32 %v80_v6, %v5511_v9  ;;  %v5573_v35 = vsub.f32 %v79_v7, %v5513_v10 }
  0x21   :  { %9913 = vst [vmem:[#allocation14_spill] sm:$0xff] %v5518_v15  ;;  %9914 = vst [vmem:[#allocation15_spill] sm:$0xff] %v5520_v16  ;;  %v5548_v27 = vld [vmem:[#allocation2 + $0x90] sm:$0xff]  ;;  %v5550_v28 = vld [vmem:[#allocation2 + $0x88] sm:$0xff]  ;;  %v5554_v29 = vand.u32 4294901760, %v5525_v18  ;;  %v5557_v30 = vand.u32 4294901760, %v5531_v21  ;;  %200 = vmatpush1.msra.mxu0 %v5511_v9  ;;  %v5587_v40 = vsub.f32 %v78_v8, %v5515_v11  ;;  %v5601_v45 = vsub.f32 %v77_v12, %v5518_v15 }
  0x22   :  { %9915 = vst [vmem:[#allocation16_spill] sm:$0xff] %v5522_v17  ;;  %9916 = vst [vmem:[#allocation17_spill] sm:$0xff] %v5525_v18  ;;  %v5563_v32 = vand.u32 4294901760, %v5546_v26  ;;  %v5567_v33 = vand.u32 4294901760, %v5538_v23  ;;  %v5570_v34 = vand.u32 4294901760, %v5544_v25  ;;  %v5576_v36 = vand.u32 4294901760, %v5548_v27  ;;  %202 = vmatprep.subr.mxu0 %v5513_v10 }
  0x23   :  { %9917 = vst [vmem:[#allocation18_spill] sm:$0xff] %v5535_v22  ;;  %9918 = vst [vmem:[#allocation19_spill] sm:$0xff] %v5538_v23  ;;  %v5578_v37 = vld [vmem:[#allocation2 + $0x80] sm:$0xff]  ;;  %v341_v38 = vsub.f32 %v5525_v18, %v5554_v29  ;;  %v5584_v39 = vand.u32 4294901760, %v5560_v31  ;;  %v5590_v41 = vand.u32 4294901760, %v5550_v28  ;;  %204 = vmatpush1.msra.mxu0 %v5515_v11  ;;  %v5598_v44 = vand.u32 4294901760, %v5573_v35 }
  0x24   :  { %9919 = vst [vmem:[#allocation20_spill] sm:$0xff] %v5541_v24  ;;  %9920 = vst [vmem:[#allocation21_spill] sm:$0xff] %v5544_v25  ;;  %v347_v42 = vsub.f32 %v5538_v23, %v5567_v33  ;;  %v353_v43 = vsub.f32 %v5544_v25, %v5570_v34  ;;  %v5603_v46 = vld [vmem:[#allocation2 + $0x78] sm:$0xff]  ;;  %206 = vmatprep.subr.mxu0 %v5518_v15  ;;  %v5611_v49 = vand.u32 4294901760, %v5587_v40  ;;  %v5614_v50 = vand.u32 4294901760, %v5578_v37  ;;  %v5616_v51 = vld [vmem:[#allocation2 + $0x70] sm:$0xff] }
  0x25   :  { %9921 = vst [vmem:[#allocation22_spill] sm:$0xff] %v5554_v29  ;;  %9922 = vst [vmem:[#allocation23_spill] sm:$0xff] %v5557_v30  ;;  %v5606_v47 = vand.u32 4294901760, %v341_v38  ;;  %v359_v48 = vsub.f32 %v5560_v31, %v5584_v39  ;;  %208 = vmatpush1.msra.mxu0 %v5520_v16  ;;  %v365_v54 = vsub.f32 %v5573_v35, %v5598_v44  ;;  %v5626_v55 = vand.u32 4294901760, %v5601_v45  ;;  %v5628_v56 = vld [vmem:[#allocation2 + $0x68] sm:$0xff]  ;;  %v5642_v61 = vld [vmem:[#allocation2 + $0x60] sm:$0xff] }
  0x26   :  { %9923 = vst [vmem:[#allocation24_spill] sm:$0xff] %v5560_v31  ;;  %9924 = vst [vmem:[#allocation25_spill] sm:$0xff] %v5563_v32  ;;  %v5619_v52 = vand.u32 4294901760, %v347_v42  ;;  %v5621_v53 = vand.u32 4294901760, %v353_v43  ;;  %210 = vmatprep.subr.mxu0 %v5522_v17  ;;  %v371_v58 = vsub.f32 %v5587_v40, %v5611_v49  ;;  %v5637_v59 = vsub.f32 %v76_v13, %v5520_v16  ;;  %v5656_v2 = vld [vmem:[#allocation2 + $0x58] sm:$0xff]  ;;  %v5672_v13 = vld [vmem:[#allocation2 + $0x50] sm:$0xff] }
  0x27   :  { %9925 = vst [vmem:[#allocation26_spill] sm:$0xff] %v5567_v33  ;;  %9926 = vst [vmem:[#allocation27_spill] sm:$0xff] %v5570_v34  ;;  %343 = vmatprep.subr.mxu1 %v5606_v47  ;;  %v5632_v57 = vand.u32 4294901760, %v359_v48  ;;  %v5640_v60 = vand.u32 4294901760, %v5603_v46  ;;  %212 = vmatpush1.msra.mxu0 %v5535_v22  ;;  %v5646_v62 = vand.u32 4294901760, %v365_v54  ;;  %v377_v63 = vsub.f32 %v5601_v45, %v5626_v55  ;;  %v5788_v34 = vld [vmem:[#allocation2 + $0x20] sm:$0xff] }
  0x28   :  { %9927 = vst [vmem:[#allocation28_spill] sm:$0xff] %v5573_v35  ;;  %9928 = vst [vmem:[#allocation29_spill] sm:$0xff] %v5576_v36  ;;  %349 = vmatpush1.msra.mxu1 %v5619_v52  ;;  %v5651_v0 = vsub.f32 %v75_v14, %v5522_v17  ;;  %v5654_v1 = vand.u32 4294901760, %v5616_v51  ;;  %214 = vmatprep.subr.mxu0 %v5541_v24  ;;  %v5660_v6 = vand.u32 4294901760, %v371_v58  ;;  %v5663_v7 = vand.u32 4294901760, %v5637_v59  ;;  %v5702_v58 = vld [vmem:[#allocation2 + $0x48] sm:$0xff] }
  0x29   :  { %9929 = vst [vmem:[#allocation30_spill] sm:$0xff] %v5584_v39  ;;  %9930 = vst [vmem:[#allocation31_spill] sm:$0xff] %v5587_v40  ;;  %355 = vmatprep.subr.mxu1 %v5621_v53  ;;  %v5667_v8 = vsub.f32 %v5527_v19, %v5535_v22  ;;  %v5670_v12 = vand.u32 4294901760, %v5628_v56  ;;  %216 = vmatpush1.msra.mxu0 %v5557_v30  ;;  %v5676_v14 = vand.u32 4294901760, %v377_v63  ;;  %v5686_v19 = vand.u32 4294901760, %v5642_v61  ;;  %v5804_v33 = vld [vmem:[#allocation2 + $0x18] sm:$0xff] }
  0x2a   :  { %9931 = vst [vmem:[#allocation32_spill] sm:$0xff] %v5590_v41  ;;  %9932 = vst [vmem:[#allocation33_spill] sm:$0xff] %v5598_v44  ;;  %361 = vmatpush1.msra.mxu1 %v5632_v57  ;;  %v5679_v38 = vand.u32 4294901760, %v5651_v0  ;;  %v5683_v42 = vsub.f32 %v5529_v20, %v5541_v24  ;;  %218 = vmatprep.subr.mxu0 %v5563_v32  ;;  %v383_v43 = vsub.f32 %v5637_v59, %v5663_v7 }
  0x2b   :  { %9933 = vst [vmem:[#allocation34_spill] sm:$0xff] %v5601_v45  ;;  %9934 = vst [vmem:[#allocation35_spill] sm:$0xff] %v5606_v47  ;;  %367 = vmatprep.subr.mxu1 %v5646_v62  ;;  %v5693_v48 = vand.u32 4294901760, %v5667_v8  ;;  %v5697_v54 = vsub.f32 %v5531_v21, %v5557_v30  ;;  %v5700_v20 = vand.u32 4294901760, %v5656_v2  ;;  %220 = vmatpush1.msra.mxu0 %v5576_v36  ;;  %v5716_v21 = vand.u32 4294901760, %v5672_v13 }
  0x2c   :  { %9935 = vst [vmem:[#allocation36_spill] sm:$0xff] %v5611_v49  ;;  %9936 = vst [vmem:[#allocation37_spill] sm:$0xff] %v5614_v50  ;;  %373 = vmatpush1.msra.mxu1 %v5660_v6  ;;  %v389_v63 = vsub.f32 %v5651_v0, %v5679_v38  ;;  %222 = vmatprep.subr.mxu0 %v5590_v41  ;;  %v5729_v47 = vsub.f32 %v5548_v27, %v5576_v36  ;;  %v5759_v49 = vld [vmem:[#allocation2 + $0x30] sm:$0xff]  ;;  %v5877_v36 = vld [vmem:[#allocation2] sm:$0xff] }
  0x2d   :  { %9937 = vst [vmem:[#allocation38_spill] sm:$0xff] %v5619_v52  ;;  %9938 = vst [vmem:[#allocation39_spill] sm:$0xff] %v5621_v53  ;;  %379 = vmatprep.subr.mxu1 %v5676_v14  ;;  %v5720_v53 = vand.u32 4294901760, %v383_v43  ;;  %v5725_v52 = vand.u32 4294901760, %v5697_v54  ;;  %224 = vmatpush1.msra.mxu0 %v5614_v50  ;;  %v5772_v44 = vsub.f32 %v5578_v37, %v5614_v50 }
  0x2e   :  { %9939 = vst [vmem:[#allocation40_spill] sm:$0xff] %v5626_v55  ;;  %9940 = vst [vmem:[#allocation41_spill] sm:$0xff] %v5632_v57  ;;  %v5713_v57 = vsub.f32 %v5546_v26, %v5563_v32  ;;  %v5731_v26 = vld [vmem:[#allocation2 + $0x40] sm:$0xff]  ;;  %226 = vmatprep.subr.mxu0 %v5640_v60  ;;  %v5753_v55 = vand.u32 4294901760, %v5729_v47  ;;  %v5814_v29 = vsub.f32 %v5616_v51, %v5654_v1  ;;  %v5831_v51 = vand.u32 4294901760, %v5788_v34  ;;  %v5891_v32 = vld [vmem:[#allocation2 + $0x1f8] sm:$0xff] }
  0x2f   :  { %9941 = vst [vmem:[#allocation42_spill] sm:$0xff] %v5637_v59  ;;  %9942 = vst [vmem:[#allocation43_spill] sm:$0xff] %v5640_v60  ;;  %385 = vmatpush1.msra.mxu1 %v5720_v53  ;;  %228 = vmatpush1.msra.mxu0 %v5654_v1 }
  0x30   :  { %9943 = vst [vmem:[#allocation44_spill] sm:$0xff] %v5646_v62  ;;  %9944 = vst [vmem:[#allocation45_spill] sm:$0xff] %v5651_v0  ;;  %v5709_v62 = vand.u32 4294901760, %v5683_v42  ;;  %230 = vmatprep.subr.mxu0 %v5670_v12 }
  0x31   :  { %9945 = vst [vmem:[#allocation46_spill] sm:$0xff] %v5654_v1  ;;  %9946 = vst [vmem:[#allocation47_spill] sm:$0xff] %v5660_v6  ;;  %v395_v6 = vsub.f32 %v5667_v8, %v5693_v48  ;;  %232 = vmatpush1.msra.mxu0 %v5686_v19  ;;  %v5833_v1 = vld [vmem:[#allocation2 + $0x10] sm:$0xff] }
  0x32   :  { %9947 = vst [vmem:[#allocation48_spill] sm:$0xff] %v5663_v7  ;;  %9948 = vst [vmem:[#allocation49_spill] sm:$0xff] %v5667_v8  ;;  %v401_v43 = vsub.f32 %v5683_v42, %v5709_v62  ;;  %v5744_v7 = vld [vmem:[#allocation2 + $0x38] sm:$0xff]  ;;  %234 = vmatprep.subr.mxu0 %v5700_v20 }
  0x33   :  { %9949 = vst [vmem:[#allocation50_spill] sm:$0xff] %v5670_v12  ;;  %9950 = vst [vmem:[#allocation51_spill] sm:$0xff] %v5676_v14  ;;  %v5739_v14 = vand.u32 4294901760, %v5713_v57  ;;  %v5748_v27 = vand.u32 4294901760, %v395_v6  ;;  %v5786_v39 = vand.u32 4294901760, %v5744_v7  ;;  %236 = vmatpush1.msra.mxu0 %v5716_v21 }
  0x34   :  { %9951 = vst [vmem:[#allocation52_spill] sm:$0xff] %v5679_v38  ;;  %9952 = vst [vmem:[#allocation53_spill] sm:$0xff] %v5683_v42  ;;  %v5734_v38 = vand.u32 4294901760, %v389_v63  ;;  %v407_v63 = vsub.f32 %v5697_v54, %v5725_v52 }
  0x35   :  { %9953 = vst [vmem:[#allocation54_spill] sm:$0xff] %v5686_v19  ;;  %9954 = vst [vmem:[#allocation55_spill] sm:$0xff] %v5693_v48  ;;  %v5742_v48 = vand.u32 4294901760, %v5702_v58  ;;  %v413_v6 = vsub.f32 %v5713_v57, %v5739_v14 }
  0x36   :  { %9955 = vst [vmem:[#allocation56_spill] sm:$0xff] %v5697_v54  ;;  %9956 = vst [vmem:[#allocation57_spill] sm:$0xff] %v5700_v20  ;;  %391 = vmatprep.subr.mxu1 %v5734_v38 }
  0x37   :  { %9957 = vst [vmem:[#allocation58_spill] sm:$0xff] %v5709_v62  ;;  %9958 = vst [vmem:[#allocation59_spill] sm:$0xff] %v5713_v57  ;;  %v5757_v62 = vsub.f32 %v5550_v28, %v5590_v41  ;;  %v5774_v28 = vld [vmem:[#allocation2 + $0x28] sm:$0xff]  ;;  %397 = vmatpush1.msra.mxu1 %v5748_v27  ;;  %v5792_v37 = vand.u32 4294901760, %v413_v6  ;;  %238 = vmatprep.subr.mxu0 %v5742_v48  ;;  %v5861_v41 = vsub.f32 %v5656_v2, %v5700_v20 }
  0x38   :  { %9959 = vst [vmem:[#allocation60_spill] sm:$0xff] %v5716_v21  ;;  %9960 = vst [vmem:[#allocation61_spill] sm:$0xff] %v5720_v53  ;;  %v5763_v53 = vand.u32 4294901760, %v401_v43  ;;  %v419_v43 = vsub.f32 %v5729_v47, %v5753_v55 }
  0x39   :  { %9961 = vst [vmem:[#allocation62_spill] sm:$0xff] %v5725_v52  ;;  %9962 = vst [vmem:[#allocation63_spill] sm:$0xff] %v5729_v47  ;;  %v5768_v52 = vand.u32 4294901760, %v5731_v26 }
  0x3a   :  { %9963 = vst [vmem:[#allocation64_spill] sm:$0xff] %v5734_v38  ;;  %9964 = vst [vmem:[#allocation65_spill] sm:$0xff] %v5739_v14  ;;  %v5778_v38 = vand.u32 4294901760, %v407_v63  ;;  %v5783_v14 = vand.u32 4294901760, %v5757_v62  ;;  %403 = vmatprep.subr.mxu1 %v5763_v53  ;;  %v5795_v63 = vand.u32 4294901760, %v5772_v44 }
  0x3b   :  { %9965 = vst [vmem:[#allocation66_spill] sm:$0xff] %v5742_v48  ;;  %9966 = vst [vmem:[#allocation67_spill] sm:$0xff] %v5748_v27  ;;  %v5799_v27 = vsub.f32 %v5603_v46, %v5640_v60  ;;  %v5817_v46 = vand.u32 4294901760, %v5774_v28  ;;  %v5844_v60 = vsub.f32 %v5642_v61, %v5686_v19  ;;  %240 = vmatpush1.msra.mxu0 %v5768_v52  ;;  %v5871_v19 = vand.u32 4294901760, %v5833_v1 }
  0x3c   :  { %9967 = vst [vmem:[#allocation68_spill] sm:$0xff] %v5753_v55  ;;  %9968 = vst [vmem:[#allocation69_spill] sm:$0xff] %v5757_v62  ;;  %v5802_v55 = vand.u32 4294901760, %v5759_v49  ;;  %409 = vmatpush1.msra.mxu1 %v5778_v38  ;;  %v425_v6 = vsub.f32 %v5757_v62, %v5783_v14  ;;  %242 = vmatprep.subr.mxu0 %v5786_v39 }
  0x3d   :  { %9969 = vst [vmem:[#allocation70_spill] sm:$0xff] %v5763_v53  ;;  %9970 = vst [vmem:[#allocation71_spill] sm:$0xff] %v5768_v52  ;;  %v5808_v53 = vand.u32 4294901760, %v419_v43  ;;  %415 = vmatprep.subr.mxu1 %v5792_v37  ;;  %v5824_v43 = vand.u32 4294901760, %v5799_v27 }
  0x3e   :  { %9971 = vst [vmem:[#allocation72_spill] sm:$0xff] %v5772_v44  ;;  %9972 = vst [vmem:[#allocation73_spill] sm:$0xff] %v5778_v38  ;;  %v431_v38 = vsub.f32 %v5772_v44, %v5795_v63  ;;  %244 = vmatpush1.msra.mxu0 %v5802_v55 }
  0x3f   :  { %9973 = vst [vmem:[#allocation74_spill] sm:$0xff] %v5783_v14  ;;  %9974 = vst [vmem:[#allocation75_spill] sm:$0xff] %v5786_v39  ;;  %v5828_v14 = vsub.f32 %v5628_v56, %v5670_v12  ;;  %421 = vmatpush1.msra.mxu1 %v5808_v53  ;;  %v5847_v56 = vand.u32 4294901760, %v5804_v33  ;;  %v5849_v12 = vld [vmem:[#allocation2 + $0x8] sm:$0xff]  ;;  %246 = vmatprep.subr.mxu0 %v5817_v46 }
  0x40   :  { %9975 = vst [vmem:[#allocation76_spill] sm:$0xff] %v5792_v37  ;;  %9976 = vst [vmem:[#allocation77_spill] sm:$0xff] %v5795_v63  ;;  %v5837_v37 = vand.u32 4294901760, %v425_v6  ;;  %v5840_v63 = vand.u32 4294901760, %v5814_v29  ;;  %v5852_v50 = vand.u32 4294901760, %v431_v38  ;;  %v437_v6 = vsub.f32 %v5799_v27, %v5824_v43  ;;  %248 = vmatpush1.msra.mxu0 %v5831_v51 }
  0x41   :  { %9977 = vst [vmem:[#allocation78_spill] sm:$0xff] %v5799_v27  ;;  %9978 = vst [vmem:[#allocation79_spill] sm:$0xff] %v5802_v55  ;;  %v5868_v38 = vand.u32 4294901760, %v5844_v60  ;;  %v5889_v20 = vand.u32 4294901760, %v5849_v12  ;;  %250 = vmatprep.subr.mxu0 %v5847_v56 }
  0x42   :  { %9979 = vst [vmem:[#allocation80_spill] sm:$0xff] %v5808_v53  ;;  %9980 = vst [vmem:[#allocation81_spill] sm:$0xff] %v5814_v29  ;;  %v5857_v53 = vand.u32 4294901760, %v5828_v14  ;;  %427 = vmatprep.subr.mxu1 %v5837_v37  ;;  %v443_v61 = vsub.f32 %v5814_v29, %v5840_v63  ;;  %v5880_v2 = vand.u32 4294901760, %v437_v6  ;;  %252 = vmatpush1.msra.mxu0 %v5871_v19 }
  0x43   :  { %9981 = vst [vmem:[#allocation82_spill] sm:$0xff] %v5817_v46  ;;  %9982 = vst [vmem:[#allocation83_spill] sm:$0xff] %v5824_v43  ;;  %v5875_v43 = vsub.f32 %v5672_v13, %v5716_v21  ;;  %433 = vmatpush1.msra.mxu1 %v5852_v50  ;;  %v455_v6 = vsub.f32 %v5844_v60, %v5868_v38  ;;  %v5905_v21 = vld [vmem:[#allocation2 + $0x1f0] sm:$0xff]  ;;  %254 = vmatprep.subr.mxu0 %v5889_v20 }
  0x44   :  { %9983 = vst [vmem:[#allocation84_spill] sm:$0xff] %v5828_v14  ;;  %9984 = vst [vmem:[#allocation85_spill] sm:$0xff] %v5831_v51  ;;  %v5893_v13 = vand.u32 4294901760, %v443_v61  ;;  %439 = vmatprep.subr.mxu1 %v5880_v2 }
  0x45   :  { %9985 = vst [vmem:[#allocation86_spill] sm:$0xff] %v5837_v37  ;;  %9986 = vst [vmem:[#allocation87_spill] sm:$0xff] %v5840_v63  ;;  %v449_v37 = vsub.f32 %v5828_v14, %v5857_v53  ;;  %v5886_v63 = vand.u32 4294901760, %v5861_v41 }
  0x46   :  { %9987 = vst [vmem:[#allocation88_spill] sm:$0xff] %v5844_v60  ;;  %9988 = vst [vmem:[#allocation89_spill] sm:$0xff] %v5847_v56  ;;  %v5918_v60 = vsub.f32 %v5731_v26, %v5768_v52  ;;  %445 = vmatpush1.msra.mxu1 %v5893_v13  ;;  %v5950_v52 = vld [vmem:[#allocation2 + $0x1d8] sm:$0xff] }
  0x47   :  { %9989 = vst [vmem:[#allocation90_spill] sm:$0xff] %v5852_v50  ;;  %9990 = vst [vmem:[#allocation91_spill] sm:$0xff] %v5857_v53  ;;  %v5899_v50 = vand.u32 4294901760, %v5875_v43  ;;  %v5903_v53 = vsub.f32 %v5702_v58, %v5742_v48  ;;  %v5908_v30 = vand.u32 4294901760, %v449_v37  ;;  %v461_v61 = vsub.f32 %v5861_v41, %v5886_v63  ;;  %v5920_v58 = vld [vmem:[#allocation2 + $0x1e8] sm:$0xff] }
  0x48   :  { %9991 = vst [vmem:[#allocation92_spill] sm:$0xff] %v5861_v41  ;;  %9992 = vst [vmem:[#allocation93_spill] sm:$0xff] %v5868_v38  ;;  %v5914_v38 = vand.u32 4294901760, %v5877_v36  ;;  %v5923_v48 = vand.u32 4294901760, %v455_v6  ;;  %v5934_v41 = vld [vmem:[#allocation2 + $0x1e0] sm:$0xff]  ;;  %v5941_v6 = vand.u32 4294901760, %v5918_v60 }
  0x49   :  { %9993 = vst [vmem:[#allocation94_spill] sm:$0xff] %v5871_v19  ;;  %9994 = vst [vmem:[#allocation95_spill] sm:$0xff] %v5875_v43  ;;  %v467_v37 = vsub.f32 %v5875_v43, %v5899_v50  ;;  %451 = vmatprep.subr.mxu1 %v5908_v30  ;;  %v5937_v26 = vand.u32 4294901760, %v461_v61 }
  0x4a   :  { %9995 = vst [vmem:[#allocation96_spill] sm:$0xff] %v5880_v2  ;;  %9996 = vst [vmem:[#allocation97_spill] sm:$0xff] %v5886_v63  ;;  %v5929_v2 = vand.u32 4294901760, %v5903_v53  ;;  %v5932_v63 = vand.u32 4294901760, %v5891_v32  ;;  %457 = vmatpush1.msra.mxu1 %v5923_v48  ;;  %256 = vmatpush1.msra.mxu0 %v5914_v38 }
  0x4b   :  { %9997 = vst [vmem:[#allocation98_spill] sm:$0xff] %v5889_v20  ;;  %9998 = vst [vmem:[#allocation99_spill] sm:$0xff] %v5893_v13  ;;  %v5945_v13 = vsub.f32 %v5744_v7, %v5786_v39  ;;  %v5953_v43 = vand.u32 4294901760, %v467_v37  ;;  %v5963_v7 = vand.u32 4294901760, %v5920_v58  ;;  %463 = vmatprep.subr.mxu1 %v5937_v26  ;;  %v479_v37 = vsub.f32 %v5918_v60, %v5941_v6 }
  0x4c   :  { %9999 = vst [vmem:[#allocation100_spill] sm:$0xff] %v5899_v50  ;;  %10000 = vst [vmem:[#allocation101_spill] sm:$0xff] %v5903_v53  ;;  %v5948_v50 = vand.u32 4294901760, %v5905_v21  ;;  %v473_v61 = vsub.f32 %v5903_v53, %v5929_v2  ;;  %258 = vmatprep.subr.mxu0 %v5932_v63  ;;  %v5990_v39 = vsub.f32 %v5788_v34, %v5831_v51 }
  0x4d   :  { %10001 = vst [vmem:[#allocation102_spill] sm:$0xff] %v5908_v30  ;;  %10002 = vst [vmem:[#allocation103_spill] sm:$0xff] %v5914_v38  ;;  %v5960_v30 = vsub.f32 %v5759_v49, %v5802_v55  ;;  %v5977_v49 = vand.u32 4294901760, %v5934_v41  ;;  %v5979_v55 = vld [vmem:[#allocation2 + $0x1d0] sm:$0xff]  ;;  %469 = vmatpush1.msra.mxu1 %v5953_v43  ;;  %v6007_v53 = vsub.f32 %v5804_v33, %v5847_v56 }
  0x4e   :  { %10003 = vst [vmem:[#allocation104_spill] sm:$0xff] %v5918_v60  ;;  %10004 = vst [vmem:[#allocation105_spill] sm:$0xff] %v5923_v48  ;;  %v5970_v48 = vand.u32 4294901760, %v5945_v13  ;;  %v5997_v60 = vand.u32 4294901760, %v479_v37  ;;  %260 = vmatpush2.msra.mxu0 %v5948_v50  ;;  %v6014_v37 = vand.u32 4294901760, %v5990_v39  ;;  %v6021_v51 = vsub.f32 %v5833_v1, %v5871_v19  ;;  %v6051_v19 = vld [vmem:[#allocation2 + $0x1b0] sm:$0xff] }
  0x4f   :  { %10005 = vst [vmem:[#allocation106_spill] sm:$0xff] %v5929_v2  ;;  %10006 = vst [vmem:[#allocation107_spill] sm:$0xff] %v5932_v63  ;;  %v5974_v2 = vsub.f32 %v5774_v28, %v5817_v46  ;;  %v5993_v28 = vand.u32 4294901760, %v5950_v52  ;;  %v5995_v46 = vld [vmem:[#allocation2 + $0x1c8] sm:$0xff]  ;;  %262 = vmatprep.subr.mxu0 %v5963_v7 }
  0x50   :  { %10007 = vst [vmem:[#allocation108_spill] sm:$0xff] %v5937_v26  ;;  %10008 = vst [vmem:[#allocation109_spill] sm:$0xff] %v5941_v6  ;;  %v5982_v26 = vand.u32 4294901760, %v473_v61  ;;  %v5986_v6 = vand.u32 4294901760, %v5960_v30  ;;  %v485_v61 = vsub.f32 %v5945_v13, %v5970_v48  ;;  %264 = vmatpush2.msra.mxu0 %v5977_v49  ;;  %v6035_v56 = vand.u32 4294901760, %v5995_v46 }
  0x51   :  { %10009 = vst [vmem:[#allocation110_spill] sm:$0xff] %v5945_v13  ;;  %10010 = vst [vmem:[#allocation111_spill] sm:$0xff] %v5948_v50  ;;  %v6023_v13 = vld [vmem:[#allocation2 + $0x1c0] sm:$0xff]  ;;  %266 = vmatprep.subr.mxu0 %v5993_v28 }
  0x52   :  { %10011 = vst [vmem:[#allocation112_spill] sm:$0xff] %v5953_v43  ;;  %10012 = vst [vmem:[#allocation113_spill] sm:$0xff] %v5960_v30  ;;  %v6003_v43 = vand.u32 4294901760, %v5974_v2  ;;  %475 = vmatprep.subr.mxu1 %v5982_v26  ;;  %v491_v34 = vsub.f32 %v5960_v30, %v5986_v6  ;;  %v6026_v33 = vand.u32 4294901760, %v485_v61  ;;  %v6037_v30 = vld [vmem:[#allocation2 + $0x1b8] sm:$0xff]  ;;  %v6045_v61 = vand.u32 4294901760, %v6021_v51 }
  0x53   :  { %10013 = vst [vmem:[#allocation114_spill] sm:$0xff] %v5963_v7  ;;  %10014 = vst [vmem:[#allocation115_spill] sm:$0xff] %v5970_v48  ;;  %v6017_v48 = vand.u32 4294901760, %v5979_v55  ;;  %481 = vmatpush1.msra.mxu1 %v5997_v60 }
  0x54   :  { %10015 = vst [vmem:[#allocation116_spill] sm:$0xff] %v5974_v2  ;;  %10016 = vst [vmem:[#allocation117_spill] sm:$0xff] %v5977_v49  ;;  %v6039_v1 = vand.u32 4294901760, %v491_v34  ;;  %487 = vmatprep.subr.mxu1 %v6026_v33 }
  0x55   :  { %10017 = vst [vmem:[#allocation118_spill] sm:$0xff] %v5982_v26  ;;  %10018 = vst [vmem:[#allocation119_spill] sm:$0xff] %v5986_v6  ;;  %v497_v26 = vsub.f32 %v5974_v2, %v6003_v43  ;;  %v6032_v6 = vand.u32 4294901760, %v6007_v53  ;;  %268 = vmatpush2.msra.mxu0 %v6017_v48 }
  0x56   :  { %10019 = vst [vmem:[#allocation120_spill] sm:$0xff] %v5990_v39  ;;  %10020 = vst [vmem:[#allocation121_spill] sm:$0xff] %v5993_v28  ;;  %493 = vmatpush1.msra.mxu1 %v6039_v1  ;;  %270 = vmatprep.subr.mxu0 %v6035_v56 }
  0x57   :  { %10021 = vst [vmem:[#allocation122_spill] sm:$0xff] %v5997_v60  ;;  %10022 = vst [vmem:[#allocation123_spill] sm:$0xff] %v6003_v43  ;;  %v503_v60 = vsub.f32 %v5990_v39, %v6014_v37  ;;  %v6049_v43 = vsub.f32 %v5849_v12, %v5889_v20  ;;  %v6054_v2 = vand.u32 4294901760, %v497_v26  ;;  %v509_v34 = vsub.f32 %v6007_v53, %v6032_v6  ;;  %v6066_v12 = vld [vmem:[#allocation2 + $0x1a8] sm:$0xff] }
  0x58   :  { %10023 = vst [vmem:[#allocation124_spill] sm:$0xff] %v6007_v53  ;;  %10024 = vst [vmem:[#allocation125_spill] sm:$0xff] %v6014_v37  ;;  %v6060_v37 = vand.u32 4294901760, %v6023_v13  ;;  %v6064_v39 = vsub.f32 %v5877_v36, %v5914_v38  ;;  %v515_v26 = vsub.f32 %v6021_v51, %v6045_v61  ;;  %v6080_v53 = vld [vmem:[#allocation2 + $0x1a0] sm:$0xff]  ;;  %v6096_v38 = vld [vmem:[#allocation2 + $0x198] sm:$0xff] }
  0x59   :  { %10025 = vst [vmem:[#allocation126_spill] sm:$0xff] %v6017_v48  ;;  %10026 = vst [vmem:[#allocation127_spill] sm:$0xff] %v6021_v51  ;;  %v6069_v20 = vand.u32 4294901760, %v503_v60  ;;  %499 = vmatprep.subr.mxu1 %v6054_v2  ;;  %v6083_v36 = vand.u32 4294901760, %v509_v34 }
  0x5a   :  { %10027 = vst [vmem:[#allocation128_spill] sm:$0xff] %v6026_v33  ;;  %10028 = vst [vmem:[#allocation129_spill] sm:$0xff] %v6032_v6  ;;  %v6075_v33 = vand.u32 4294901760, %v6049_v43  ;;  %v6078_v6 = vand.u32 4294901760, %v6037_v30  ;;  %272 = vmatpush2.msra.mxu0 %v6060_v37  ;;  %v6087_v60 = vand.u32 4294901760, %v6064_v39  ;;  %v6099_v51 = vand.u32 4294901760, %v515_v26 }
  0x5b   :  { %10029 = vst [vmem:[#allocation130_spill] sm:$0xff] %v6035_v56  ;;  %10030 = vst [vmem:[#allocation131_spill] sm:$0xff] %v6039_v1  ;;  %v6091_v1 = vsub.f32 %v5891_v32, %v5932_v63  ;;  %505 = vmatpush1.msra.mxu1 %v6069_v20  ;;  %v6109_v32 = vand.u32 4294901760, %v6066_v12 }
  0x5c   :  { %10031 = vst [vmem:[#allocation132_spill] sm:$0xff] %v6045_v61  ;;  %10032 = vst [vmem:[#allocation133_spill] sm:$0xff] %v6049_v43  ;;  %v6094_v61 = vand.u32 4294901760, %v6051_v19  ;;  %v521_v34 = vsub.f32 %v6049_v43, %v6075_v33  ;;  %274 = vmatprep.subr.mxu0 %v6078_v6  ;;  %511 = vmatprep.subr.mxu1 %v6083_v36  ;;  %v527_v63 = vsub.f32 %v6064_v39, %v6087_v60 }
  0x5d   :  { %10033 = vst [vmem:[#allocation134_spill] sm:$0xff] %v6054_v2  ;;  %10034 = vst [vmem:[#allocation135_spill] sm:$0xff] %v6060_v37  ;;  %v6106_v2 = vsub.f32 %v5905_v21, %v5948_v50  ;;  %v6115_v26 = vand.u32 4294901760, %v6091_v1  ;;  %v6123_v21 = vand.u32 4294901760, %v6080_v53  ;;  %517 = vmatpush1.msra.mxu1 %v6099_v51  ;;  %v6136_v50 = vsub.f32 %v5934_v41, %v5977_v49 }
  0x5e   :  { %10035 = vst [vmem:[#allocation136_spill] sm:$0xff] %v6064_v39  ;;  %10036 = vst [vmem:[#allocation137_spill] sm:$0xff] %v6069_v20  ;;  %276 = vmatpush2.msra.mxu0 %v6094_v61  ;;  %v6120_v20 = vsub.f32 %v5920_v58, %v5963_v7  ;;  %v6139_v58 = vand.u32 4294901760, %v6096_v38  ;;  %v6141_v7 = vld [vmem:[#allocation2 + $0x188] sm:$0xff]  ;;  %v6143_v39 = vand.u32 4294901760, %v527_v63  ;;  %v6153_v43 = vsub.f32 %v5950_v52, %v5993_v28 }
  0x5f   :  { %10037 = vst [vmem:[#allocation138_spill] sm:$0xff] %v6075_v33  ;;  %10038 = vst [vmem:[#allocation139_spill] sm:$0xff] %v6078_v6  ;;  %v6125_v33 = vld [vmem:[#allocation2 + $0x190] sm:$0xff]  ;;  %278 = vmatprep.subr.mxu0 %v6109_v32  ;;  %v6159_v63 = vand.u32 4294901760, %v6136_v50  ;;  %v6167_v49 = vsub.f32 %v5979_v55, %v6017_v48  ;;  %v6180_v28 = vand.u32 4294901760, %v6141_v7 }
  0x60   :  { %10039 = vst [vmem:[#allocation140_spill] sm:$0xff] %v6083_v36  ;;  %10040 = vst [vmem:[#allocation141_spill] sm:$0xff] %v6087_v60  ;;  %v6128_v36 = vand.u32 4294901760, %v521_v34  ;;  %v6131_v60 = vand.u32 4294901760, %v6106_v2  ;;  %v533_v34 = vsub.f32 %v6091_v1, %v6115_v26  ;;  %280 = vmatpush2.msra.mxu0 %v6123_v21 }
  0x61   :  { %10041 = vst [vmem:[#allocation142_spill] sm:$0xff] %v6091_v1  ;;  %10042 = vst [vmem:[#allocation143_spill] sm:$0xff] %v6094_v61  ;;  %282 = vmatprep.subr.mxu0 %v6139_v58  ;;  %v6169_v1 = vld [vmem:[#allocation2 + $0x180] sm:$0xff]  ;;  %v551_v55 = vsub.f32 %v6136_v50, %v6159_v63 }
  0x62   :  { %10043 = vst [vmem:[#allocation144_spill] sm:$0xff] %v6099_v51  ;;  %10044 = vst [vmem:[#allocation145_spill] sm:$0xff] %v6106_v2  ;;  %v6148_v51 = vand.u32 4294901760, %v6120_v20  ;;  %523 = vmatprep.subr.mxu1 %v6128_v36  ;;  %v539_v41 = vsub.f32 %v6106_v2, %v6131_v60  ;;  %v6172_v52 = vand.u32 4294901760, %v533_v34  ;;  %v6182_v2 = vld [vmem:[#allocation2 + $0x178] sm:$0xff]  ;;  %v6190_v34 = vand.u32 4294901760, %v6167_v49 }
  0x63   :  { %10045 = vst [vmem:[#allocation146_spill] sm:$0xff] %v6109_v32  ;;  %10046 = vst [vmem:[#allocation147_spill] sm:$0xff] %v6115_v26  ;;  %v6163_v26 = vand.u32 4294901760, %v6125_v33  ;;  %529 = vmatpush1.msra.mxu1 %v6143_v39 }
  0x64   :  { %10047 = vst [vmem:[#allocation148_spill] sm:$0xff] %v6120_v20  ;;  %10048 = vst [vmem:[#allocation149_spill] sm:$0xff] %v6123_v21  ;;  %v6184_v14 = vand.u32 4294901760, %v539_v41  ;;  %535 = vmatprep.subr.mxu1 %v6172_v52 }
  0x65   :  { %10049 = vst [vmem:[#allocation150_spill] sm:$0xff] %v6128_v36  ;;  %10050 = vst [vmem:[#allocation151_spill] sm:$0xff] %v6131_v60  ;;  %v545_v36 = vsub.f32 %v6120_v20, %v6148_v51  ;;  %v6177_v60 = vand.u32 4294901760, %v6153_v43  ;;  %284 = vmatpush2.msra.mxu0 %v6163_v26 }
  0x66   :  { %10051 = vst [vmem:[#allocation152_spill] sm:$0xff] %v6136_v50  ;;  %10052 = vst [vmem:[#allocation153_spill] sm:$0xff] %v6139_v58  ;;  %286 = vmatprep.subr.mxu0 %v6180_v28  ;;  %v6209_v50 = vsub.f32 %v6023_v13, %v6060_v37  ;;  %541 = vmatpush2.msra.mxu1 %v6184_v14  ;;  %v6240_v37 = vld [vmem:[#allocation2 + $0x158] sm:$0xff] }
  0x67   :  { %10053 = vst [vmem:[#allocation154_spill] sm:$0xff] %v6143_v39  ;;  %10054 = vst [vmem:[#allocation155_spill] sm:$0xff] %v6148_v51  ;;  %v6194_v39 = vsub.f32 %v5995_v46, %v6035_v56  ;;  %v6196_v51 = vld [vmem:[#allocation2 + $0x170] sm:$0xff]  ;;  %v6199_v48 = vand.u32 4294901760, %v545_v36  ;;  %v557_v41 = vsub.f32 %v6153_v43, %v6177_v60  ;;  %v6211_v46 = vld [vmem:[#allocation2 + $0x168] sm:$0xff]  ;;  %v6214_v56 = vand.u32 4294901760, %v551_v55 }
  0x68   :  { %10055 = vst [vmem:[#allocation156_spill] sm:$0xff] %v6153_v43  ;;  %10056 = vst [vmem:[#allocation157_spill] sm:$0xff] %v6159_v63  ;;  %v6205_v63 = vand.u32 4294901760, %v6169_v1  ;;  %v563_v36 = vsub.f32 %v6167_v49, %v6190_v34  ;;  %v6224_v43 = vld [vmem:[#allocation2 + $0x160] sm:$0xff]  ;;  %v6231_v55 = vand.u32 4294901760, %v6209_v50 }
  0x69   :  { %10057 = vst [vmem:[#allocation158_spill] sm:$0xff] %v6163_v26  ;;  %10058 = vst [vmem:[#allocation159_spill] sm:$0xff] %v6167_v49  ;;  %547 = vmatprep.subr.mxu1 %v6199_v48  ;;  %v6227_v13 = vand.u32 4294901760, %v557_v41 }
  0x6a   :  { %10059 = vst [vmem:[#allocation160_spill] sm:$0xff] %v6172_v52  ;;  %10060 = vst [vmem:[#allocation161_spill] sm:$0xff] %v6177_v60  ;;  %v6219_v52 = vand.u32 4294901760, %v6194_v39  ;;  %v6222_v60 = vand.u32 4294901760, %v6182_v2  ;;  %288 = vmatpush2.msra.mxu0 %v6205_v63  ;;  %553 = vmatpush2.msra.mxu1 %v6214_v56  ;;  %v6243_v49 = vand.u32 4294901760, %v563_v36 }
  0x6b   :  { %10061 = vst [vmem:[#allocation162_spill] sm:$0xff] %v6180_v28  ;;  %10062 = vst [vmem:[#allocation163_spill] sm:$0xff] %v6184_v14  ;;  %v6235_v14 = vsub.f32 %v6037_v30, %v6078_v6  ;;  %v6253_v30 = vand.u32 4294901760, %v6211_v46  ;;  %559 = vmatprep.subr.mxu1 %v6227_v13  ;;  %v575_v6 = vsub.f32 %v6209_v50, %v6231_v55 }
  0x6c   :  { %10063 = vst [vmem:[#allocation164_spill] sm:$0xff] %v6190_v34  ;;  %10064 = vst [vmem:[#allocation165_spill] sm:$0xff] %v6194_v39  ;;  %v6238_v34 = vand.u32 4294901760, %v6196_v51  ;;  %v569_v41 = vsub.f32 %v6194_v39, %v6219_v52  ;;  %290 = vmatprep.subr.mxu0 %v6222_v60  ;;  %565 = vmatpush2.msra.mxu1 %v6243_v49  ;;  %v6297_v39 = vsub.f32 %v6096_v38, %v6139_v58 }
  0x6d   :  { %10065 = vst [vmem:[#allocation166_spill] sm:$0xff] %v6199_v48  ;;  %10066 = vst [vmem:[#allocation167_spill] sm:$0xff] %v6205_v63  ;;  %v6250_v48 = vsub.f32 %v6051_v19, %v6094_v61  ;;  %v6259_v36 = vand.u32 4294901760, %v6235_v14  ;;  %v6267_v19 = vand.u32 4294901760, %v6224_v43  ;;  %v6280_v61 = vsub.f32 %v6080_v53, %v6123_v21 }
  0x6e   :  { %10067 = vst [vmem:[#allocation168_spill] sm:$0xff] %v6209_v50  ;;  %10068 = vst [vmem:[#allocation169_spill] sm:$0xff] %v6214_v56  ;;  %292 = vmatpush2.msra.mxu0 %v6238_v34  ;;  %v6264_v56 = vsub.f32 %v6066_v12, %v6109_v32  ;;  %v6283_v12 = vand.u32 4294901760, %v6240_v37  ;;  %v6285_v32 = vld [vmem:[#allocation2 + $0x148] sm:$0xff]  ;;  %v6287_v50 = vand.u32 4294901760, %v575_v6  ;;  %v6311_v21 = vsub.f32 %v6125_v33, %v6163_v26 }
  0x6f   :  { %10069 = vst [vmem:[#allocation170_spill] sm:$0xff] %v6219_v52  ;;  %10070 = vst [vmem:[#allocation171_spill] sm:$0xff] %v6222_v60  ;;  %v6269_v52 = vld [vmem:[#allocation2 + $0x150] sm:$0xff]  ;;  %294 = vmatprep.subr.mxu0 %v6253_v30  ;;  %v6303_v6 = vand.u32 4294901760, %v6280_v61  ;;  %v6324_v58 = vand.u32 4294901760, %v6285_v32 }
  0x70   :  { %10071 = vst [vmem:[#allocation172_spill] sm:$0xff] %v6227_v13  ;;  %10072 = vst [vmem:[#allocation173_spill] sm:$0xff] %v6231_v55  ;;  %v6272_v13 = vand.u32 4294901760, %v569_v41  ;;  %v6275_v55 = vand.u32 4294901760, %v6250_v48  ;;  %v581_v41 = vsub.f32 %v6235_v14, %v6259_v36  ;;  %296 = vmatpush2.msra.mxu0 %v6267_v19 }
  0x71   :  { %10073 = vst [vmem:[#allocation174_spill] sm:$0xff] %v6235_v14  ;;  %10074 = vst [vmem:[#allocation175_spill] sm:$0xff] %v6238_v34  ;;  %298 = vmatprep.subr.mxu0 %v6283_v12  ;;  %v6313_v14 = vld [vmem:[#allocation2 + $0x140] sm:$0xff]  ;;  %v599_v33 = vsub.f32 %v6280_v61, %v6303_v6 }
  0x72   :  { %10075 = vst [vmem:[#allocation176_spill] sm:$0xff] %v6243_v49  ;;  %10076 = vst [vmem:[#allocation177_spill] sm:$0xff] %v6250_v48  ;;  %v6292_v49 = vand.u32 4294901760, %v6264_v56  ;;  %571 = vmatprep.subr.mxu1 %v6272_v13  ;;  %v587_v53 = vsub.f32 %v6250_v48, %v6275_v55  ;;  %v6316_v38 = vand.u32 4294901760, %v581_v41  ;;  %v6326_v48 = vld [vmem:[#allocation2 + $0x138] sm:$0xff]  ;;  %v6334_v41 = vand.u32 4294901760, %v6311_v21 }
  0x73   :  { %10077 = vst [vmem:[#allocation178_spill] sm:$0xff] %v6253_v30  ;;  %10078 = vst [vmem:[#allocation179_spill] sm:$0xff] %v6259_v36  ;;  %v6307_v36 = vand.u32 4294901760, %v6269_v52  ;;  %577 = vmatpush2.msra.mxu1 %v6287_v50 }
  0x74   :  { %10079 = vst [vmem:[#allocation180_spill] sm:$0xff] %v6264_v56  ;;  %10080 = vst [vmem:[#allocation181_spill] sm:$0xff] %v6267_v19  ;;  %v6328_v20 = vand.u32 4294901760, %v587_v53  ;;  %583 = vmatprep.subr.mxu1 %v6316_v38 }
  0x75   :  { %10081 = vst [vmem:[#allocation182_spill] sm:$0xff] %v6272_v13  ;;  %10082 = vst [vmem:[#allocation183_spill] sm:$0xff] %v6275_v55  ;;  %v593_v13 = vsub.f32 %v6264_v56, %v6292_v49  ;;  %v6321_v55 = vand.u32 4294901760, %v6297_v39  ;;  %300 = vmatpush2.msra.mxu0 %v6307_v36 }
  0x76   :  { %10083 = vst [vmem:[#allocation184_spill] sm:$0xff] %v6280_v61  ;;  %10084 = vst [vmem:[#allocation185_spill] sm:$0xff] %v6283_v12  ;;  %302 = vmatprep.subr.mxu0 %v6324_v58  ;;  %v6353_v61 = vsub.f32 %v6169_v1, %v6205_v63  ;;  %589 = vmatpush2.msra.mxu1 %v6328_v20  ;;  %v6384_v63 = vld [vmem:[#allocation2 + $0x118] sm:$0xff] }
  0x77   :  { %10085 = vst [vmem:[#allocation186_spill] sm:$0xff] %v6287_v50  ;;  %10086 = vst [vmem:[#allocation187_spill] sm:$0xff] %v6292_v49  ;;  %v6338_v50 = vsub.f32 %v6141_v7, %v6180_v28  ;;  %v6340_v49 = vld [vmem:[#allocation2 + $0x130] sm:$0xff]  ;;  %v6343_v26 = vand.u32 4294901760, %v593_v13  ;;  %v605_v53 = vsub.f32 %v6297_v39, %v6321_v55  ;;  %v6355_v7 = vld [vmem:[#allocation2 + $0x128] sm:$0xff]  ;;  %v6358_v28 = vand.u32 4294901760, %v599_v33 }
  0x78   :  { %10087 = vst [vmem:[#allocation188_spill] sm:$0xff] %v6297_v39  ;;  %10088 = vst [vmem:[#allocation189_spill] sm:$0xff] %v6303_v6  ;;  %v6349_v6 = vand.u32 4294901760, %v6313_v14  ;;  %v611_v13 = vsub.f32 %v6311_v21, %v6334_v41  ;;  %v6368_v39 = vld [vmem:[#allocation2 + $0x120] sm:$0xff]  ;;  %v6375_v33 = vand.u32 4294901760, %v6353_v61 }
  0x79   :  { %10089 = vst [vmem:[#allocation190_spill] sm:$0xff] %v6307_v36  ;;  %10090 = vst [vmem:[#allocation191_spill] sm:$0xff] %v6311_v21  ;;  %595 = vmatprep.subr.mxu1 %v6343_v26  ;;  %v6371_v1 = vand.u32 4294901760, %v605_v53 }
  0x7a   :  { %10091 = vst [vmem:[#allocation192_spill] sm:$0xff] %v6316_v38  ;;  %10092 = vst [vmem:[#allocation193_spill] sm:$0xff] %v6321_v55  ;;  %v6363_v38 = vand.u32 4294901760, %v6338_v50  ;;  %v6366_v55 = vand.u32 4294901760, %v6326_v48  ;;  %304 = vmatpush2.msra.mxu0 %v6349_v6  ;;  %601 = vmatpush2.msra.mxu1 %v6358_v28  ;;  %v6387_v21 = vand.u32 4294901760, %v611_v13 }
  0x7b   :  { %10093 = vst [vmem:[#allocation194_spill] sm:$0xff] %v6324_v58  ;;  %10094 = vst [vmem:[#allocation195_spill] sm:$0xff] %v6328_v20  ;;  %v6379_v20 = vsub.f32 %v6182_v2, %v6222_v60  ;;  %v6397_v2 = vand.u32 4294901760, %v6355_v7  ;;  %607 = vmatprep.subr.mxu1 %v6371_v1  ;;  %v623_v60 = vsub.f32 %v6353_v61, %v6375_v33 }
  0x7c   :  { %10095 = vst [vmem:[#allocation196_spill] sm:$0xff] %v6334_v41  ;;  %10096 = vst [vmem:[#allocation197_spill] sm:$0xff] %v6338_v50  ;;  %v6382_v41 = vand.u32 4294901760, %v6340_v49  ;;  %v617_v53 = vsub.f32 %v6338_v50, %v6363_v38  ;;  %306 = vmatprep.subr.mxu0 %v6366_v55  ;;  %613 = vmatpush2.msra.mxu1 %v6387_v21  ;;  %v6441_v50 = vsub.f32 %v6240_v37, %v6283_v12 }
  0x7d   :  { %10097 = vst [vmem:[#allocation198_spill] sm:$0xff] %v6343_v26  ;;  %10098 = vst [vmem:[#allocation199_spill] sm:$0xff] %v6349_v6  ;;  %v6394_v26 = vsub.f32 %v6196_v51, %v6238_v34  ;;  %v6403_v13 = vand.u32 4294901760, %v6379_v20  ;;  %v6411_v51 = vand.u32 4294901760, %v6368_v39  ;;  %v6424_v34 = vsub.f32 %v6224_v43, %v6267_v19  ;;  %v6443_v43 = vld [vmem:[#allocation2 + $0x100] sm:$0xff] }
  0x7e   :  { %10099 = vst [vmem:[#allocation200_spill] sm:$0xff] %v6353_v61  ;;  %10100 = vst [vmem:[#allocation201_spill] sm:$0xff] %v6358_v28  ;;  %308 = vmatpush2.msra.mxu0 %v6382_v41  ;;  %v6408_v28 = vsub.f32 %v6211_v46, %v6253_v30  ;;  %v6427_v46 = vand.u32 4294901760, %v6384_v63  ;;  %v6429_v30 = vld [vmem:[#allocation2 + $0x108] sm:$0xff]  ;;  %v6431_v61 = vand.u32 4294901760, %v623_v60  ;;  %v6468_v12 = vand.u32 4294901760, %v6441_v50 }
  0x7f   :  { %10101 = vst [vmem:[#allocation202_spill] sm:$0xff] %v6363_v38  ;;  %10102 = vst [vmem:[#allocation203_spill] sm:$0xff] %v6366_v55  ;;  %v6413_v38 = vld [vmem:[#allocation2 + $0x110] sm:$0xff]  ;;  %310 = vmatprep.subr.mxu0 %v6397_v2  ;;  %v6449_v19 = vand.u32 4294901760, %v6424_v34 }
  0x80   :  { %10103 = vst [vmem:[#allocation204_spill] sm:$0xff] %v6371_v1  ;;  %10104 = vst [vmem:[#allocation205_spill] sm:$0xff] %v6375_v33  ;;  %v6416_v1 = vand.u32 4294901760, %v617_v53  ;;  %v6419_v33 = vand.u32 4294901760, %v6394_v26  ;;  %v629_v53 = vsub.f32 %v6379_v20, %v6403_v13  ;;  %312 = vmatpush2.msra.mxu0 %v6411_v51 }
  0x81   :  { %10105 = vst [vmem:[#allocation206_spill] sm:$0xff] %v6379_v20  ;;  %10106 = vst [vmem:[#allocation207_spill] sm:$0xff] %v6382_v41  ;;  %314 = vmatprep.subr.mxu0 %v6427_v46  ;;  %v6457_v20 = vsub.f32 %v6269_v52, %v6307_v36  ;;  %v5408_v37 = vld.sshfl [vmem:[%s8953_s0] sm:$0x33 pattern:$0x76325410]  ;;  %v647_v52 = vsub.f32 %v6424_v34, %v6449_v19  ;;  %v6496_v36 = vsub.f32 %v6313_v14, %v6349_v6 }
  0x82   :  { %10107 = vst [vmem:[#allocation208_spill] sm:$0xff] %v6387_v21  ;;  %10108 = vst [vmem:[#allocation209_spill] sm:$0xff] %v6394_v26  ;;  %v6436_v21 = vand.u32 4294901760, %v6408_v28  ;;  %619 = vmatprep.subr.mxu1 %v6416_v1  ;;  %v635_v60 = vsub.f32 %v6394_v26, %v6419_v33  ;;  %v6471_v26 = vand.u32 4294901760, %v6429_v30  ;;  %v6513_v6 = vand.u32 4294901760, %v5408_v37 }
  0x83   :  { %10109 = vst [vmem:[#allocation210_spill] sm:$0xff] %v6397_v2  ;;  %10110 = vst [vmem:[#allocation211_spill] sm:$0xff] %v6403_v13  ;;  %v6453_v13 = vand.u32 4294901760, %v6413_v38  ;;  %625 = vmatpush2.msra.mxu1 %v6431_v61  ;;  %v6511_v14 = vand.u32 4294901760, %v6496_v36 }
  0x84   :  { %10111 = vst [vmem:[#allocation212_spill] sm:$0xff] %v6408_v28  ;;  %10112 = vst [vmem:[#allocation213_spill] sm:$0xff] %v6411_v51  ;;  %v6473_v56 = vand.u32 4294901760, %v635_v60  ;;  %v653_v60 = vsub.f32 %v6441_v50, %v6468_v12 }
  0x85   :  { %10113 = vst [vmem:[#allocation214_spill] sm:$0xff] %v6416_v1  ;;  %10114 = vst [vmem:[#allocation215_spill] sm:$0xff] %v6419_v33  ;;  %v6463_v1 = vand.u32 4294901760, %v629_v53  ;;  %v641_v33 = vsub.f32 %v6408_v28, %v6436_v21  ;;  %316 = vmatpush2.msra.mxu0 %v6453_v13  ;;  %v6483_v53 = vsub.f32 %v6285_v32, %v6324_v58  ;;  %v6499_v32 = vand.u32 4294901760, %v647_v52 }
  0x86   :  { %10115 = vst [vmem:[#allocation216_spill] sm:$0xff] %v6424_v34  ;;  %10116 = vst [vmem:[#allocation217_spill] sm:$0xff] %v6427_v46  ;;  %318 = vmatprep.subr.mxu0 %v6471_v26  ;;  %v6507_v58 = vand.u32 4294901760, %v653_v60  ;;  %v6517_v52 = vsub.f32 %v6326_v48, %v6366_v55  ;;  %v671_v48 = vsub.f32 %v6496_v36, %v6511_v14 }
  0x87   :  { %10117 = vst [vmem:[#allocation218_spill] sm:$0xff] %v6431_v61  ;;  %10118 = vst [vmem:[#allocation219_spill] sm:$0xff] %v6436_v21  ;;  %v6479_v61 = vand.u32 4294901760, %v6457_v20  ;;  %631 = vmatprep.subr.mxu1 %v6463_v1  ;;  %v6486_v21 = vand.u32 4294901760, %v641_v33 }
  0x88   :  { %10119 = vst [vmem:[#allocation220_spill] sm:$0xff] %v6441_v50  ;;  %10120 = vst [vmem:[#allocation221_spill] sm:$0xff] %v6449_v19  ;;  %v6492_v19 = vand.u32 4294901760, %v6443_v43  ;;  %637 = vmatpush2.msra.mxu1 %v6473_v56 }
  0x89   :  { %10121 = vst [vmem:[#allocation222_spill] sm:$0xff] %v6453_v13  ;;  %10122 = vst [vmem:[#allocation223_spill] sm:$0xff] %v6457_v20  ;;  %v659_v33 = vsub.f32 %v6457_v20, %v6479_v61  ;;  %643 = vmatprep.subr.mxu1 %v6486_v21 }
  0x8a   :  { %10123 = vst [vmem:[#allocation224_spill] sm:$0xff] %v6463_v1  ;;  %10124 = vst [vmem:[#allocation225_spill] sm:$0xff] %v6468_v12  ;;  %v6504_v1 = vand.u32 4294901760, %v6483_v53  ;;  %v190_v12 = vcombine.high %v5408_v37, %v5408_v37  ;;  %320 = vmatpush2.msra.mxu0 %v6492_v19  ;;  %649 = vmatpush2.msra.mxu1 %v6499_v32 }
  0x8b   :  { %10125 = vst [vmem:[#allocation226_spill] sm:$0xff] %v6471_v26  ;;  %10126 = vst [vmem:[#allocation227_spill] sm:$0xff] %v6473_v56  ;;  %v6520_v56 = vand.u32 4294901760, %v659_v33  ;;  %733 = vmatprep.subr.mxu0 %v5525_v18  ;;  %655 = vmatprep.subr.mxu1 %v6507_v58  ;;  %v6538_v33 = vsub.f32 %v5408_v37, %v6513_v6  ;;  %v6558_v37 = vand.u32 4294901760, %v671_v48 }
  0x8c   :  { %10127 = vst [vmem:[#allocation228_spill] sm:$0xff] %v6479_v61  ;;  %10128 = vst [vmem:[#allocation229_spill] sm:$0xff] %v6483_v53  ;;  %v6524_v60 = vand.u32 4294901760, %v190_v12  ;;  %v6529_v61 = vsub.f32 %v6340_v49, %v6382_v41 }
  0x8d   :  { %10129 = vst [vmem:[#allocation230_spill] sm:$0xff] %v6486_v21  ;;  %10130 = vst [vmem:[#allocation231_spill] sm:$0xff] %v6492_v19  ;;  %v665_v21 = vsub.f32 %v6483_v53, %v6504_v1  ;;  %661 = vmatpush2.msra.mxu1 %v6520_v56 }
  0x8e   :  { %10131 = vst [vmem:[#allocation232_spill] sm:$0xff] %v6496_v36  ;;  %10132 = vst [vmem:[#allocation233_spill] sm:$0xff] %v6499_v32  ;;  %v6535_v32 = vand.u32 4294901760, %v6517_v52  ;;  %v6548_v49 = vsub.f32 %v190_v12, %v6524_v60  ;;  %723 = vmatprep.mubr.f32.mxu1 %v6524_v60 }
  0x8f   :  { %10133 = vst [vmem:[#allocation234_spill] sm:$0xff] %v6504_v1  ;;  %10134 = vst [vmem:[#allocation235_spill] sm:$0xff] %v6507_v58  ;;  %v6542_v1 = vsub.f32 %v6355_v7, %v6397_v2  ;;  %v6545_v18 = vand.u32 4294901760, %v665_v21  ;;  %v6551_v58 = vand.u32 4294901760, %v6529_v61  ;;  %v6563_v21 = vand.u32 4294901760, %v6538_v33 }
  0x90   :  { %10135 = vst [vmem:[#allocation236_spill] sm:$0xff] %v6511_v14  ;;  %10136 = vst [vmem:[#allocation237_spill] sm:$0xff] %v6513_v6  ;;  %v6555_v14 = vsub.f32 %v6368_v39, %v6411_v51  ;;  %v677_v7 = vsub.f32 %v6517_v52, %v6535_v32 }
  0x91   :  { %10137 = vst [vmem:[#allocation238_spill] sm:$0xff] %v6517_v52  ;;  %10138 = vst [vmem:[#allocation239_spill] sm:$0xff] %v6520_v56  ;;  %v6566_v12 = vand.u32 4294901760, %v6542_v1  ;;  %667 = vmatprep.subr.mxu1 %v6545_v18  ;;  %v6570_v56 = vand.u32 4294901760, %v6548_v49  ;;  %v683_v39 = vsub.f32 %v6529_v61, %v6551_v58 }
  0x92   :  { %10139 = vst [vmem:[#allocation240_spill] sm:$0xff] %v6524_v60  ;;  %10140 = vst [vmem:[#allocation241_spill] sm:$0xff] %v6529_v61  ;;  %v6575_v48 = vand.u32 4294901760, %v6555_v14  ;;  %v6579_v60 = vsub.f32 %v6384_v63, %v6427_v46  ;;  %673 = vmatpush2.msra.mxu1 %v6558_v37 }
  0x93   :  { %10141 = vst [vmem:[#allocation242_spill] sm:$0xff] %v6535_v32  ;;  %10142 = vst [vmem:[#allocation243_spill] sm:$0xff] %v6538_v33  ;;  %v6582_v32 = vand.u32 4294901760, %v677_v7  ;;  %v689_v51 = vsub.f32 %v6542_v1, %v6566_v12  ;;  %v324_v2 = vsub.f32 %v6548_v49, %v6570_v56  ;;  %v6594_v41 = vand.u32 4294901760, %v683_v39 }
  0x94   :  { %10143 = vst [vmem:[#allocation244_spill] sm:$0xff] %v6542_v1  ;;  %10144 = vst [vmem:[#allocation245_spill] sm:$0xff] %v6545_v18  ;;  %v330_v18 = vsub.f32 %v6538_v33, %v6563_v21  ;;  %v695_v63 = vsub.f32 %v6555_v14, %v6575_v48  ;;  %v6599_v7 = vand.u32 4294901760, %v6579_v60 }
  0x95   :  { %10145 = vst [vmem:[#allocation246_spill] sm:$0xff] %v6548_v49  ;;  %10146 = vst [vmem:[#allocation247_spill] sm:$0xff] %v6551_v58  ;;  %v6590_v58 = vsub.f32 %v6413_v38, %v6453_v13  ;;  %679 = vmatprep.subr.mxu1 %v6582_v32  ;;  %v6613_v39 = vand.u32 4294901760, %v324_v2 }
  0x96   :  { %10147 = vst [vmem:[#allocation248_spill] sm:$0xff] %v6555_v14  ;;  %10148 = vst [vmem:[#allocation249_spill] sm:$0xff] %v6558_v37  ;;  %v6602_v37 = vand.u32 4294901760, %v330_v18  ;;  %685 = vmatpush2.msra.mxu1 %v6594_v41  ;;  %v6622_v18 = vsub.f32 %v6443_v43, %v6492_v19 }
  0x97   :  { %10149 = vst [vmem:[#allocation250_spill] sm:$0xff] %v6563_v21  ;;  %10150 = vst [vmem:[#allocation251_spill] sm:$0xff] %v6566_v12  ;;  %v6604_v12 = vand.u32 4294901760, %v689_v51  ;;  %v6607_v38 = vand.u32 4294901760, %v6590_v58  ;;  %v6611_v21 = vsub.f32 %v6429_v30, %v6471_v26  ;;  %326 = vmatprep.mubr.f32.mxu0 %v6613_v39 }
  0x98   :  { %10151 = vst [vmem:[#allocation252_spill] sm:$0xff] %v6570_v56  ;;  %10152 = vst [vmem:[#allocation253_spill] sm:$0xff] %v6575_v48  ;;  %v6616_v48 = vand.u32 4294901760, %v695_v63  ;;  %v6635_v63 = vand.u32 4294901760, %v6622_v18  ;;  %332 = vmatmul.mubr.f32.vlgmr.msra.gmra.mxu0 %v6602_v37 }
  0x99   :  { %10153 = vst [vmem:[#allocation254_spill] sm:$0xff] %v6579_v60  ;;  %10154 = vst [vmem:[#allocation255_spill] sm:$0xff] %v6582_v32  ;;  %v701_v32 = vsub.f32 %v6579_v60, %v6599_v7  ;;  %691 = vmatprep.subr.mxu1 %v6604_v12  ;;  %v707_v51 = vsub.f32 %v6590_v58, %v6607_v38  ;;  %v6628_v30 = vand.u32 4294901760, %v6611_v21  ;;  %736 = vmatpush1.msra.mxu0 %v5538_v23  ;;  %v10207_v23 = vld [vmem:[#allocation156_spill] sm:$0xff] }
  0x9a   :  { %10155 = vst [vmem:[#allocation256_spill] sm:$0xff] %v6590_v58  ;;  %10156 = vst [vmem:[#allocation257_spill] sm:$0xff] %v6594_v41  ;;  %697 = vmatpush2.msra.mxu1 %v6616_v48  ;;  %v719_v41 = vsub.f32 %v6622_v18, %v6635_v63  ;;  %739 = vmatprep.subr.mxu0 %v5544_v25  ;;  %v10205_v25 = vld [vmem:[#allocation152_spill] sm:$0xff] }
  0x9b   :  { %10157 = vst [vmem:[#allocation258_spill] sm:$0xff] %v6599_v7  ;;  %10158 = vst [vmem:[#allocation259_spill] sm:$0xff] %v6602_v37  ;;  %v6632_v2 = vand.u32 4294901760, %v701_v32  ;;  %v6638_v43 = vand.u32 4294901760, %v707_v51  ;;  %742 = vmatpush1.msra.mxu0 %v5560_v31  ;;  %925 = vmatprep.mubr.f32.mxu0 %v6548_v49  ;;  %v10201_v31 = vld [vmem:[#allocation145_spill] sm:$0xff]  ;;  %v10209_v49 = vld [vmem:[#allocation159_spill] sm:$0xff] }
  0x9c   :  { %10159 = vst [vmem:[#allocation260_spill] sm:$0xff] %v6604_v12  ;;  %10160 = vst [vmem:[#allocation261_spill] sm:$0xff] %v6607_v38  ;;  %v713_v12 = vsub.f32 %v6611_v21, %v6628_v30  ;;  %v6651_v51 = vand.u32 4294901760, %v719_v41  ;;  %745 = vmatprep.subr.mxu0 %v5573_v35  ;;  %v10171_v41 = vld [vmem:[#allocation84_spill] sm:$0xff]  ;;  %v10211_v37 = vld [vmem:[#allocation165_spill] sm:$0xff] }
  0x9d   :  { %10161 = vst [vmem:[#allocation262_spill] sm:$0xff] %v6611_v21  ;;  %10162 = vst [vmem:[#allocation263_spill] sm:$0xff] %v6613_v39  ;;  %703 = vmatprep.subr.mxu1 %v6632_v2  ;;  %748 = vmatpush1.msra.mxu0 %v5587_v40  ;;  %v10193_v40 = vld [vmem:[#allocation127_spill] sm:$0xff]  ;;  %v10197_v35 = vld [vmem:[#allocation136_spill] sm:$0xff] }
  0x9e   :  { %10163 = vst [vmem:[#allocation264_spill] sm:$0xff] %v6616_v48  ;;  %10164 = vst [vmem:[#allocation265_spill] sm:$0xff] %v6622_v18  ;;  %709 = vmatpush2.msra.mxu1 %v6638_v43  ;;  %v6648_v32 = vand.u32 4294901760, %v713_v12  ;;  %751 = vmatprep.subr.mxu0 %v5601_v45  ;;  %v10172_v12 = vld [vmem:[#allocation23_spill] sm:$0xff]  ;;  %v10189_v45 = vld [vmem:[#allocation120_spill] sm:$0xff] }
  0x9f   :  { %10165 = vst [vmem:[#allocation266_spill] sm:$0xff] %v6628_v30  ;;  %10166 = vst [vmem:[#allocation267_spill] sm:$0xff] %v6632_v2  ;;  %754 = vmatpush1.msra.mxu0 %v5637_v59  ;;  %v10185_v59 = vld [vmem:[#allocation113_spill] sm:$0xff]  ;;  %v10199_v2 = vld [vmem:[#allocation142_spill] sm:$0xff] }
  0xa0   :  { %10167 = vst [vmem:[#allocation268_spill] sm:$0xff] %v6635_v63  ;;  %10168 = vst [vmem:[#allocation269_spill] sm:$0xff] %v6638_v43  ;;  %715 = vmatprep.subr.mxu1 %v6648_v32  ;;  %757 = vmatprep.subr.mxu0 %v5651_v0  ;;  %v10183_v0 = vld [vmem:[#allocation110_spill] sm:$0xff]  ;;  %v10195_v43 = vld [vmem:[#allocation133_spill] sm:$0xff] }
  0xa1   :  { %10169 = vst [vmem:[#allocation270_spill] sm:$0xff] %v6648_v32  ;;  %10170 = vst [vmem:[#allocation271_spill] sm:$0xff] %v6651_v51  ;;  %721 = vmatpush2.msra.mxu1 %v6651_v51  ;;  %760 = vmatpush1.msra.mxu0 %v5667_v8  ;;  %v10181_v8 = vld [vmem:[#allocation104_spill] sm:$0xff]  ;;  %v10217_v63 = vld [vmem:[#allocation177_spill] sm:$0xff] }
  0xa2   :  { %725 = vmatmul.mubr.f32.vlgmr.msra.gmra.mxu1 %v6513_v6  ;;  %935 = vmatprep.subr.mxu1 %v5505_v3  ;;  %v10187_v51 = vld [vmem:[#allocation116_spill] sm:$0xff]  ;;  %v10215_v6 = vld [vmem:[#allocation174_spill] sm:$0xff] }
  0xa3   :  { %937 = vmatpush1.msra.mxu1 %v5507_v4  ;;  %763 = vmatprep.subr.mxu0 %v5683_v42  ;;  %v10179_v42 = vld [vmem:[#allocation101_spill] sm:$0xff]  ;;  %v10191_v32 = vld [vmem:[#allocation124_spill] sm:$0xff] }
  0xa4   :  { %939 = vmatprep.subr.mxu1 %v5509_v5  ;;  %766 = vmatpush1.msra.mxu0 %v5697_v54  ;;  %v10177_v54 = vld [vmem:[#allocation95_spill] sm:$0xff]  ;;  %v10203_v48 = vld [vmem:[#allocation148_spill] sm:$0xff] }
  0xa5   :  { %941 = vmatpush1.msra.mxu1 %v5511_v9  ;;  %769 = vmatprep.subr.mxu0 %v5713_v57  ;;  %v10175_v57 = vld [vmem:[#allocation92_spill] sm:$0xff] }
  0xa6   :  { %943 = vmatprep.subr.mxu1 %v5513_v10  ;;  %772 = vmatpush1.msra.mxu0 %v5729_v47  ;;  %v10173_v47 = vld [vmem:[#allocation88_spill] sm:$0xff] }
  0xa7   :  { %945 = vmatpush1.msra.mxu1 %v5515_v11  ;;  %775 = vmatprep.subr.mxu0 %v5757_v62  ;;  %v10174_v62 = vld [vmem:[#allocation25_spill] sm:$0xff]  ;;  %v10213_v39 = vld [vmem:[#allocation168_spill] sm:$0xff] }
  0xa8   :  { %947 = vmatprep.subr.mxu1 %v5518_v15  ;;  %778 = vmatpush1.msra.mxu0 %v5772_v44  ;;  %v10176_v44 = vld [vmem:[#allocation29_spill] sm:$0xff]  ;;  %v10219_v30 = vld [vmem:[#allocation180_spill] sm:$0xff] }
  0xa9   :  { %949 = vmatpush1.msra.mxu1 %v5520_v16  ;;  %781 = vmatprep.subr.mxu0 %v5799_v27  ;;  %v10178_v27 = vld [vmem:[#allocation32_spill] sm:$0xff] }
  0xaa   :  { %951 = vmatprep.subr.mxu1 %v5522_v17  ;;  %784 = vmatpush1.msra.mxu0 %v5814_v29  ;;  %v10180_v29 = vld [vmem:[#allocation37_spill] sm:$0xff]  ;;  %v10221_v38 = vld [vmem:[#allocation184_spill] sm:$0xff] }
  0xab   :  { %953 = vmatpush1.msra.mxu1 %v5535_v22  ;;  %787 = vmatprep.subr.mxu0 %v10171_v41  ;;  %v10182_v41 = vld [vmem:[#allocation43_spill] sm:$0xff]  ;;  %v10223_v7 = vld [vmem:[#allocation188_spill] sm:$0xff] }
  0xac   :  { %955 = vmatprep.subr.mxu1 %v5541_v24  ;;  %790 = vmatpush1.msra.mxu0 %v10173_v47  ;;  %v10184_v47 = vld [vmem:[#allocation46_spill] sm:$0xff] }
  0xad   :  { %957 = vmatpush1.msra.mxu1 %v10172_v12  ;;  %793 = vmatprep.subr.mxu0 %v10175_v57  ;;  %v10186_v57 = vld [vmem:[#allocation50_spill] sm:$0xff] }
  0xae   :  { %959 = vmatprep.subr.mxu1 %v10174_v62  ;;  %796 = vmatpush1.msra.mxu0 %v10177_v54  ;;  %v10188_v54 = vld [vmem:[#allocation54_spill] sm:$0xff] }
  0xaf   :  { %961 = vmatpush1.msra.mxu1 %v10176_v44  ;;  %799 = vmatprep.subr.mxu0 %v10179_v42  ;;  %v10190_v42 = vld [vmem:[#allocation57_spill] sm:$0xff] }
  0xb0   :  { %963 = vmatprep.subr.mxu1 %v10178_v27  ;;  %802 = vmatpush1.msra.mxu0 %v10181_v8  ;;  %v10192_v8 = vld [vmem:[#allocation60_spill] sm:$0xff] }
  0xb1   :  { %965 = vmatpush1.msra.mxu1 %v10180_v29  ;;  %805 = vmatprep.subr.mxu0 %v10183_v0  ;;  %v10194_v0 = vld [vmem:[#allocation66_spill] sm:$0xff] }
  0xb2   :  { %967 = vmatprep.subr.mxu1 %v10182_v41  ;;  %808 = vmatpush1.msra.mxu0 %v10185_v59  ;;  %v10196_v59 = vld [vmem:[#allocation71_spill] sm:$0xff] }
  0xb3   :  { %969 = vmatpush1.msra.mxu1 %v10184_v47  ;;  %811 = vmatprep.subr.mxu0 %v10187_v51  ;;  %v10198_v51 = vld [vmem:[#allocation75_spill] sm:$0xff] }
  0xb4   :  { %971 = vmatprep.subr.mxu1 %v10186_v57  ;;  %814 = vmatpush1.msra.mxu0 %v10189_v45  ;;  %v10200_v45 = vld [vmem:[#allocation79_spill] sm:$0xff] }
  0xb5   :  { %973 = vmatpush1.msra.mxu1 %v10188_v54  ;;  %817 = vmatprep.subr.mxu0 %v10191_v32  ;;  %v10202_v32 = vld [vmem:[#allocation82_spill] sm:$0xff] }
  0xb6   :  { %975 = vmatprep.subr.mxu1 %v10190_v42  ;;  %820 = vmatpush1.msra.mxu0 %v10193_v40  ;;  %v10204_v40 = vld [vmem:[#allocation85_spill] sm:$0xff] }
  0xb7   :  { %977 = vmatpush1.msra.mxu1 %v10192_v8  ;;  %823 = vmatprep.subr.mxu0 %v10195_v43  ;;  %v10206_v43 = vld [vmem:[#allocation89_spill] sm:$0xff] }
  0xb8   :  { %979 = vmatprep.subr.mxu1 %v10194_v0  ;;  %826 = vmatpush1.msra.mxu0 %v10197_v35  ;;  %v10208_v35 = vld [vmem:[#allocation94_spill] sm:$0xff] }
  0xb9   :  { %981 = vmatpush1.msra.mxu1 %v10196_v59  ;;  %829 = vmatprep.subr.mxu0 %v10199_v2  ;;  %v10210_v2 = vld [vmem:[#allocation98_spill] sm:$0xff] }
  0xba   :  { %983 = vmatprep.subr.mxu1 %v10198_v51  ;;  %832 = vmatpush2.msra.mxu0 %v10201_v31  ;;  %v10212_v31 = vld [vmem:[#allocation103_spill] sm:$0xff] }
  0xbb   :  { %985 = vmatpush1.msra.mxu1 %v10200_v45  ;;  %835 = vmatprep.subr.mxu0 %v10203_v48  ;;  %v10214_v48 = vld [vmem:[#allocation107_spill] sm:$0xff] }
  0xbc   :  { %987 = vmatprep.subr.mxu1 %v10202_v32  ;;  %838 = vmatpush2.msra.mxu0 %v10205_v25  ;;  %v10216_v25 = vld [vmem:[#allocation111_spill] sm:$0xff] }
  0xbd   :  { %989 = vmatpush1.msra.mxu1 %v10204_v40  ;;  %841 = vmatprep.subr.mxu0 %v10207_v23  ;;  %v10218_v23 = vld [vmem:[#allocation114_spill] sm:$0xff] }
  0xbe   :  { %991 = vmatprep.subr.mxu1 %v10206_v43  ;;  %844 = vmatpush2.msra.mxu0 %v10209_v49  ;;  %v10220_v49 = vld [vmem:[#allocation117_spill] sm:$0xff] }
  0xbf   :  { %993 = vmatpush1.msra.mxu1 %v10208_v35  ;;  %847 = vmatprep.subr.mxu0 %v10211_v37  ;;  %v10222_v37 = vld [vmem:[#allocation121_spill] sm:$0xff] }
  0xc0   :  { %995 = vmatprep.subr.mxu1 %v10210_v2  ;;  %850 = vmatpush2.msra.mxu0 %v10213_v39  ;;  %v10224_v39 = vld [vmem:[#allocation126_spill] sm:$0xff] }
  0xc1   :  { %997 = vmatpush1.msra.mxu1 %v10212_v31  ;;  %853 = vmatprep.subr.mxu0 %v10215_v6  ;;  %v10226_v6 = vld [vmem:[#allocation130_spill] sm:$0xff] }
  0xc2   :  { %999 = vmatprep.subr.mxu1 %v10214_v48  ;;  %856 = vmatpush2.msra.mxu0 %v10217_v63  ;;  %v10225_v48 = vld [vmem:[#allocation191_spill] sm:$0xff] }
  0xc3   :  { %1001 = vmatpush2.msra.mxu1 %v10216_v25  ;;  %859 = vmatprep.subr.mxu0 %v10219_v30  ;;  %v10227_v25 = vld [vmem:[#allocation197_spill] sm:$0xff]  ;;  %v10228_v63 = vld [vmem:[#allocation135_spill] sm:$0xff] }
  0xc4   :  { %1003 = vmatprep.subr.mxu1 %v10218_v23  ;;  %862 = vmatpush2.msra.mxu0 %v10221_v38  ;;  %v10229_v23 = vld [vmem:[#allocation200_spill] sm:$0xff]  ;;  %v10230_v30 = vld [vmem:[#allocation139_spill] sm:$0xff] }
  0xc5   :  { %1005 = vmatpush2.msra.mxu1 %v10220_v49  ;;  %865 = vmatprep.subr.mxu0 %v10223_v7  ;;  %v10231_v49 = vld [vmem:[#allocation206_spill] sm:$0xff]  ;;  %v10232_v38 = vld [vmem:[#allocation143_spill] sm:$0xff] }
  0xc6   :  { %1007 = vmatprep.subr.mxu1 %v10222_v37  ;;  %868 = vmatpush2.msra.mxu0 %v10225_v48  ;;  %v10233_v37 = vld [vmem:[#allocation209_spill] sm:$0xff]  ;;  %v10234_v7 = vld [vmem:[#allocation146_spill] sm:$0xff] }
  0xc7   :  { %1009 = vmatpush2.msra.mxu1 %v10224_v39  ;;  %871 = vmatprep.subr.mxu0 %v10227_v25  ;;  %v10235_v48 = vld [vmem:[#allocation149_spill] sm:$0xff] }
  0xc8   :  { %1011 = vmatprep.subr.mxu1 %v10226_v6  ;;  %874 = vmatpush2.msra.mxu0 %v10229_v23  ;;  %v10236_v25 = vld [vmem:[#allocation153_spill] sm:$0xff]  ;;  %v10237_v23 = vld [vmem:[#allocation158_spill] sm:$0xff] }
  0xc9   :  { %1013 = vmatpush2.msra.mxu1 %v10228_v63  ;;  %877 = vmatprep.subr.mxu0 %v10231_v49  ;;  %v10238_v49 = vld [vmem:[#allocation162_spill] sm:$0xff] }
  0xca   :  { %1015 = vmatprep.subr.mxu1 %v10230_v30  ;;  %880 = vmatpush2.msra.mxu0 %v10233_v37  ;;  %v10239_v37 = vld [vmem:[#allocation167_spill] sm:$0xff] }
  0xcb   :  { %1017 = vmatpush2.msra.mxu1 %v10232_v38  ;;  %883 = vmatprep.subr.mxu0 %v6408_v28  ;;  %v10240_v28 = vld [vmem:[#allocation171_spill] sm:$0xff] }
  0xcc   :  { %1019 = vmatprep.subr.mxu1 %v10234_v7  ;;  %886 = vmatpush2.msra.mxu0 %v6424_v34  ;;  %v10241_v34 = vld [vmem:[#allocation175_spill] sm:$0xff] }
  0xcd   :  { %1021 = vmatpush2.msra.mxu1 %v10235_v48  ;;  %889 = vmatprep.subr.mxu0 %v6441_v50  ;;  %v10242_v50 = vld [vmem:[#allocation178_spill] sm:$0xff] }
  0xce   :  { %1023 = vmatprep.subr.mxu1 %v10236_v25  ;;  %892 = vmatpush2.msra.mxu0 %v6457_v20  ;;  %v10243_v20 = vld [vmem:[#allocation181_spill] sm:$0xff] }
  0xcf   :  { %1025 = vmatpush2.msra.mxu1 %v10237_v23  ;;  %895 = vmatprep.subr.mxu0 %v6483_v53  ;;  %v10244_v53 = vld [vmem:[#allocation185_spill] sm:$0xff] }
  0xd0   :  { %1027 = vmatprep.subr.mxu1 %v10238_v49  ;;  %898 = vmatpush2.msra.mxu0 %v6496_v36  ;;  %v10245_v36 = vld [vmem:[#allocation190_spill] sm:$0xff] }
  0xd1   :  { %1029 = vmatpush2.msra.mxu1 %v10239_v37  ;;  %901 = vmatprep.subr.mxu0 %v6517_v52  ;;  %v10246_v52 = vld [vmem:[#allocation194_spill] sm:$0xff] }
  0xd2   :  { %1031 = vmatprep.subr.mxu1 %v10240_v28  ;;  %904 = vmatpush2.msra.mxu0 %v6529_v61  ;;  %v10247_v61 = vld [vmem:[#allocation199_spill] sm:$0xff] }
  0xd3   :  { %1033 = vmatpush2.msra.mxu1 %v10241_v34  ;;  %907 = vmatprep.subr.mxu0 %v6542_v1  ;;  %v10249_v1 = vld [vmem:[#allocation207_spill] sm:$0xff] }
  0xd4   :  { %1035 = vmatprep.subr.mxu1 %v10242_v50  ;;  %910 = vmatpush2.msra.mxu0 %v6555_v14  ;;  %v10248_v14 = vld [vmem:[#allocation22_spill] sm:$0xff] }
  0xd5   :  { %1037 = vmatpush2.msra.mxu1 %v10243_v20  ;;  %913 = vmatprep.subr.mxu0 %v6579_v60  ;;  %v10250_v60 = vld [vmem:[#allocation26_spill] sm:$0xff] }
  0xd6   :  { %1039 = vmatprep.subr.mxu1 %v10244_v53  ;;  %916 = vmatpush2.msra.mxu0 %v6590_v58  ;;  %v10252_v58 = vld [vmem:[#allocation27_spill] sm:$0xff] }
  0xd7   :  { %1041 = vmatpush2.msra.mxu1 %v10245_v36  ;;  %919 = vmatprep.subr.mxu0 %v6611_v21  ;;  %v10251_v36 = vld [vmem:[#allocation210_spill] sm:$0xff] }
  0xd8   :  { %1043 = vmatprep.subr.mxu1 %v10246_v52  ;;  %922 = vmatpush2.msra.mxu0 %v6622_v18  ;;  %v10253_v52 = vld [vmem:[#allocation213_spill] sm:$0xff]  ;;  %v10254_v21 = vld [vmem:[#allocation30_spill] sm:$0xff] }
  0xd9   :  { %1045 = vmatpush2.msra.mxu1 %v10247_v61  ;;  %928 = vmatmul.mubr.f32.vlgmr.msra.gmra.mxu0 %v6538_v33  ;;  %v10255_v18 = vld [vmem:[#allocation33_spill] sm:$0xff]  ;;  %v10256_v33 = vld [vmem:[#allocation36_spill] sm:$0xff] }
  0xda   :  { %1047 = vmatprep.subr.mxu1 %v6366_v55  ;;  %1078 = vmatprep.subr.mxu0 %v10248_v14  ;;  %v10257_v14 = vld [vmem:[#allocation40_spill] sm:$0xff] }
  0xdb   :  { %1049 = vmatpush2.msra.mxu1 %v10249_v1  ;;  %1082 = vmatpush1.msra.mxu0 %v10250_v60  ;;  %v10259_v60 = vld [vmem:[#allocation250_spill] sm:$0xff] }
  0xdc   :  { %1051 = vmatprep.subr.mxu1 %v10251_v36  ;;  %1086 = vmatprep.subr.mxu0 %v10252_v58  ;;  %v10258_v58 = vld [vmem:[#allocation48_spill] sm:$0xff] }
  0xdd   :  { %1053 = vmatpush2.msra.mxu1 %v10253_v52  ;;  %1090 = vmatpush1.msra.mxu0 %v10254_v21  ;;  %v10260_v21 = vld [vmem:[#allocation52_spill] sm:$0xff] }
  0xde   :  { %1055 = vmatprep.subr.mxu1 %v6427_v46  ;;  %1094 = vmatprep.subr.mxu0 %v10255_v18  ;;  %v10261_v18 = vld [vmem:[#allocation55_spill] sm:$0xff] }
  0xdf   :  { %1057 = vmatpush2.msra.mxu1 %v6453_v13  ;;  %1098 = vmatpush1.msra.mxu0 %v10256_v33  ;;  %v10262_v33 = vld [vmem:[#allocation58_spill] sm:$0xff] }
  0xe0   :  { %1059 = vmatprep.subr.mxu1 %v6471_v26  ;;  %1102 = vmatprep.subr.mxu0 %v10257_v14  ;;  %v10263_v14 = vld [vmem:[#allocation62_spill] sm:$0xff] }
  0xe1   :  { %1061 = vmatpush2.msra.mxu1 %v6492_v19  ;;  %1065 = vmatprep.mubr.f32.mxu1 %v6570_v56  ;;  %v10264_v56 = vld [vmem:[#allocation65_spill] sm:$0xff] }
  0xe2   :  { %1106 = vmatpush1.msra.mxu0 %v10258_v58  ;;  %1069 = vmatmul.mubr.f32.vlgmr.msra.gmra.mxu1 %v10259_v60  ;;  %v10265_v58 = vld [vmem:[#allocation68_spill] sm:$0xff] }
  0xe3   :  { %1110 = vmatprep.subr.mxu0 %v10260_v21  ;;  %1341 = vmatprep.subr.mxu1 %v5505_v3  ;;  %v10266_v21 = vld [vmem:[#allocation74_spill] sm:$0xff]  ;;  %v10353_v3 = vld [vmem:[#allocation253_spill] sm:$0xff] }
  0xe4   :  { %1114 = vmatpush1.msra.mxu0 %v10261_v18  ;;  %1343 = vmatpush1.msra.mxu1 %v5507_v4  ;;  %v10267_v18 = vld [vmem:[#allocation77_spill] sm:$0xff] }
  0xe5   :  { %1118 = vmatprep.subr.mxu0 %v10262_v33  ;;  %1345 = vmatprep.subr.mxu1 %v5509_v5  ;;  %v10268_v33 = vld [vmem:[#allocation83_spill] sm:$0xff] }
  0xe6   :  { %1122 = vmatpush1.msra.mxu0 %v10263_v14  ;;  %1347 = vmatpush1.msra.mxu1 %v5511_v9  ;;  %v10269_v14 = vld [vmem:[#allocation87_spill] sm:$0xff] }
  0xe7   :  { %1126 = vmatprep.subr.mxu0 %v10264_v56  ;;  %1349 = vmatprep.subr.mxu1 %v5513_v10  ;;  %v10270_v56 = vld [vmem:[#allocation91_spill] sm:$0xff] }
  0xe8   :  { %1130 = vmatpush1.msra.mxu0 %v10265_v58  ;;  %1351 = vmatpush1.msra.mxu1 %v5515_v11  ;;  %v10271_v58 = vld [vmem:[#allocation93_spill] sm:$0xff]  ;;  %v10346_v10 = vld [vmem:[#allocation247_spill] sm:$0xff] }
  0xe9   :  { %1134 = vmatprep.subr.mxu0 %v10266_v21  ;;  %1353 = vmatprep.subr.mxu1 %v5518_v15  ;;  %v10272_v21 = vld [vmem:[#allocation97_spill] sm:$0xff]  ;;  %v10350_v5 = vld [vmem:[#allocation251_spill] sm:$0xff] }
  0xea   :  { %1138 = vmatpush1.msra.mxu0 %v10267_v18  ;;  %1355 = vmatpush1.msra.mxu1 %v5520_v16  ;;  %v10273_v18 = vld [vmem:[#allocation100_spill] sm:$0xff]  ;;  %v10341_v16 = vld [vmem:[#allocation242_spill] sm:$0xff] }
  0xeb   :  { %1142 = vmatprep.subr.mxu0 %v10268_v33  ;;  %1357 = vmatprep.subr.mxu1 %v5522_v17  ;;  %v10274_v33 = vld [vmem:[#allocation106_spill] sm:$0xff] }
  0xec   :  { %1146 = vmatpush1.msra.mxu0 %v10269_v14  ;;  %1359 = vmatpush1.msra.mxu1 %v5535_v22  ;;  %v10275_v14 = vld [vmem:[#allocation109_spill] sm:$0xff]  ;;  %v132_v22 = vld [vmem:[#allocation4 + $0x80] sm:$0xff] }
  0xed   :  { %1150 = vmatprep.subr.mxu0 %v10270_v56  ;;  %1361 = vmatprep.subr.mxu1 %v5541_v24  ;;  %v10276_v56 = vld [vmem:[#allocation115_spill] sm:$0xff]  ;;  %v10337_v24 = vld [vmem:[#allocation236_spill] sm:$0xff]  ;;  %v6997_v4 = vand.u32 4294901760, %v132_v22 }
  0xee   :  { %1154 = vmatpush1.msra.mxu0 %v10271_v58  ;;  %1363 = vmatpush1.msra.mxu1 %v10172_v12  ;;  %v10277_v58 = vld [vmem:[#allocation119_spill] sm:$0xff]  ;;  %v133_v12 = vld [vmem:[#allocation4 + $0x88] sm:$0xff] }
  0xef   :  { %1158 = vmatprep.subr.mxu0 %v10272_v21  ;;  %1365 = vmatprep.subr.mxu1 %v10174_v62  ;;  %v10278_v21 = vld [vmem:[#allocation123_spill] sm:$0xff]  ;;  %v10334_v62 = vld [vmem:[#allocation234_spill] sm:$0xff]  ;;  %10352 = vst [vmem:[#allocation308_spill] sm:$0xff] %v6997_v4 }
  0xf0   :  { %1162 = vmatpush1.msra.mxu0 %v10273_v18  ;;  %1367 = vmatpush1.msra.mxu1 %v10176_v44  ;;  %v10279_v18 = vld [vmem:[#allocation125_spill] sm:$0xff] }
  0xf1   :  { %1166 = vmatprep.subr.mxu0 %v10274_v33  ;;  %1369 = vmatprep.subr.mxu1 %v10178_v27  ;;  %v10280_v33 = vld [vmem:[#allocation129_spill] sm:$0xff] }
  0xf2   :  { %1170 = vmatpush1.msra.mxu0 %v10275_v14  ;;  %1371 = vmatpush1.msra.mxu1 %v10180_v29  ;;  %v10281_v14 = vld [vmem:[#allocation132_spill] sm:$0xff]  ;;  %v135_v29 = vld [vmem:[#allocation4 + $0x98] sm:$0xff] }
  0xf3   :  { %1174 = vmatprep.subr.mxu0 %v10276_v56  ;;  %1373 = vmatprep.subr.mxu1 %v10182_v41  ;;  %v10282_v56 = vld [vmem:[#allocation138_spill] sm:$0xff] }
  0xf4   :  { %1178 = vmatpush1.msra.mxu0 %v10277_v58  ;;  %1375 = vmatpush1.msra.mxu1 %v10184_v47  ;;  %v10283_v58 = vld [vmem:[#allocation141_spill] sm:$0xff] }
  0xf5   :  { %1182 = vmatprep.subr.mxu0 %v10278_v21  ;;  %1377 = vmatprep.subr.mxu1 %v10186_v57  ;;  %v10284_v21 = vld [vmem:[#allocation147_spill] sm:$0xff] }
  0xf6   :  { %1186 = vmatpush1.msra.mxu0 %v10279_v18  ;;  %1379 = vmatpush1.msra.mxu1 %v10188_v54  ;;  %v10285_v18 = vld [vmem:[#allocation151_spill] sm:$0xff] }
  0xf7   :  { %1190 = vmatprep.subr.mxu0 %v10280_v33  ;;  %1381 = vmatprep.subr.mxu1 %v10190_v42  ;;  %v10286_v33 = vld [vmem:[#allocation155_spill] sm:$0xff] }
  0xf8   :  { %1194 = vmatpush1.msra.mxu0 %v10281_v14  ;;  %1383 = vmatpush1.msra.mxu1 %v10192_v8  ;;  %v10287_v14 = vld [vmem:[#allocation157_spill] sm:$0xff]  ;;  %v10308_v8 = vld [vmem:[#allocation202_spill] sm:$0xff]  ;;  %v10317_v57 = vld [vmem:[#allocation215_spill] sm:$0xff] }
  0xf9   :  { %1198 = vmatprep.subr.mxu0 %v10282_v56  ;;  %1385 = vmatprep.subr.mxu1 %v10194_v0  ;;  %v10288_v56 = vld [vmem:[#allocation161_spill] sm:$0xff] }
  0xfa   :  { %1202 = vmatpush1.msra.mxu0 %v10283_v58  ;;  %1387 = vmatpush1.msra.mxu1 %v10196_v59  ;;  %v10289_v58 = vld [vmem:[#allocation164_spill] sm:$0xff]  ;;  %v142_v59 = vld [vmem:[#allocation4 + $0xd0] sm:$0xff]  ;;  %v10303_v0 = vld [vmem:[#allocation193_spill] sm:$0xff] }
  0xfb   :  { %1206 = vmatprep.subr.mxu0 %v10284_v21  ;;  %1389 = vmatprep.subr.mxu1 %v10198_v51  ;;  %v147_v21 = vld [vmem:[#allocation4 + $0xf8] sm:$0xff]  ;;  %v10301_v51 = vld [vmem:[#allocation117_spill] sm:$0xff]  ;;  %v6883_v42 = vand.u32 4294901760, %v142_v59 }
  0xfc   :  { %1210 = vmatpush2.msra.mxu0 %v10285_v18  ;;  %1391 = vmatpush1.msra.mxu1 %v10200_v45  ;;  %v10290_v18 = vld [vmem:[#allocation170_spill] sm:$0xff]  ;;  %v10297_v45 = vld [vmem:[#allocation187_spill] sm:$0xff] }
  0xfd   :  { %1214 = vmatprep.subr.mxu0 %v10286_v33  ;;  %1393 = vmatprep.subr.mxu1 %v10202_v32  ;;  %v10291_v33 = vld [vmem:[#allocation173_spill] sm:$0xff]  ;;  %v10292_v32 = vld [vmem:[#allocation179_spill] sm:$0xff]  ;;  %10310 = vst [vmem:[#allocation278_spill] sm:$0xff] %v6883_v42 }
  0xfe   :  { %1218 = vmatpush2.msra.mxu0 %v10287_v14  ;;  %1395 = vmatpush1.msra.mxu1 %v10204_v40  ;;  %v146_v14 = vld [vmem:[#allocation4 + $0xf0] sm:$0xff]  ;;  %v10293_v40 = vld [vmem:[#allocation107_spill] sm:$0xff] }
  0xff   :  { %1222 = vmatprep.subr.mxu0 %v10288_v56  ;;  %1397 = vmatprep.subr.mxu1 %v10206_v43  ;;  %v6858_v56 = vand.u32 4294901760, %v147_v21  ;;  %v145_v43 = vld [vmem:[#allocation4 + $0xe8] sm:$0xff] }
 0x100   :  { %1226 = vmatpush2.msra.mxu0 %v10289_v58  ;;  %1399 = vmatpush1.msra.mxu1 %v10208_v35  ;;  %v10295_v58 = vld [vmem:[#allocation183_spill] sm:$0xff] }
 0x101   :  { %1230 = vmatprep.subr.mxu0 %v10290_v18  ;;  %1401 = vmatprep.subr.mxu1 %v10210_v2  ;;  %10294 = vst [vmem:[#allocation272_spill] sm:$0xff] %v6858_v56  ;;  %v10296_v35 = vld [vmem:[#allocation111_spill] sm:$0xff]  ;;  %v10298_v18 = vld [vmem:[#allocation114_spill] sm:$0xff]  ;;  %v6864_v2 = vand.u32 4294901760, %v146_v14 }
 0x102   :  { %1234 = vmatpush2.msra.mxu0 %v10291_v33  ;;  %1403 = vmatpush1.msra.mxu1 %v10212_v31  ;;  %v144_v33 = vld [vmem:[#allocation4 + $0xe0] sm:$0xff]  ;;  %v10300_v31 = vld [vmem:[#allocation189_spill] sm:$0xff] }
 0x103   :  { %1238 = vmatprep.subr.mxu0 %v10292_v32  ;;  %1405 = vmatprep.subr.mxu1 %v10293_v40  ;;  %10299 = vst [vmem:[#allocation273_spill] sm:$0xff] %v6864_v2  ;;  %v6868_v32 = vand.u32 4294901760, %v145_v43  ;;  %v143_v40 = vld [vmem:[#allocation4 + $0xd8] sm:$0xff] }
 0x104   :  { %1242 = vmatpush2.msra.mxu0 %v10295_v58  ;;  %1407 = vmatpush2.msra.mxu1 %v10296_v35  ;;  %v10304_v58 = vld [vmem:[#allocation121_spill] sm:$0xff]  ;;  %v6873_v35 = vsub.f32 %v147_v21, %v6858_v56 }
 0x105   :  { %1246 = vmatprep.subr.mxu0 %v10297_v45  ;;  %1409 = vmatprep.subr.mxu1 %v10298_v18  ;;  %10302 = vst [vmem:[#allocation274_spill] sm:$0xff] %v6868_v32  ;;  %v10306_v45 = vld [vmem:[#allocation196_spill] sm:$0xff]  ;;  %v6877_v18 = vand.u32 4294901760, %v144_v33  ;;  %v10312_v21 = vld [vmem:[#allocation205_spill] sm:$0xff] }
 0x106   :  { %1250 = vmatpush2.msra.mxu0 %v10300_v31  ;;  %1411 = vmatpush2.msra.mxu1 %v10301_v51  ;;  %10305 = vst [vmem:[#allocation275_spill] sm:$0xff] %v6873_v35  ;;  %v141_v31 = vld [vmem:[#allocation4 + $0xc8] sm:$0xff]  ;;  %v6881_v51 = vand.u32 4294901760, %v143_v40  ;;  %v6898_v54 = vand.u32 4294901760, %v6873_v35 }
 0x107   :  { %1254 = vmatprep.subr.mxu0 %v10303_v0  ;;  %1413 = vmatprep.subr.mxu1 %v10304_v58  ;;  %10307 = vst [vmem:[#allocation276_spill] sm:$0xff] %v6877_v18  ;;  %v140_v0 = vld [vmem:[#allocation4 + $0xc0] sm:$0xff]  ;;  %v6886_v58 = vsub.f32 %v146_v14, %v6864_v2 }
 0x108   :  { %1258 = vmatpush2.msra.mxu0 %v10306_v45  ;;  %1415 = vmatpush2.msra.mxu1 %v10224_v39  ;;  %10309 = vst [vmem:[#allocation277_spill] sm:$0xff] %v6881_v51  ;;  %v6891_v45 = vsub.f32 %v145_v43, %v6868_v32  ;;  %v10314_v39 = vld [vmem:[#allocation211_spill] sm:$0xff]  ;;  %10316 = vst [vmem:[#allocation282_spill] sm:$0xff] %v6898_v54  ;;  %v6902_v14 = vand.u32 4294901760, %v140_v0  ;;  %v6905_v43 = vsub.f32 %v144_v33, %v6877_v18 }
 0x109   :  { %1262 = vmatprep.subr.mxu0 %v10308_v8  ;;  %1417 = vmatprep.subr.mxu1 %v10226_v6  ;;  %10311 = vst [vmem:[#allocation279_spill] sm:$0xff] %v6886_v58  ;;  %v6895_v8 = vand.u32 4294901760, %v141_v31  ;;  %v139_v6 = vld [vmem:[#allocation4 + $0xb8] sm:$0xff]  ;;  %v6913_v47 = vsub.f32 %v143_v40, %v6881_v51  ;;  %v1625_v40 = vsub.f32 %v6873_v35, %v6898_v54  ;;  %v10368_v54 = vld [vmem:[#allocation194_spill] sm:$0xff] }
 0x10a   :  { %1266 = vmatpush2.msra.mxu0 %v10312_v21  ;;  %1419 = vmatpush2.msra.mxu1 %v10228_v63  ;;  %10313 = vst [vmem:[#allocation280_spill] sm:$0xff] %v6891_v45  ;;  %10318 = vst [vmem:[#allocation283_spill] sm:$0xff] %v6902_v14  ;;  %v138_v21 = vld [vmem:[#allocation4 + $0xb0] sm:$0xff]  ;;  %v10320_v63 = vld [vmem:[#allocation219_spill] sm:$0xff]  ;;  %v6920_v33 = vand.u32 4294901760, %v139_v6  ;;  %v6942_v44 = vsub.f32 %v140_v0, %v6902_v14 }
 0x10b   :  { %1270 = vmatprep.subr.mxu0 %v10314_v39  ;;  %1421 = vmatprep.subr.mxu1 %v10230_v30  ;;  %10315 = vst [vmem:[#allocation281_spill] sm:$0xff] %v6895_v8  ;;  %10319 = vst [vmem:[#allocation284_spill] sm:$0xff] %v6905_v43  ;;  %v6910_v39 = vand.u32 4294901760, %v6886_v58  ;;  %v137_v30 = vld [vmem:[#allocation4 + $0xa8] sm:$0xff]  ;;  %v6929_v41 = vand.u32 4294901760, %v138_v21  ;;  %v6967_v15 = vand.u32 4294901760, %v1625_v40 }
 0x10c   :  { %1274 = vmatpush2.msra.mxu0 %v10317_v57  ;;  %1423 = vmatpush2.msra.mxu1 %v10232_v38  ;;  %10322 = vst [vmem:[#allocation286_spill] sm:$0xff] %v6913_v47  ;;  %v6916_v57 = vsub.f32 %v142_v59, %v6883_v42  ;;  %v10324_v38 = vld [vmem:[#allocation221_spill] sm:$0xff]  ;;  %10325 = vst [vmem:[#allocation288_spill] sm:$0xff] %v6920_v33  ;;  %v136_v59 = vld [vmem:[#allocation4 + $0xa0] sm:$0xff]  ;;  %v6936_v27 = vand.u32 4294901760, %v137_v30  ;;  %v6963_v17 = vsub.f32 %v139_v6, %v6920_v33 }
 0x10d   :  { %1278 = vmatprep.subr.mxu0 %v10320_v63  ;;  %1425 = vmatprep.subr.mxu1 %v10234_v7  ;;  %10321 = vst [vmem:[#allocation285_spill] sm:$0xff] %v6910_v39  ;;  %v6923_v63 = vand.u32 4294901760, %v6891_v45  ;;  %v10327_v7 = vld [vmem:[#allocation225_spill] sm:$0xff]  ;;  %10328 = vst [vmem:[#allocation290_spill] sm:$0xff] %v6929_v41  ;;  %v6975_v11 = vsub.f32 %v138_v21, %v6929_v41  ;;  %v6984_v40 = vand.u32 4294901760, %v6942_v44 }
 0x10e   :  { %10323 = vst [vmem:[#allocation287_spill] sm:$0xff] %v6916_v57  ;;  %1282 = vmatpush2.msra.mxu0 %v10324_v38  ;;  %1427 = vmatpush2.msra.mxu1 %v10235_v48  ;;  %v6932_v38 = vsub.f32 %v141_v31, %v6895_v8  ;;  %v10330_v48 = vld [vmem:[#allocation228_spill] sm:$0xff]  ;;  %10331 = vst [vmem:[#allocation292_spill] sm:$0xff] %v6936_v27  ;;  %v1631_v31 = vsub.f32 %v6886_v58, %v6910_v39  ;;  %v10367_v39 = vld [vmem:[#allocation266_spill] sm:$0xff] }
 0x10f   :  { %10326 = vst [vmem:[#allocation289_spill] sm:$0xff] %v6923_v63  ;;  %1286 = vmatprep.subr.mxu0 %v10327_v7  ;;  %1429 = vmatprep.subr.mxu1 %v10236_v25  ;;  %v6939_v7 = vand.u32 4294901760, %v6905_v43  ;;  %v134_v25 = vld [vmem:[#allocation4 + $0x90] sm:$0xff]  ;;  %10333 = vst [vmem:[#allocation294_spill] sm:$0xff] %v6942_v44  ;;  %v1637_v0 = vsub.f32 %v6891_v45, %v6923_v63  ;;  %v6987_v9 = vsub.f32 %v137_v30, %v6936_v27  ;;  %v125_v45 = vld [vmem:[#allocation4 + $0x48] sm:$0xff] }
 0x110   :  { %10329 = vst [vmem:[#allocation291_spill] sm:$0xff] %v6932_v38  ;;  %1290 = vmatpush2.msra.mxu0 %v10330_v48  ;;  %1431 = vmatpush2.msra.mxu1 %v10237_v23  ;;  %v6949_v48 = vand.u32 4294901760, %v6913_v47  ;;  %v6952_v23 = vand.u32 4294901760, %v6916_v57  ;;  %10340 = vst [vmem:[#allocation299_spill] sm:$0xff] %v6963_v17  ;;  %v6991_v21 = vand.u32 4294901760, %v1631_v31 }
 0x111   :  { %10332 = vst [vmem:[#allocation293_spill] sm:$0xff] %v6939_v7  ;;  %1294 = vmatprep.subr.mxu0 %v10334_v62  ;;  %1433 = vmatprep.subr.mxu1 %v10238_v49  ;;  %v6958_v62 = vand.u32 4294901760, %v136_v59  ;;  %v6960_v49 = vand.u32 4294901760, %v135_v29  ;;  %10342 = vst [vmem:[#allocation300_spill] sm:$0xff] %v6967_v15  ;;  %v1643_v6 = vsub.f32 %v6905_v43, %v6939_v7  ;;  %v7001_v30 = vand.u32 4294901760, %v1637_v0 }
 0x112   :  { %10335 = vst [vmem:[#allocation295_spill] sm:$0xff] %v6949_v48  ;;  %10336 = vst [vmem:[#allocation296_spill] sm:$0xff] %v6952_v23  ;;  %1298 = vmatpush2.msra.mxu0 %v10337_v24  ;;  %1435 = vmatpush2.msra.mxu1 %v10239_v37  ;;  %v6969_v24 = vand.u32 4294901760, %v134_v25  ;;  %v6972_v37 = vand.u32 4294901760, %v6932_v38  ;;  %v7019_v0 = vand.u32 4294901760, %v6975_v11 }
 0x113   :  { %10338 = vst [vmem:[#allocation297_spill] sm:$0xff] %v6958_v62  ;;  %10339 = vst [vmem:[#allocation298_spill] sm:$0xff] %v6960_v49  ;;  %1302 = vmatprep.subr.mxu0 %v10341_v16  ;;  %1437 = vmatprep.subr.mxu1 %v10240_v28  ;;  %v6981_v16 = vand.u32 4294901760, %v133_v12  ;;  %v131_v28 = vld [vmem:[#allocation4 + $0x78] sm:$0xff]  ;;  %v7007_v31 = vsub.f32 %v136_v59, %v6958_v62  ;;  %v7010_v60 = vsub.f32 %v135_v29, %v6960_v49  ;;  %v10362_v59 = vld [vmem:[#allocation261_spill] sm:$0xff] }
 0x114   :  { %10343 = vst [vmem:[#allocation301_spill] sm:$0xff] %v6969_v24  ;;  %10344 = vst [vmem:[#allocation302_spill] sm:$0xff] %v6972_v37  ;;  %1306 = vmatpush2.msra.mxu0 %v10346_v10  ;;  %1439 = vmatpush2.msra.mxu1 %v10241_v34  ;;  %v1649_v10 = vsub.f32 %v6913_v47, %v6949_v48  ;;  %v1655_v34 = vsub.f32 %v6916_v57, %v6952_v23  ;;  %v10358_v48 = vld [vmem:[#allocation258_spill] sm:$0xff]  ;;  %v129_v23 = vld [vmem:[#allocation4 + $0x68] sm:$0xff]  ;;  %v7026_v63 = vand.u32 4294901760, %v1643_v6 }
 0x115   :  { %10345 = vst [vmem:[#allocation303_spill] sm:$0xff] %v6975_v11  ;;  %10347 = vst [vmem:[#allocation304_spill] sm:$0xff] %v6981_v16  ;;  %1310 = vmatprep.subr.mxu0 %v10350_v5  ;;  %1441 = vmatprep.subr.mxu1 %v10242_v50  ;;  %v7004_v5 = vand.u32 4294901760, %v6963_v17  ;;  %v130_v50 = vld [vmem:[#allocation4 + $0x70] sm:$0xff]  ;;  %v7022_v7 = vsub.f32 %v134_v25, %v6969_v24  ;;  %v128_v6 = vld [vmem:[#allocation4 + $0x60] sm:$0xff]  ;;  %v1679_v47 = vsub.f32 %v6975_v11, %v7019_v0 }
 0x116   :  { %10348 = vst [vmem:[#allocation305_spill] sm:$0xff] %v6984_v40  ;;  %10349 = vst [vmem:[#allocation306_spill] sm:$0xff] %v6987_v9  ;;  %1314 = vmatpush2.msra.mxu0 %v10353_v3  ;;  %1443 = vmatpush2.msra.mxu1 %v10243_v20  ;;  %v1661_v3 = vsub.f32 %v6932_v38, %v6972_v37  ;;  %v7016_v20 = vand.u32 4294901760, %v131_v28  ;;  %v10363_v29 = vld [vmem:[#allocation190_spill] sm:$0xff]  ;;  %v7034_v37 = vsub.f32 %v133_v12, %v6981_v16  ;;  %v124_v11 = vld [vmem:[#allocation4 + $0x40] sm:$0xff] }
 0x117   :  { %10351 = vst [vmem:[#allocation307_spill] sm:$0xff] %v6991_v21  ;;  %10354 = vst [vmem:[#allocation309_spill] sm:$0xff] %v7001_v30  ;;  %1318 = vmatprep.subr.mxu0 %v10358_v48  ;;  %1445 = vmatprep.subr.mxu1 %v10244_v53  ;;  %v1667_v48 = vsub.f32 %v6942_v44, %v6984_v40  ;;  %v7031_v53 = vand.u32 4294901760, %v6987_v9  ;;  %v7038_v25 = vand.u32 4294901760, %v1649_v10  ;;  %v10373_v40 = vld [vmem:[#allocation268_spill] sm:$0xff]  ;;  %v7054_v10 = vand.u32 4294901760, %v7007_v31 }
 0x118   :  { %10355 = vst [vmem:[#allocation310_spill] sm:$0xff] %v7004_v5  ;;  %10356 = vst [vmem:[#allocation311_spill] sm:$0xff] %v7007_v31  ;;  %1322 = vmatpush2.msra.mxu0 %v10362_v59  ;;  %1447 = vmatpush2.msra.mxu1 %v10363_v29  ;;  %v7040_v59 = vand.u32 4294901760, %v1655_v34  ;;  %v7042_v29 = vand.u32 4294901760, %v130_v50  ;;  %v7045_v38 = vsub.f32 %v132_v22, %v6997_v4  ;;  %v10374_v44 = vld [vmem:[#allocation240_spill] sm:$0xff]  ;;  %v127_v34 = vld [vmem:[#allocation4 + $0x58] sm:$0xff] }
 0x119   :  { %10357 = vst [vmem:[#allocation312_spill] sm:$0xff] %v7010_v60  ;;  %10359 = vst [vmem:[#allocation313_spill] sm:$0xff] %v7016_v20  ;;  %1326 = vmatprep.subr.mxu0 %v10367_v39  ;;  %1449 = vmatprep.subr.mxu1 %v10368_v54  ;;  %v1673_v12 = vsub.f32 %v6963_v17, %v7004_v5  ;;  %v7051_v39 = vand.u32 4294901760, %v129_v23  ;;  %v7057_v54 = vand.u32 4294901760, %v7010_v60  ;;  %v126_v57 = vld [vmem:[#allocation4 + $0x50] sm:$0xff]  ;;  %v10378_v22 = vld [vmem:[#allocation237_spill] sm:$0xff] }
 0x11a   :  { %10360 = vst [vmem:[#allocation314_spill] sm:$0xff] %v7019_v0  ;;  %10361 = vst [vmem:[#allocation315_spill] sm:$0xff] %v7022_v7  ;;  %1330 = vmatpush2.msra.mxu0 %v10373_v40  ;;  %1332 = vmatprep.mubr.f32.mxu0 %v10374_v44  ;;  %v7061_v40 = vand.u32 4294901760, %v1661_v3  ;;  %v7066_v5 = vand.u32 4294901760, %v7022_v7  ;;  %v7069_v17 = vsub.f32 %v131_v28, %v7016_v20  ;;  %v7073_v43 = vand.u32 4294901760, %v1667_v48 }
 0x11b   :  { %10364 = vst [vmem:[#allocation316_spill] sm:$0xff] %v7026_v63  ;;  %10365 = vst [vmem:[#allocation317_spill] sm:$0xff] %v7031_v53  ;;  %1451 = vmatpush2.msra.mxu1 %v10247_v61  ;;  %1334 = vmatmul.mubr.f32.vlgmr.msra.gmra.mxu0 %v10378_v22  ;;  %v1685_v61 = vsub.f32 %v6987_v9, %v7031_v53  ;;  %v7077_v3 = vand.u32 4294901760, %v128_v6  ;;  %v7080_v0 = vand.u32 4294901760, %v7034_v37  ;;  %v7084_v28 = vand.u32 4294901760, %v127_v34 }
 0x11c   :  { %10366 = vst [vmem:[#allocation318_spill] sm:$0xff] %v7034_v37  ;;  %10369 = vst [vmem:[#allocation319_spill] sm:$0xff] %v7038_v25  ;;  %1453 = vmatprep.subr.mxu1 %v6366_v55  ;;  %1478 = vmatprep.subr.mxu0 %v6858_v56  ;;  %v7086_v55 = vand.u32 4294901760, %v126_v57  ;;  %v7089_v48 = vand.u32 4294901760, %v7045_v38  ;;  %v7092_v53 = vsub.f32 %v130_v50, %v7042_v29  ;;  %v7096_v9 = vand.u32 4294901760, %v1673_v12 }
 0x11d   :  { %10370 = vst [vmem:[#allocation320_spill] sm:$0xff] %v7040_v59  ;;  %10371 = vst [vmem:[#allocation321_spill] sm:$0xff] %v7042_v29  ;;  %1455 = vmatpush2.msra.mxu1 %v10249_v1  ;;  %1480 = vmatpush1.msra.mxu0 %v6864_v2  ;;  %v1691_v1 = vsub.f32 %v7007_v31, %v7054_v10  ;;  %v1697_v2 = vsub.f32 %v7010_v60, %v7057_v54  ;;  %v7107_v50 = vand.u32 4294901760, %v1679_v47  ;;  %v117_v60 = vld [vmem:[#allocation4 + $0x8] sm:$0xff] }
 0x11e   :  { %10372 = vst [vmem:[#allocation322_spill] sm:$0xff] %v7045_v38  ;;  %10375 = vst [vmem:[#allocation323_spill] sm:$0xff] %v7051_v39  ;;  %1457 = vmatprep.subr.mxu1 %v10251_v36  ;;  %1482 = vmatprep.subr.mxu0 %v6868_v32  ;;  %v7103_v56 = vsub.f32 %v129_v23, %v7051_v39  ;;  %v1703_v36 = vsub.f32 %v7022_v7, %v7066_v5  ;;  %v7111_v12 = vand.u32 4294901760, %v125_v45  ;;  %v123_v32 = vld [vmem:[#allocation4 + $0x38] sm:$0xff] }
 0x11f   :  { %10376 = vst [vmem:[#allocation324_spill] sm:$0xff] %v7054_v10  ;;  %10377 = vst [vmem:[#allocation325_spill] sm:$0xff] %v7057_v54  ;;  %1459 = vmatpush2.msra.mxu1 %v10253_v52  ;;  %1484 = vmatpush1.msra.mxu0 %v6877_v18  ;;  %v7114_v10 = vand.u32 4294901760, %v7069_v17  ;;  %v7118_v23 = vand.u32 4294901760, %v1685_v61  ;;  %v1709_v52 = vsub.f32 %v7034_v37, %v7080_v0  ;;  %v7122_v47 = vand.u32 4294901760, %v124_v11  ;;  %v122_v54 = vld [vmem:[#allocation4 + $0x30] sm:$0xff] }
 0x120   :  { %10379 = vst [vmem:[#allocation326_spill] sm:$0xff] %v7061_v40  ;;  %10380 = vst [vmem:[#allocation327_spill] sm:$0xff] %v7066_v5  ;;  %1461 = vmatprep.subr.mxu1 %v6427_v46  ;;  %1486 = vmatprep.subr.mxu0 %v6881_v51  ;;  %v7125_v5 = vsub.f32 %v128_v6, %v7077_v3  ;;  %v1715_v46 = vsub.f32 %v7045_v38, %v7089_v48  ;;  %v7132_v7 = vand.u32 4294901760, %v7092_v53  ;;  %v121_v61 = vld [vmem:[#allocation4 + $0x28] sm:$0xff]  ;;  %v119_v38 = vld [vmem:[#allocation4 + $0x18] sm:$0xff] }
 0x121   :  { %10381 = vst [vmem:[#allocation328_spill] sm:$0xff] %v7069_v17  ;;  %10382 = vst [vmem:[#allocation329_spill] sm:$0xff] %v7073_v43  ;;  %1463 = vmatpush2.msra.mxu1 %v6453_v13  ;;  %1488 = vmatpush1.msra.mxu0 %v6883_v42  ;;  %v7135_v51 = vsub.f32 %v127_v34, %v7084_v28  ;;  %v7142_v6 = vand.u32 4294901760, %v1691_v1  ;;  %v7144_v13 = vand.u32 4294901760, %v1697_v2  ;;  %v7146_v37 = vand.u32 4294901760, %v123_v32  ;;  %v120_v1 = vld [vmem:[#allocation4 + $0x20] sm:$0xff] }
 0x122   :  { %10383 = vst [vmem:[#allocation330_spill] sm:$0xff] %v7077_v3  ;;  %10384 = vst [vmem:[#allocation331_spill] sm:$0xff] %v7080_v0  ;;  %v7138_v0 = vsub.f32 %v126_v57, %v7086_v55  ;;  %1465 = vmatprep.subr.mxu1 %v6471_v26  ;;  %1490 = vmatprep.subr.mxu0 %v6895_v8  ;;  %v7153_v34 = vand.u32 4294901760, %v1703_v36  ;;  %v1721_v57 = vsub.f32 %v7069_v17, %v7114_v10  ;;  %v118_v42 = vld [vmem:[#allocation4 + $0x10] sm:$0xff] }
 0x123   :  { %10385 = vst [vmem:[#allocation332_spill] sm:$0xff] %v7084_v28  ;;  %10386 = vst [vmem:[#allocation333_spill] sm:$0xff] %v7086_v55  ;;  %1467 = vmatpush2.msra.mxu1 %v6492_v19  ;;  %1469 = vmatprep.mubr.f32.mxu1 %v10374_v44  ;;  %v7157_v26 = vand.u32 4294901760, %v122_v54  ;;  %v7160_v2 = vsub.f32 %v125_v45, %v7111_v12  ;;  %v7164_v8 = vand.u32 4294901760, %v1709_v52  ;;  %v7166_v19 = vand.u32 4294901760, %v121_v61 }
 0x124   :  { %10387 = vst [vmem:[#allocation334_spill] sm:$0xff] %v7089_v48  ;;  %10388 = vst [vmem:[#allocation335_spill] sm:$0xff] %v7092_v53  ;;  %v7149_v48 = vand.u32 4294901760, %v7103_v56  ;;  %1492 = vmatpush1.msra.mxu0 %v6902_v14  ;;  %1471 = vmatmul.mubr.f32.vlgmr.msra.gmra.mxu1 %v10378_v22  ;;  %v7169_v36 = vand.u32 4294901760, %v7125_v5  ;;  %v7176_v45 = vand.u32 4294901760, %v1715_v46  ;;  %v1727_v17 = vsub.f32 %v7092_v53, %v7132_v7 }
 0x125   :  { %10389 = vst [vmem:[#allocation336_spill] sm:$0xff] %v7096_v9  ;;  %10390 = vst [vmem:[#allocation337_spill] sm:$0xff] %v7103_v56  ;;  %1494 = vmatprep.subr.mxu0 %v6920_v33  ;;  %1627 = vmatprep.subr.mxu1 %v6967_v15  ;;  %v7181_v52 = vand.u32 4294901760, %v7135_v51  ;;  %v7184_v14 = vand.u32 4294901760, %v7138_v0  ;;  %v7190_v15 = vand.u32 4294901760, %v120_v1  ;;  %v7192_v46 = vand.u32 4294901760, %v119_v38 }
 0x126   :  { %10391 = vst [vmem:[#allocation338_spill] sm:$0xff] %v7107_v50  ;;  %10392 = vst [vmem:[#allocation339_spill] sm:$0xff] %v7111_v12  ;;  %1496 = vmatpush1.msra.mxu0 %v6929_v41  ;;  %1633 = vmatpush1.msra.mxu1 %v6991_v21  ;;  %v116_v33 = vld [vmem:[#allocation4] sm:$0xff]  ;;  %v7199_v53 = vand.u32 4294901760, %v1721_v57  ;;  %v7201_v41 = vand.u32 4294901760, %v118_v42  ;;  %v7204_v21 = vand.u32 4294901760, %v7160_v2 }
 0x127   :  { %10393 = vst [vmem:[#allocation340_spill] sm:$0xff] %v7114_v10  ;;  %10394 = vst [vmem:[#allocation341_spill] sm:$0xff] %v7118_v23  ;;  %v7172_v10 = vsub.f32 %v124_v11, %v7122_v47  ;;  %v1733_v11 = vsub.f32 %v7103_v56, %v7149_v48  ;;  %1498 = vmatprep.subr.mxu0 %v6936_v27  ;;  %1639 = vmatprep.subr.mxu1 %v7001_v30  ;;  %v7213_v27 = vand.u32 4294901760, %v117_v60  ;;  %v179_v30 = vld [vmem:[#allocation4 + $0x1f8] sm:$0xff] }
 0x128   :  { %10395 = vst [vmem:[#allocation342_spill] sm:$0xff] %v7122_v47  ;;  %10396 = vst [vmem:[#allocation343_spill] sm:$0xff] %v7125_v5  ;;  %1500 = vmatpush1.msra.mxu0 %v6958_v62  ;;  %1645 = vmatpush1.msra.mxu1 %v7026_v63  ;;  %v7219_v56 = vsub.f32 %v121_v61, %v7166_v19  ;;  %v1745_v63 = vsub.f32 %v7135_v51, %v7181_v52  ;;  %v7229_v62 = vand.u32 4294901760, %v116_v33 }
 0x129   :  { %10397 = vst [vmem:[#allocation344_spill] sm:$0xff] %v7132_v7  ;;  %10398 = vst [vmem:[#allocation345_spill] sm:$0xff] %v7135_v51  ;;  %v7195_v7 = vsub.f32 %v123_v32, %v7146_v37  ;;  %v1739_v32 = vsub.f32 %v7125_v5, %v7169_v36  ;;  %v7216_v57 = vand.u32 4294901760, %v7172_v10  ;;  %1502 = vmatprep.subr.mxu0 %v6960_v49  ;;  %1651 = vmatprep.subr.mxu1 %v7038_v25  ;;  %v178_v25 = vld [vmem:[#allocation4 + $0x1f0] sm:$0xff] }
 0x12a   :  { %10399 = vst [vmem:[#allocation346_spill] sm:$0xff] %v7138_v0  ;;  %10400 = vst [vmem:[#allocation347_spill] sm:$0xff] %v7142_v6  ;;  %1504 = vmatpush1.msra.mxu0 %v6969_v24  ;;  %1657 = vmatpush1.msra.mxu1 %v7040_v59  ;;  %v7233_v61 = vand.u32 4294901760, %v1733_v11  ;;  %v7248_v59 = vand.u32 4294901760, %v179_v30  ;;  %v177_v24 = vld [vmem:[#allocation4 + $0x1e8] sm:$0xff] }
 0x12b   :  { %10401 = vst [vmem:[#allocation348_spill] sm:$0xff] %v7144_v13  ;;  %10402 = vst [vmem:[#allocation349_spill] sm:$0xff] %v7146_v37  ;;  %v7236_v49 = vand.u32 4294901760, %v7195_v7  ;;  %1506 = vmatprep.subr.mxu0 %v6981_v16  ;;  %1663 = vmatprep.subr.mxu1 %v7061_v40  ;;  %v7263_v40 = vand.u32 4294901760, %v7219_v56  ;;  %v7277_v16 = vsub.f32 %v116_v33, %v7229_v62 }
 0x12c   :  { %10403 = vst [vmem:[#allocation350_spill] sm:$0xff] %v7149_v48  ;;  %10404 = vst [vmem:[#allocation351_spill] sm:$0xff] %v7153_v34  ;;  %v7207_v48 = vsub.f32 %v122_v54, %v7157_v26  ;;  %v7223_v54 = vand.u32 4294901760, %v1727_v17  ;;  %v7239_v17 = vsub.f32 %v120_v1, %v7190_v15  ;;  %1508 = vmatpush1.msra.mxu0 %v6997_v4  ;;  %1669 = vmatpush1.msra.mxu1 %v7073_v43 }
 0x12d   :  { %10405 = vst [vmem:[#allocation352_spill] sm:$0xff] %v7157_v26  ;;  %10406 = vst [vmem:[#allocation353_spill] sm:$0xff] %v7160_v2  ;;  %v1763_v1 = vsub.f32 %v7172_v10, %v7216_v57  ;;  %1510 = vmatprep.subr.mxu0 %v7016_v20  ;;  %1675 = vmatprep.subr.mxu1 %v7096_v9  ;;  %v7274_v43 = vand.u32 4294901760, %v178_v25  ;;  %v174_v20 = vld [vmem:[#allocation4 + $0x1d0] sm:$0xff] }
 0x12e   :  { %10407 = vst [vmem:[#allocation354_spill] sm:$0xff] %v7164_v8  ;;  %10408 = vst [vmem:[#allocation355_spill] sm:$0xff] %v7166_v19  ;;  %v7251_v11 = vand.u32 4294901760, %v7207_v48  ;;  %1512 = vmatpush1.msra.mxu0 %v7042_v29  ;;  %1681 = vmatpush1.msra.mxu1 %v7107_v50  ;;  %v7301_v29 = vsub.f32 %v179_v30, %v7248_v59 }
 0x12f   :  { %10409 = vst [vmem:[#allocation356_spill] sm:$0xff] %v7169_v36  ;;  %10410 = vst [vmem:[#allocation357_spill] sm:$0xff] %v7172_v10  ;;  %v1751_v36 = vsub.f32 %v7138_v0, %v7184_v14  ;;  %v7254_v0 = vsub.f32 %v118_v42, %v7201_v41  ;;  %v7270_v42 = vand.u32 4294901760, %v1745_v63  ;;  %v7286_v63 = vand.u32 4294901760, %v7239_v17  ;;  %1514 = vmatprep.subr.mxu0 %v7051_v39  ;;  %v173_v39 = vld [vmem:[#allocation4 + $0x1c8] sm:$0xff] }
 0x130   :  { %10411 = vst [vmem:[#allocation358_spill] sm:$0xff] %v7176_v45  ;;  %10412 = vst [vmem:[#allocation359_spill] sm:$0xff] %v7181_v52  ;;  %v7242_v52 = vsub.f32 %v119_v38, %v7192_v46  ;;  %v7258_v38 = vand.u32 4294901760, %v1739_v32  ;;  %v176_v32 = vld [vmem:[#allocation4 + $0x1e0] sm:$0xff]  ;;  %1687 = vmatprep.subr.mxu1 %v7118_v23  ;;  %v1775_v50 = vsub.f32 %v7207_v48, %v7251_v11  ;;  %1516 = vmatpush1.msra.mxu0 %v7077_v3 }
 0x131   :  { %10413 = vst [vmem:[#allocation360_spill] sm:$0xff] %v7184_v14  ;;  %10414 = vst [vmem:[#allocation361_spill] sm:$0xff] %v7190_v15  ;;  %v1757_v14 = vsub.f32 %v7160_v2, %v7204_v21  ;;  %v7272_v4 = vand.u32 4294901760, %v1751_v36  ;;  %v175_v36 = vld [vmem:[#allocation4 + $0x1d8] sm:$0xff]  ;;  %1693 = vmatpush1.msra.mxu1 %v7142_v6  ;;  %v1781_v23 = vsub.f32 %v7219_v56, %v7263_v40  ;;  %1518 = vmatprep.subr.mxu0 %v7084_v28  ;;  %v172_v6 = vld [vmem:[#allocation4 + $0x1c0] sm:$0xff] }
 0x132   :  { %10415 = vst [vmem:[#allocation362_spill] sm:$0xff] %v7192_v46  ;;  %10416 = vst [vmem:[#allocation363_spill] sm:$0xff] %v7195_v7  ;;  %v7289_v9 = vand.u32 4294901760, %v7242_v52  ;;  %1699 = vmatprep.subr.mxu1 %v7144_v13  ;;  %v7316_v30 = vand.u32 4294901760, %v175_v36  ;;  %v7318_v3 = vand.u32 4294901760, %v174_v20  ;;  %1520 = vmatpush1.msra.mxu0 %v7086_v55  ;;  %v1787_v13 = vsub.f32 %v7239_v17, %v7286_v63 }
 0x133   :  { %10417 = vst [vmem:[#allocation364_spill] sm:$0xff] %v7199_v53  ;;  %10418 = vst [vmem:[#allocation365_spill] sm:$0xff] %v7201_v41  ;;  %v7293_v33 = vand.u32 4294901760, %v1757_v14  ;;  %v7309_v14 = vand.u32 4294901760, %v176_v32  ;;  %1705 = vmatpush1.msra.mxu1 %v7153_v34  ;;  %1522 = vmatprep.subr.mxu0 %v7111_v12  ;;  %v7343_v34 = vand.u32 4294901760, %v173_v39 }
 0x134   :  { %10419 = vst [vmem:[#allocation366_spill] sm:$0xff] %v7204_v21  ;;  %10420 = vst [vmem:[#allocation367_spill] sm:$0xff] %v7207_v48  ;;  %v7266_v21 = vsub.f32 %v117_v60, %v7213_v27  ;;  %v1769_v60 = vsub.f32 %v7195_v7, %v7236_v49  ;;  %v7305_v7 = vand.u32 4294901760, %v1763_v1  ;;  %v7321_v1 = vand.u32 4294901760, %v7277_v16  ;;  %v171_v48 = vld [vmem:[#allocation4 + $0x1b8] sm:$0xff]  ;;  %1711 = vmatprep.subr.mxu1 %v7164_v8 }
 0x135   :  { %10421 = vst [vmem:[#allocation368_spill] sm:$0xff] %v7213_v27  ;;  %10422 = vst [vmem:[#allocation369_spill] sm:$0xff] %v7216_v57  ;;  %v7283_v57 = vand.u32 4294901760, %v177_v24  ;;  %v1793_v28 = vsub.f32 %v7242_v52, %v7289_v9  ;;  %1524 = vmatpush1.msra.mxu0 %v7122_v47  ;;  %1717 = vmatpush1.msra.mxu1 %v7176_v45  ;;  %v7354_v8 = vand.u32 4294901760, %v172_v6  ;;  %v7363_v47 = vand.u32 4294901760, %v171_v48  ;;  %v169_v45 = vld [vmem:[#allocation4 + $0x1a8] sm:$0xff] }
 0x136   :  { %10423 = vst [vmem:[#allocation370_spill] sm:$0xff] %v7219_v56  ;;  %10424 = vst [vmem:[#allocation371_spill] sm:$0xff] %v7223_v54  ;;  %v7328_v56 = vand.u32 4294901760, %v1769_v60  ;;  %v7357_v12 = vsub.f32 %v176_v32, %v7309_v14  ;;  %1526 = vmatprep.subr.mxu0 %v7146_v37  ;;  %1723 = vmatprep.subr.mxu1 %v7199_v53  ;;  %v7373_v32 = vand.u32 4294901760, %v1787_v13 }
 0x137   :  { %10425 = vst [vmem:[#allocation372_spill] sm:$0xff] %v7229_v62  ;;  %10426 = vst [vmem:[#allocation373_spill] sm:$0xff] %v7233_v61  ;;  %v7335_v10 = vsub.f32 %v177_v24, %v7283_v57  ;;  %v7350_v24 = vand.u32 4294901760, %v1781_v23  ;;  %1528 = vmatpush1.msra.mxu0 %v7157_v26  ;;  %1729 = vmatpush1.msra.mxu1 %v7223_v54  ;;  %v7375_v37 = vand.u32 4294901760, %v1793_v28  ;;  %v167_v28 = vld [vmem:[#allocation4 + $0x198] sm:$0xff] }
 0x138   :  { %10427 = vst [vmem:[#allocation374_spill] sm:$0xff] %v7236_v49  ;;  %10428 = vst [vmem:[#allocation375_spill] sm:$0xff] %v7239_v17  ;;  %v7298_v49 = vand.u32 4294901760, %v7254_v0  ;;  %1530 = vmatprep.subr.mxu0 %v7166_v19  ;;  %1735 = vmatprep.subr.mxu1 %v7233_v61  ;;  %v7392_v26 = vsub.f32 %v173_v39, %v7343_v34  ;;  %v7398_v19 = vand.u32 4294901760, %v169_v45  ;;  %v166_v61 = vld [vmem:[#allocation4 + $0x190] sm:$0xff] }
 0x139   :  { %10429 = vst [vmem:[#allocation376_spill] sm:$0xff] %v7242_v52  ;;  %10430 = vst [vmem:[#allocation377_spill] sm:$0xff] %v7248_v59  ;;  %v7378_v53 = vand.u32 4294901760, %v7335_v10  ;;  %1532 = vmatpush1.msra.mxu0 %v7190_v15  ;;  %1741 = vmatpush1.msra.mxu1 %v7258_v38 }
 0x13a   :  { %10431 = vst [vmem:[#allocation378_spill] sm:$0xff] %v7251_v11  ;;  %10432 = vst [vmem:[#allocation379_spill] sm:$0xff] %v7254_v0  ;;  %v7312_v11 = vand.u32 4294901760, %v7266_v21  ;;  %v1799_v60 = vsub.f32 %v7254_v0, %v7298_v49  ;;  %1534 = vmatprep.subr.mxu0 %v7192_v46  ;;  %1747 = vmatprep.subr.mxu1 %v7270_v42  ;;  %v7421_v46 = vand.u32 4294901760, %v167_v28 }
 0x13b   :  { %10433 = vst [vmem:[#allocation380_spill] sm:$0xff] %v7258_v38  ;;  %10434 = vst [vmem:[#allocation381_spill] sm:$0xff] %v7263_v40  ;;  %v7324_v40 = vsub.f32 %v178_v25, %v7274_v43  ;;  %v7339_v25 = vand.u32 4294901760, %v1775_v50  ;;  %v170_v50 = vld [vmem:[#allocation4 + $0x1b0] sm:$0xff]  ;;  %1536 = vmatpush1.msra.mxu0 %v7201_v41  ;;  %1753 = vmatpush1.msra.mxu1 %v7272_v4  ;;  %v7433_v41 = vand.u32 4294901760, %v166_v61 }
 0x13c   :  { %10435 = vst [vmem:[#allocation382_spill] sm:$0xff] %v7266_v21  ;;  %10436 = vst [vmem:[#allocation383_spill] sm:$0xff] %v7270_v42  ;;  %v7389_v13 = vand.u32 4294901760, %v170_v50  ;;  %v164_v42 = vld [vmem:[#allocation4 + $0x180] sm:$0xff]  ;;  %1538 = vmatprep.subr.mxu0 %v7213_v27  ;;  %1759 = vmatprep.subr.mxu1 %v7293_v33 }
 0x13d   :  { %10437 = vst [vmem:[#allocation384_spill] sm:$0xff] %v7272_v4  ;;  %10438 = vst [vmem:[#allocation385_spill] sm:$0xff] %v7274_v43  ;;  %v7366_v23 = vand.u32 4294901760, %v7324_v40  ;;  %v7436_v4 = vand.u32 4294901760, %v7392_v26  ;;  %1540 = vmatpush1.msra.mxu0 %v7229_v62  ;;  %1765 = vmatpush1.msra.mxu1 %v7305_v7  ;;  %v7459_v62 = vand.u32 4294901760, %v164_v42 }
 0x13e   :  { %10439 = vst [vmem:[#allocation386_spill] sm:$0xff] %v7277_v16  ;;  %10440 = vst [vmem:[#allocation387_spill] sm:$0xff] %v7283_v57  ;;  %1542 = vmatprep.subr.mxu0 %v7248_v59  ;;  %1771 = vmatprep.subr.mxu1 %v7328_v56 }
 0x13f   :  { %10441 = vst [vmem:[#allocation388_spill] sm:$0xff] %v7286_v63  ;;  %10442 = vst [vmem:[#allocation389_spill] sm:$0xff] %v7289_v9  ;;  %v7346_v63 = vand.u32 4294901760, %v7301_v29  ;;  %v1805_v9 = vsub.f32 %v7266_v21, %v7312_v11  ;;  %v1823_v38 = vsub.f32 %v7324_v40, %v7366_v23  ;;  %1544 = vmatpush2.msra.mxu0 %v7274_v43  ;;  %1777 = vmatpush1.msra.mxu1 %v7339_v25 }
 0x140   :  { %10443 = vst [vmem:[#allocation390_spill] sm:$0xff] %v7293_v33  ;;  %10444 = vst [vmem:[#allocation391_spill] sm:$0xff] %v7298_v49  ;;  %v1811_v49 = vsub.f32 %v7277_v16, %v7321_v1  ;;  %v7381_v16 = vsub.f32 %v174_v20, %v7318_v3  ;;  %v163_v33 = vld [vmem:[#allocation4 + $0x178] sm:$0xff]  ;;  %1546 = vmatprep.subr.mxu0 %v7283_v57  ;;  %1783 = vmatprep.subr.mxu1 %v7350_v24 }
 0x141   :  { %10445 = vst [vmem:[#allocation392_spill] sm:$0xff] %v7301_v29  ;;  %10446 = vst [vmem:[#allocation393_spill] sm:$0xff] %v7305_v7  ;;  %v1817_v54 = vsub.f32 %v7301_v29, %v7346_v63  ;;  %v7396_v20 = vand.u32 4294901760, %v1805_v9  ;;  %v165_v29 = vld [vmem:[#allocation4 + $0x188] sm:$0xff]  ;;  %v7486_v43 = vsub.f32 %v166_v61, %v7433_v41  ;;  %1548 = vmatpush2.msra.mxu0 %v7309_v14  ;;  %1789 = vmatpush1.msra.mxu1 %v7373_v32 }
 0x142   :  { %10447 = vst [vmem:[#allocation394_spill] sm:$0xff] %v7309_v14  ;;  %10448 = vst [vmem:[#allocation395_spill] sm:$0xff] %v7312_v11  ;;  %v7369_v11 = vsub.f32 %v175_v36, %v7316_v30  ;;  %v7385_v36 = vand.u32 4294901760, %v1799_v60  ;;  %v7401_v60 = vand.u32 4294901760, %v7357_v12  ;;  %v7408_v39 = vand.u32 4294901760, %v1811_v49  ;;  %1550 = vmatprep.subr.mxu0 %v7316_v30  ;;  %1795 = vmatprep.subr.mxu1 %v7375_v37 }
 0x143   :  { %10449 = vst [vmem:[#allocation396_spill] sm:$0xff] %v7316_v30  ;;  %10450 = vst [vmem:[#allocation397_spill] sm:$0xff] %v7318_v3  ;;  %v7424_v49 = vand.u32 4294901760, %v7381_v16  ;;  %v7445_v27 = vand.u32 4294901760, %v165_v29  ;;  %1552 = vmatpush2.msra.mxu0 %v7318_v3  ;;  %v159_v30 = vld [vmem:[#allocation4 + $0x158] sm:$0xff]  ;;  %2007 = vmatprep.mubr.f32.mxu1 %v10374_v44 }
 0x144   :  { %10451 = vst [vmem:[#allocation398_spill] sm:$0xff] %v7321_v1  ;;  %10452 = vst [vmem:[#allocation399_spill] sm:$0xff] %v7324_v40  ;;  %v168_v1 = vld [vmem:[#allocation4 + $0x1a0] sm:$0xff]  ;;  %v7415_v15 = vand.u32 4294901760, %v7369_v11  ;;  %v7431_v40 = vand.u32 4294901760, %v1817_v54  ;;  %1801 = vmatpush1.msra.mxu1 %v7385_v36  ;;  %1554 = vmatprep.subr.mxu0 %v7343_v34  ;;  %v10618_v44 = vld [vmem:[#allocation367_spill] sm:$0xff] }
 0x145   :  { %10453 = vst [vmem:[#allocation400_spill] sm:$0xff] %v7328_v56  ;;  %10454 = vst [vmem:[#allocation401_spill] sm:$0xff] %v7335_v10  ;;  %v7412_v9 = vand.u32 4294901760, %v168_v1  ;;  %v1847_v59 = vsub.f32 %v7381_v16, %v7424_v49  ;;  %v162_v56 = vld [vmem:[#allocation4 + $0x170] sm:$0xff]  ;;  %v7498_v57 = vsub.f32 %v165_v29, %v7445_v27  ;;  %1807 = vmatprep.subr.mxu1 %v7396_v20  ;;  %1556 = vmatpush2.msra.mxu0 %v7354_v8 }
 0x146   :  { %10455 = vst [vmem:[#allocation402_spill] sm:$0xff] %v7339_v25  ;;  %10456 = vst [vmem:[#allocation403_spill] sm:$0xff] %v7343_v34  ;;  %v1841_v7 = vsub.f32 %v7369_v11, %v7415_v15  ;;  %v7480_v25 = vand.u32 4294901760, %v163_v33  ;;  %v7504_v14 = vand.u32 4294901760, %v162_v56  ;;  %1813 = vmatpush1.msra.mxu1 %v7408_v39  ;;  %1558 = vmatprep.subr.mxu0 %v7363_v47 }
 0x147   :  { %10457 = vst [vmem:[#allocation404_spill] sm:$0xff] %v7346_v63  ;;  %10458 = vst [vmem:[#allocation405_spill] sm:$0xff] %v7350_v24  ;;  %v7404_v63 = vsub.f32 %v172_v6, %v7354_v8  ;;  %v1829_v6 = vsub.f32 %v7335_v10, %v7378_v53  ;;  %v7451_v10 = vsub.f32 %v169_v45, %v7398_v19  ;;  %v7514_v29 = vand.u32 4294901760, %v1847_v59 }
 0x148   :  { %10459 = vst [vmem:[#allocation406_spill] sm:$0xff] %v7354_v8  ;;  %10460 = vst [vmem:[#allocation407_spill] sm:$0xff] %v7357_v12  ;;  %v7502_v61 = vand.u32 4294901760, %v1841_v7  ;;  %v7533_v3 = vsub.f32 %v163_v33, %v7480_v25  ;;  %1819 = vmatprep.subr.mxu1 %v7431_v40  ;;  %v7550_v8 = vand.u32 4294901760, %v159_v30  ;;  %1560 = vmatpush2.msra.mxu0 %v7389_v13 }
 0x149   :  { %10461 = vst [vmem:[#allocation408_spill] sm:$0xff] %v7363_v47  ;;  %10462 = vst [vmem:[#allocation409_spill] sm:$0xff] %v7366_v23  ;;  %v7427_v23 = vsub.f32 %v171_v48, %v7363_v47  ;;  %v1835_v48 = vsub.f32 %v7357_v12, %v7401_v60  ;;  %v7448_v54 = vand.u32 4294901760, %v7404_v63  ;;  %v7466_v45 = vand.u32 4294901760, %v1829_v6  ;;  %1562 = vmatprep.subr.mxu0 %v7398_v19 }
 0x14a   :  { %10463 = vst [vmem:[#allocation410_spill] sm:$0xff] %v7369_v11  ;;  %10464 = vst [vmem:[#allocation411_spill] sm:$0xff] %v7373_v32  ;;  %v160_v32 = vld [vmem:[#allocation4 + $0x160] sm:$0xff]  ;;  %1564 = vmatpush2.msra.mxu0 %v7412_v9 }
 0x14b   :  { %10465 = vst [vmem:[#allocation412_spill] sm:$0xff] %v7375_v37  ;;  %10466 = vst [vmem:[#allocation413_spill] sm:$0xff] %v7378_v53  ;;  %v7439_v53 = vsub.f32 %v170_v50, %v7389_v13  ;;  %v7455_v50 = vand.u32 4294901760, %v1823_v38  ;;  %v7471_v38 = vand.u32 4294901760, %v7427_v23  ;;  %v1859_v24 = vsub.f32 %v7404_v63, %v7448_v54  ;;  %1566 = vmatprep.subr.mxu0 %v7421_v46 }
 0x14c   :  { %10467 = vst [vmem:[#allocation414_spill] sm:$0xff] %v7381_v16  ;;  %10468 = vst [vmem:[#allocation415_spill] sm:$0xff] %v7385_v36  ;;  %v7530_v36 = vand.u32 4294901760, %v7486_v43  ;;  %1568 = vmatpush2.msra.mxu0 %v7433_v41 }
 0x14d   :  { %10469 = vst [vmem:[#allocation416_spill] sm:$0xff] %v7389_v13  ;;  %10470 = vst [vmem:[#allocation417_spill] sm:$0xff] %v7392_v26  ;;  %v7483_v6 = vand.u32 4294901760, %v7439_v53  ;;  %v1865_v37 = vsub.f32 %v7427_v23, %v7471_v38  ;;  %1825 = vmatpush2.msra.mxu1 %v7455_v50  ;;  %v154_v13 = vld [vmem:[#allocation4 + $0x130] sm:$0xff]  ;;  %1570 = vmatprep.subr.mxu0 %v7445_v27 }
 0x14e   :  { %10471 = vst [vmem:[#allocation418_spill] sm:$0xff] %v7396_v20  ;;  %10472 = vst [vmem:[#allocation419_spill] sm:$0xff] %v7398_v19  ;;  %v7541_v20 = vand.u32 4294901760, %v160_v32  ;;  %1831 = vmatprep.subr.mxu1 %v7466_v45  ;;  %v7600_v19 = vsub.f32 %v159_v30, %v7550_v8  ;;  %1572 = vmatpush2.msra.mxu0 %v7459_v62 }
 0x14f   :  { %10473 = vst [vmem:[#allocation420_spill] sm:$0xff] %v7401_v60  ;;  %10474 = vst [vmem:[#allocation421_spill] sm:$0xff] %v7404_v63  ;;  %v7462_v60 = vsub.f32 %v168_v1, %v7412_v9  ;;  %v1853_v1 = vsub.f32 %v7392_v26, %v7436_v4  ;;  %v158_v26 = vld [vmem:[#allocation4 + $0x150] sm:$0xff]  ;;  %v1871_v59 = vsub.f32 %v7439_v53, %v7483_v6  ;;  %1574 = vmatprep.subr.mxu0 %v7480_v25 }
 0x150   :  { %10475 = vst [vmem:[#allocation422_spill] sm:$0xff] %v7408_v39  ;;  %10476 = vst [vmem:[#allocation423_spill] sm:$0xff] %v7412_v9  ;;  %v7552_v39 = vand.u32 4294901760, %v158_v26  ;;  %1576 = vmatpush2.msra.mxu0 %v7504_v14 }
 0x151   :  { %10477 = vst [vmem:[#allocation424_spill] sm:$0xff] %v7415_v15  ;;  %10478 = vst [vmem:[#allocation425_spill] sm:$0xff] %v7421_v46  ;;  %v7474_v15 = vsub.f32 %v167_v28, %v7421_v46  ;;  %v7490_v28 = vand.u32 4294901760, %v1835_v48  ;;  %v7507_v48 = vand.u32 4294901760, %v7462_v60  ;;  %v150_v46 = vld [vmem:[#allocation4 + $0x110] sm:$0xff] }
 0x152   :  { %10479 = vst [vmem:[#allocation426_spill] sm:$0xff] %v7424_v49  ;;  %10480 = vst [vmem:[#allocation427_spill] sm:$0xff] %v7427_v23  ;;  %v161_v49 = vld [vmem:[#allocation4 + $0x168] sm:$0xff]  ;;  %v7537_v23 = vand.u32 4294901760, %v1859_v24  ;;  %v156_v24 = vld [vmem:[#allocation4 + $0x140] sm:$0xff] }
 0x153   :  { %10481 = vst [vmem:[#allocation428_spill] sm:$0xff] %v7431_v40  ;;  %10482 = vst [vmem:[#allocation429_spill] sm:$0xff] %v7433_v41  ;;  %v7518_v7 = vand.u32 4294901760, %v161_v49  ;;  %v7521_v63 = vand.u32 4294901760, %v7474_v15  ;;  %v1883_v33 = vsub.f32 %v7462_v60, %v7507_v48  ;;  %1837 = vmatpush2.msra.mxu1 %v7490_v28  ;;  %v151_v41 = vld [vmem:[#allocation4 + $0x118] sm:$0xff] }
 0x154   :  { %10483 = vst [vmem:[#allocation430_spill] sm:$0xff] %v7436_v4  ;;  %10484 = vst [vmem:[#allocation431_spill] sm:$0xff] %v7439_v53  ;;  %v7495_v4 = vand.u32 4294901760, %v7451_v10  ;;  %1843 = vmatprep.subr.mxu1 %v7502_v61 }
 0x155   :  { %10485 = vst [vmem:[#allocation432_spill] sm:$0xff] %v7445_v27  ;;  %10486 = vst [vmem:[#allocation433_spill] sm:$0xff] %v7448_v54  ;;  %v7510_v54 = vsub.f32 %v164_v42, %v7459_v62  ;;  %v7525_v42 = vand.u32 4294901760, %v1853_v1  ;;  %v1889_v40 = vsub.f32 %v7474_v15, %v7521_v63  ;;  %1849 = vmatpush2.msra.mxu1 %v7514_v29  ;;  %1578 = vmatprep.subr.mxu0 %v7518_v7 }
 0x156   :  { %10487 = vst [vmem:[#allocation434_spill] sm:$0xff] %v7451_v10  ;;  %10488 = vst [vmem:[#allocation435_spill] sm:$0xff] %v7455_v50  ;;  %v1877_v1 = vsub.f32 %v7451_v10, %v7495_v4  ;;  %v7570_v10 = vand.u32 4294901760, %v1871_v59  ;;  %v1895_v50 = vsub.f32 %v7486_v43, %v7530_v36  ;;  %1580 = vmatpush2.msra.mxu0 %v7541_v20 }
 0x157   :  { %10489 = vst [vmem:[#allocation436_spill] sm:$0xff] %v7459_v62  ;;  %10490 = vst [vmem:[#allocation437_spill] sm:$0xff] %v7462_v60  ;;  %v7555_v34 = vand.u32 4294901760, %v7510_v54  ;;  %v7566_v60 = vsub.f32 %v162_v56, %v7504_v14  ;;  %1855 = vmatprep.subr.mxu1 %v7525_v42  ;;  %1582 = vmatprep.subr.mxu0 %v7550_v8 }
 0x158   :  { %10491 = vst [vmem:[#allocation438_spill] sm:$0xff] %v7466_v45  ;;  %10492 = vst [vmem:[#allocation439_spill] sm:$0xff] %v7471_v38  ;;  %v157_v38 = vld [vmem:[#allocation4 + $0x148] sm:$0xff]  ;;  %v7582_v56 = vand.u32 4294901760, %v1877_v1  ;;  %v7586_v45 = vand.u32 4294901760, %v156_v24  ;;  %v7616_v30 = vand.u32 4294901760, %v1895_v50  ;;  %1861 = vmatpush2.msra.mxu1 %v7537_v23  ;;  %1584 = vmatpush2.msra.mxu0 %v7552_v39 }
 0x159   :  { %10493 = vst [vmem:[#allocation440_spill] sm:$0xff] %v7474_v15  ;;  %10494 = vst [vmem:[#allocation441_spill] sm:$0xff] %v7480_v25  ;;  %v7563_v47 = vand.u32 4294901760, %v157_v38  ;;  %v1907_v9 = vsub.f32 %v7510_v54, %v7555_v34  ;;  %v153_v1 = vld [vmem:[#allocation4 + $0x128] sm:$0xff]  ;;  %v7654_v25 = vand.u32 4294901760, %v151_v41 }
 0x15a   :  { %10495 = vst [vmem:[#allocation442_spill] sm:$0xff] %v7483_v6  ;;  %10496 = vst [vmem:[#allocation443_spill] sm:$0xff] %v7486_v43  ;;  %v7544_v6 = vand.u32 4294901760, %v7498_v57 }
 0x15b   :  { %10497 = vst [vmem:[#allocation444_spill] sm:$0xff] %v7490_v28  ;;  %10498 = vst [vmem:[#allocation445_spill] sm:$0xff] %v7495_v4  ;;  %v7559_v4 = vand.u32 4294901760, %v1865_v37  ;;  %v7575_v37 = vand.u32 4294901760, %v7533_v3  ;;  %1586 = vmatprep.subr.mxu0 %v7563_v47 }
 0x15c   :  { %10499 = vst [vmem:[#allocation446_spill] sm:$0xff] %v7498_v57  ;;  %10500 = vst [vmem:[#allocation447_spill] sm:$0xff] %v7502_v61  ;;  %v1901_v59 = vsub.f32 %v7498_v57, %v7544_v6  ;;  %v152_v61 = vld [vmem:[#allocation4 + $0x120] sm:$0xff]  ;;  %1588 = vmatpush2.msra.mxu0 %v7586_v45 }
 0x15d   :  { %10501 = vst [vmem:[#allocation448_spill] sm:$0xff] %v7504_v14  ;;  %10502 = vst [vmem:[#allocation449_spill] sm:$0xff] %v7507_v48  ;;  %v155_v48 = vld [vmem:[#allocation4 + $0x138] sm:$0xff]  ;;  %1867 = vmatprep.subr.mxu1 %v7559_v4  ;;  %v7642_v27 = vand.u32 4294901760, %v152_v61 }
 0x15e   :  { %10503 = vst [vmem:[#allocation450_spill] sm:$0xff] %v7510_v54  ;;  %10504 = vst [vmem:[#allocation451_spill] sm:$0xff] %v7514_v29  ;;  %v7597_v28 = vand.u32 4294901760, %v155_v48  ;;  %v1913_v29 = vsub.f32 %v7533_v3, %v7575_v37  ;;  %v7624_v54 = vsub.f32 %v157_v38, %v7563_v47  ;;  %v7640_v38 = vand.u32 4294901760, %v1907_v9  ;;  %1873 = vmatpush2.msra.mxu1 %v7570_v10 }
 0x15f   :  { %10505 = vst [vmem:[#allocation452_spill] sm:$0xff] %v7518_v7  ;;  %10506 = vst [vmem:[#allocation453_spill] sm:$0xff] %v7521_v63  ;;  %v7578_v63 = vsub.f32 %v161_v49, %v7518_v7  ;;  %v7593_v49 = vand.u32 4294901760, %v1883_v33  ;;  %v7609_v33 = vand.u32 4294901760, %v7566_v60  ;;  %v7656_v9 = vand.u32 4294901760, %v150_v46  ;;  %1879 = vmatprep.subr.mxu1 %v7582_v56 }
 0x160   :  { %10507 = vst [vmem:[#allocation454_spill] sm:$0xff] %v7525_v42  ;;  %10508 = vst [vmem:[#allocation455_spill] sm:$0xff] %v7530_v36  ;;  %v7589_v36 = vsub.f32 %v160_v32, %v7541_v20  ;;  %v7604_v32 = vand.u32 4294901760, %v1889_v40  ;;  %v7630_v42 = vand.u32 4294901760, %v153_v1  ;;  %v7648_v62 = vsub.f32 %v155_v48, %v7597_v28  ;;  %1590 = vmatprep.subr.mxu0 %v7597_v28 }
 0x161   :  { %10509 = vst [vmem:[#allocation456_spill] sm:$0xff] %v7533_v3  ;;  %10510 = vst [vmem:[#allocation457_spill] sm:$0xff] %v7537_v23  ;;  %v7621_v40 = vand.u32 4294901760, %v7578_v63  ;;  %v7645_v23 = vand.u32 4294901760, %v7600_v19  ;;  %v148_v3 = vld [vmem:[#allocation4 + $0x100] sm:$0xff]  ;;  %v7663_v48 = vand.u32 4294901760, %v1913_v29  ;;  %1885 = vmatpush2.msra.mxu1 %v7593_v49 }
 0x162   :  { %10511 = vst [vmem:[#allocation458_spill] sm:$0xff] %v7541_v20  ;;  %10512 = vst [vmem:[#allocation459_spill] sm:$0xff] %v7544_v6  ;;  %v7606_v6 = vand.u32 4294901760, %v154_v13  ;;  %v7633_v50 = vand.u32 4294901760, %v7589_v36  ;;  %v7668_v14 = vand.u32 4294901760, %v7624_v54  ;;  %1891 = vmatprep.subr.mxu1 %v7604_v32 }
 0x163   :  { %10513 = vst [vmem:[#allocation460_spill] sm:$0xff] %v7550_v8  ;;  %10514 = vst [vmem:[#allocation461_spill] sm:$0xff] %v7552_v39  ;;  %1897 = vmatpush2.msra.mxu1 %v7616_v30  ;;  %v7704_v8 = vsub.f32 %v151_v41, %v7654_v25 }
 0x164   :  { %10515 = vst [vmem:[#allocation462_spill] sm:$0xff] %v7555_v34  ;;  %10516 = vst [vmem:[#allocation463_spill] sm:$0xff] %v7559_v4  ;;  %v7612_v34 = vsub.f32 %v158_v26, %v7552_v39  ;;  %v7628_v26 = vand.u32 4294901760, %v1901_v59  ;;  %v149_v59 = vld [vmem:[#allocation4 + $0x108] sm:$0xff]  ;;  %v1931_v7 = vsub.f32 %v7589_v36, %v7633_v50  ;;  %1592 = vmatpush2.msra.mxu0 %v7606_v6 }
 0x165   :  { %10517 = vst [vmem:[#allocation464_spill] sm:$0xff] %v7563_v47  ;;  %10518 = vst [vmem:[#allocation465_spill] sm:$0xff] %v7566_v60  ;;  %1594 = vmatprep.subr.mxu0 %v7630_v42 }
 0x166   :  { %10519 = vst [vmem:[#allocation466_spill] sm:$0xff] %v7570_v10  ;;  %10520 = vst [vmem:[#allocation467_spill] sm:$0xff] %v7575_v37  ;;  %v7636_v37 = vsub.f32 %v156_v24, %v7586_v45  ;;  %v1919_v24 = vsub.f32 %v7566_v60, %v7609_v33  ;;  %v7659_v4 = vand.u32 4294901760, %v7612_v34  ;;  %v1925_v10 = vsub.f32 %v7578_v63, %v7621_v40 }
 0x167   :  { %10521 = vst [vmem:[#allocation468_spill] sm:$0xff] %v7578_v63  ;;  %10522 = vst [vmem:[#allocation469_spill] sm:$0xff] %v7582_v56  ;;  %v7677_v60 = vand.u32 4294901760, %v149_v59  ;;  %v7683_v56 = vsub.f32 %v153_v1, %v7630_v42  ;;  %1903 = vmatprep.subr.mxu1 %v7628_v26  ;;  %v7720_v41 = vand.u32 4294901760, %v1931_v7  ;;  %1596 = vmatpush2.msra.mxu0 %v7642_v27 }
 0x168   :  { %10523 = vst [vmem:[#allocation470_spill] sm:$0xff] %v7586_v45  ;;  %10524 = vst [vmem:[#allocation471_spill] sm:$0xff] %v7589_v36  ;;  %v7680_v29 = vand.u32 4294901760, %v7636_v37  ;;  %v7699_v1 = vand.u32 4294901760, %v1919_v24  ;;  %v7716_v24 = vsub.f32 %v150_v46, %v7656_v9  ;;  %1909 = vmatpush2.msra.mxu1 %v7640_v38  ;;  %1598 = vmatprep.subr.mxu0 %v7654_v25 }
 0x169   :  { %10525 = vst [vmem:[#allocation472_spill] sm:$0xff] %v7593_v49  ;;  %10526 = vst [vmem:[#allocation473_spill] sm:$0xff] %v7597_v28  ;;  %v7692_v49 = vand.u32 4294901760, %v7648_v62  ;;  %1915 = vmatprep.subr.mxu1 %v7663_v48  ;;  %1600 = vmatpush2.msra.mxu0 %v7656_v9 }
 0x16a   :  { %10527 = vst [vmem:[#allocation474_spill] sm:$0xff] %v7600_v19  ;;  %10528 = vst [vmem:[#allocation475_spill] sm:$0xff] %v7604_v32  ;;  %v1943_v32 = vsub.f32 %v7612_v34, %v7659_v4  ;;  %1921 = vmatpush2.msra.mxu1 %v7699_v1  ;;  %1602 = vmatprep.subr.mxu0 %v7677_v60 }
 0x16b   :  { %10529 = vst [vmem:[#allocation476_spill] sm:$0xff] %v7606_v6  ;;  %10530 = vst [vmem:[#allocation477_spill] sm:$0xff] %v7609_v33  ;;  %v7671_v33 = vsub.f32 %v154_v13, %v7606_v6  ;;  %v1937_v13 = vsub.f32 %v7600_v19, %v7645_v23 }
 0x16c   :  { %10531 = vst [vmem:[#allocation478_spill] sm:$0xff] %v7612_v34  ;;  %10532 = vst [vmem:[#allocation479_spill] sm:$0xff] %v7616_v30  ;;  %v7728_v30 = vsub.f32 %v149_v59, %v7677_v60  ;;  %v7744_v59 = vand.u32 4294901760, %v1943_v32 }
 0x16d   :  { %10533 = vst [vmem:[#allocation480_spill] sm:$0xff] %v7621_v40  ;;  %10534 = vst [vmem:[#allocation481_spill] sm:$0xff] %v7624_v54  ;;  %v7689_v40 = vand.u32 4294901760, %v148_v3  ;;  %v7713_v39 = vand.u32 4294901760, %v7671_v33  ;;  %v7732_v46 = vand.u32 4294901760, %v1937_v13 }
 0x16e   :  { %10535 = vst [vmem:[#allocation482_spill] sm:$0xff] %v7628_v26  ;;  %10536 = vst [vmem:[#allocation483_spill] sm:$0xff] %v7630_v42  ;;  %v1955_v26 = vsub.f32 %v7636_v37, %v7680_v29 }
 0x16f   :  { %10537 = vst [vmem:[#allocation484_spill] sm:$0xff] %v7633_v50  ;;  %10538 = vst [vmem:[#allocation485_spill] sm:$0xff] %v7636_v37  ;;  %v7695_v50 = vsub.f32 %v152_v61, %v7642_v27  ;;  %v1949_v61 = vsub.f32 %v7624_v54, %v7668_v14  ;;  %1604 = vmatpush2.msra.mxu0 %v7689_v40 }
 0x170   :  { %10539 = vst [vmem:[#allocation486_spill] sm:$0xff] %v7640_v38  ;;  %10540 = vst [vmem:[#allocation487_spill] sm:$0xff] %v7642_v27  ;;  %v1961_v38 = vsub.f32 %v7648_v62, %v7692_v49  ;;  %v7760_v32 = vand.u32 4294901760, %v1955_v26  ;;  %2017 = vmatprep.subr.mxu0 %v6873_v35 }
 0x171   :  { %10541 = vst [vmem:[#allocation488_spill] sm:$0xff] %v7645_v23  ;;  %10542 = vst [vmem:[#allocation489_spill] sm:$0xff] %v7648_v62  ;;  %v7708_v23 = vand.u32 4294901760, %v1925_v10  ;;  %v7725_v10 = vand.u32 4294901760, %v7683_v56  ;;  %v7737_v7 = vand.u32 4294901760, %v7695_v50  ;;  %v7751_v13 = vand.u32 4294901760, %v1949_v61 }
 0x172   :  { %10543 = vst [vmem:[#allocation490_spill] sm:$0xff] %v7654_v25  ;;  %10544 = vst [vmem:[#allocation491_spill] sm:$0xff] %v7656_v9  ;;  %v7769_v61 = vand.u32 4294901760, %v1961_v38 }
 0x173   :  { %10545 = vst [vmem:[#allocation492_spill] sm:$0xff] %v7659_v4  ;;  %10546 = vst [vmem:[#allocation493_spill] sm:$0xff] %v7663_v48  ;;  %1927 = vmatprep.subr.mxu1 %v7708_v23  ;;  %v1967_v48 = vsub.f32 %v7671_v33, %v7713_v39  ;;  %v10631_v4 = vld [vmem:[#allocation401_spill] sm:$0xff] }
 0x174   :  { %10547 = vst [vmem:[#allocation494_spill] sm:$0xff] %v7668_v14  ;;  %10548 = vst [vmem:[#allocation495_spill] sm:$0xff] %v7671_v33  ;;  %v7747_v14 = vand.u32 4294901760, %v7704_v8  ;;  %1933 = vmatpush2.msra.mxu1 %v7720_v41 }
 0x175   :  { %10549 = vst [vmem:[#allocation496_spill] sm:$0xff] %v7677_v60  ;;  %10550 = vst [vmem:[#allocation497_spill] sm:$0xff] %v7680_v29  ;;  %v7740_v29 = vsub.f32 %v148_v3, %v7689_v40  ;;  %v7756_v3 = vand.u32 4294901760, %v7716_v24  ;;  %1939 = vmatprep.subr.mxu1 %v7732_v46 }
 0x176   :  { %10551 = vst [vmem:[#allocation498_spill] sm:$0xff] %v7683_v56  ;;  %10552 = vst [vmem:[#allocation499_spill] sm:$0xff] %v7689_v40  ;;  %1945 = vmatpush2.msra.mxu1 %v7744_v59  ;;  %v1985_v26 = vsub.f32 %v7704_v8, %v7747_v14 }
 0x177   :  { %10553 = vst [vmem:[#allocation500_spill] sm:$0xff] %v7692_v49  ;;  %10554 = vst [vmem:[#allocation501_spill] sm:$0xff] %v7695_v50  ;;  %v7765_v49 = vand.u32 4294901760, %v7728_v30  ;;  %1951 = vmatprep.subr.mxu1 %v7751_v13  ;;  %v1991_v38 = vsub.f32 %v7716_v24, %v7756_v3 }
 0x178   :  { %10555 = vst [vmem:[#allocation502_spill] sm:$0xff] %v7699_v1  ;;  %10556 = vst [vmem:[#allocation503_spill] sm:$0xff] %v7704_v8  ;;  %v1973_v1 = vsub.f32 %v7683_v56, %v7725_v10  ;;  %1957 = vmatpush2.msra.mxu1 %v7760_v32 }
 0x179   :  { %10557 = vst [vmem:[#allocation504_spill] sm:$0xff] %v7708_v23  ;;  %10558 = vst [vmem:[#allocation505_spill] sm:$0xff] %v7713_v39  ;;  %v1979_v23 = vsub.f32 %v7695_v50, %v7737_v7  ;;  %v7774_v39 = vand.u32 4294901760, %v7740_v29  ;;  %1963 = vmatprep.subr.mxu1 %v7769_v61 }
 0x17a   :  { %10559 = vst [vmem:[#allocation506_spill] sm:$0xff] %v7716_v24  ;;  %10560 = vst [vmem:[#allocation507_spill] sm:$0xff] %v7720_v41  ;;  %v7788_v41 = vand.u32 4294901760, %v1973_v1  ;;  %v7804_v1 = vand.u32 4294901760, %v1991_v38  ;;  %v10587_v38 = vld [vmem:[#allocation291_spill] sm:$0xff] }
 0x17b   :  { %10561 = vst [vmem:[#allocation508_spill] sm:$0xff] %v7725_v10  ;;  %10562 = vst [vmem:[#allocation509_spill] sm:$0xff] %v7728_v30  ;;  %v10629_v10 = vld [vmem:[#allocation399_spill] sm:$0xff] }
 0x17c   :  { %10563 = vst [vmem:[#allocation510_spill] sm:$0xff] %v7732_v46  ;;  %10564 = vst [vmem:[#allocation511_spill] sm:$0xff] %v7737_v7  ;;  %v7782_v46 = vand.u32 4294901760, %v1967_v48  ;;  %v10576_v7 = vld [vmem:[#allocation263_spill] sm:$0xff]  ;;  %v2003_v48 = vsub.f32 %v7740_v29, %v7774_v39 }
 0x17d   :  { %10565 = vst [vmem:[#allocation512_spill] sm:$0xff] %v7740_v29  ;;  %10566 = vst [vmem:[#allocation513_spill] sm:$0xff] %v7744_v59  ;;  %v1997_v59 = vsub.f32 %v7728_v30, %v7765_v49  ;;  %1610 = vmatprep.mubr.f32.mxu0 %v10576_v7  ;;  %v10581_v7 = vld [vmem:[#allocation280_spill] sm:$0xff] }
 0x17e   :  { %10567 = vst [vmem:[#allocation514_spill] sm:$0xff] %v7747_v14  ;;  %10568 = vst [vmem:[#allocation515_spill] sm:$0xff] %v7751_v13  ;;  %v7794_v14 = vand.u32 4294901760, %v1979_v23  ;;  %v10578_v13 = vld [vmem:[#allocation259_spill] sm:$0xff]  ;;  %1969 = vmatpush2.msra.mxu1 %v7782_v46  ;;  %v7812_v35 = vand.u32 4294901760, %v2003_v48 }
 0x17f   :  { %10569 = vst [vmem:[#allocation516_spill] sm:$0xff] %v7756_v3  ;;  %10570 = vst [vmem:[#allocation517_spill] sm:$0xff] %v7760_v32  ;;  %1616 = vmatmul.mubr.f32.vlgmr.msra.gmra.mxu0 %v10578_v13  ;;  %v7800_v3 = vand.u32 4294901760, %v1985_v26  ;;  %1975 = vmatprep.subr.mxu1 %v7788_v41  ;;  %v7808_v23 = vand.u32 4294901760, %v1997_v59  ;;  %v10585_v13 = vld [vmem:[#allocation286_spill] sm:$0xff]  ;;  %v10586_v26 = vld [vmem:[#allocation287_spill] sm:$0xff] }
 0x180   :  { %10571 = vst [vmem:[#allocation518_spill] sm:$0xff] %v7765_v49  ;;  %10572 = vst [vmem:[#allocation519_spill] sm:$0xff] %v7769_v61  ;;  %2020 = vmatpush1.msra.mxu0 %v6886_v58  ;;  %1981 = vmatpush2.msra.mxu1 %v7794_v14  ;;  %v10583_v61 = vld [vmem:[#allocation284_spill] sm:$0xff]  ;;  %v10588_v59 = vld [vmem:[#allocation294_spill] sm:$0xff] }
 0x181   :  { %10573 = vst [vmem:[#allocation520_spill] sm:$0xff] %v7774_v39  ;;  %10574 = vst [vmem:[#allocation521_spill] sm:$0xff] %v7782_v46  ;;  %2023 = vmatprep.subr.mxu0 %v10581_v7  ;;  %1987 = vmatprep.subr.mxu1 %v7800_v3  ;;  %v10589_v48 = vld [vmem:[#allocation299_spill] sm:$0xff]  ;;  %v10603_v7 = vld [vmem:[#allocation328_spill] sm:$0xff] }
 0x182   :  { %10575 = vst [vmem:[#allocation522_spill] sm:$0xff] %v7788_v41  ;;  %10577 = vst [vmem:[#allocation263_spill] sm:$0xff] %v7794_v14  ;;  %2026 = vmatpush1.msra.mxu0 %v10583_v61  ;;  %1993 = vmatpush2.msra.mxu1 %v7804_v1  ;;  %v10599_v61 = vld [vmem:[#allocation318_spill] sm:$0xff]  ;;  %v10605_v41 = vld [vmem:[#allocation335_spill] sm:$0xff] }
 0x183   :  { %10579 = vst [vmem:[#allocation259_spill] sm:$0xff] %v7800_v3  ;;  %10580 = vst [vmem:[#allocation523_spill] sm:$0xff] %v7804_v1  ;;  %2029 = vmatprep.subr.mxu0 %v10585_v13  ;;  %1999 = vmatprep.subr.mxu1 %v7808_v23  ;;  %v10590_v3 = vld [vmem:[#allocation272_spill] sm:$0xff]  ;;  %v10591_v13 = vld [vmem:[#allocation303_spill] sm:$0xff] }
 0x184   :  { %10582 = vst [vmem:[#allocation524_spill] sm:$0xff] %v7808_v23  ;;  %10584 = vst [vmem:[#allocation525_spill] sm:$0xff] %v7812_v35  ;;  %2032 = vmatpush1.msra.mxu0 %v10586_v26  ;;  %2005 = vmatpush2.msra.mxu1 %v7812_v35  ;;  %v10592_v1 = vld [vmem:[#allocation273_spill] sm:$0xff]  ;;  %v10593_v26 = vld [vmem:[#allocation306_spill] sm:$0xff] }
 0x185   :  { %2035 = vmatprep.subr.mxu0 %v10587_v38  ;;  %2009 = vmatmul.mubr.f32.vlgmr.msra.gmra.mxu1 %v10378_v22  ;;  %v10594_v23 = vld [vmem:[#allocation274_spill] sm:$0xff]  ;;  %v10595_v35 = vld [vmem:[#allocation312_spill] sm:$0xff]  ;;  %v10597_v38 = vld [vmem:[#allocation315_spill] sm:$0xff] }
 0x186   :  { %2038 = vmatpush1.msra.mxu0 %v10588_v59  ;;  %2219 = vmatprep.subr.mxu1 %v10590_v3  ;;  %v10596_v59 = vld [vmem:[#allocation277_spill] sm:$0xff]  ;;  %v10601_v14 = vld [vmem:[#allocation322_spill] sm:$0xff]  ;;  %v10616_v22 = vld [vmem:[#allocation363_spill] sm:$0xff] }
 0x187   :  { %2041 = vmatprep.subr.mxu0 %v10589_v48  ;;  %2221 = vmatpush1.msra.mxu1 %v10592_v1  ;;  %v10598_v48 = vld [vmem:[#allocation278_spill] sm:$0xff]  ;;  %v10607_v58 = vld [vmem:[#allocation337_spill] sm:$0xff]  ;;  %v10627_v49 = vld [vmem:[#allocation392_spill] sm:$0xff] }
 0x188   :  { %2044 = vmatpush1.msra.mxu0 %v10591_v13  ;;  %2223 = vmatprep.subr.mxu1 %v10594_v23  ;;  %v10600_v13 = vld [vmem:[#allocation281_spill] sm:$0xff]  ;;  %v10611_v46 = vld [vmem:[#allocation346_spill] sm:$0xff] }
 0x189   :  { %2047 = vmatprep.subr.mxu0 %v10593_v26  ;;  %2225 = vmatpush1.msra.mxu1 %v6877_v18  ;;  %v10602_v26 = vld [vmem:[#allocation283_spill] sm:$0xff]  ;;  %v10614_v32 = vld [vmem:[#allocation357_spill] sm:$0xff]  ;;  %v10620_v39 = vld [vmem:[#allocation370_spill] sm:$0xff] }
 0x18a   :  { %2050 = vmatpush1.msra.mxu0 %v7007_v31  ;;  %2227 = vmatprep.subr.mxu1 %v10596_v59  ;;  %v10604_v31 = vld [vmem:[#allocation288_spill] sm:$0xff] }
 0x18b   :  { %2053 = vmatprep.subr.mxu0 %v10595_v35  ;;  %2229 = vmatpush1.msra.mxu1 %v10598_v48  ;;  %v10606_v35 = vld [vmem:[#allocation290_spill] sm:$0xff] }
 0x18c   :  { %2056 = vmatpush1.msra.mxu0 %v10597_v38  ;;  %2231 = vmatprep.subr.mxu1 %v10600_v13  ;;  %v10608_v38 = vld [vmem:[#allocation292_spill] sm:$0xff] }
 0x18d   :  { %2059 = vmatprep.subr.mxu0 %v10599_v61  ;;  %2233 = vmatpush1.msra.mxu1 %v10602_v26  ;;  %v10609_v61 = vld [vmem:[#allocation297_spill] sm:$0xff] }
 0x18e   :  { %2062 = vmatpush1.msra.mxu0 %v10601_v14  ;;  %2235 = vmatprep.subr.mxu1 %v10604_v31  ;;  %v10610_v14 = vld [vmem:[#allocation298_spill] sm:$0xff] }
 0x18f   :  { %2065 = vmatprep.subr.mxu0 %v10603_v7  ;;  %2237 = vmatpush1.msra.mxu1 %v10606_v35  ;;  %v10612_v7 = vld [vmem:[#allocation301_spill] sm:$0xff] }
 0x190   :  { %2068 = vmatpush1.msra.mxu0 %v10605_v41  ;;  %2239 = vmatprep.subr.mxu1 %v10608_v38  ;;  %v10613_v41 = vld [vmem:[#allocation304_spill] sm:$0xff] }
 0x191   :  { %2071 = vmatprep.subr.mxu0 %v10607_v58  ;;  %2241 = vmatpush1.msra.mxu1 %v10609_v61  ;;  %v10615_v58 = vld [vmem:[#allocation308_spill] sm:$0xff] }
 0x192   :  { %2074 = vmatpush1.msra.mxu0 %v7125_v5  ;;  %2243 = vmatprep.subr.mxu1 %v10610_v14  ;;  %v10617_v5 = vld [vmem:[#allocation313_spill] sm:$0xff] }
 0x193   :  { %2077 = vmatprep.subr.mxu0 %v7135_v51  ;;  %2245 = vmatpush1.msra.mxu1 %v10612_v7  ;;  %v10619_v51 = vld [vmem:[#allocation321_spill] sm:$0xff] }
 0x194   :  { %2080 = vmatpush1.msra.mxu0 %v10611_v46  ;;  %2247 = vmatprep.subr.mxu1 %v10613_v41  ;;  %v10621_v46 = vld [vmem:[#allocation323_spill] sm:$0xff] }
 0x195   :  { %2083 = vmatprep.subr.mxu0 %v7160_v2  ;;  %2249 = vmatpush1.msra.mxu1 %v10615_v58  ;;  %v10622_v2 = vld [vmem:[#allocation330_spill] sm:$0xff] }
 0x196   :  { %2086 = vmatpush1.msra.mxu0 %v10614_v32  ;;  %2251 = vmatprep.subr.mxu1 %v10617_v5  ;;  %v10623_v32 = vld [vmem:[#allocation332_spill] sm:$0xff] }
 0x197   :  { %2089 = vmatprep.subr.mxu0 %v10616_v22  ;;  %2253 = vmatpush1.msra.mxu1 %v10619_v51  ;;  %v10625_v22 = vld [vmem:[#allocation386_spill] sm:$0xff] }
 0x198   :  { %2092 = vmatpush1.msra.mxu0 %v10618_v44  ;;  %2255 = vmatprep.subr.mxu1 %v10621_v46  ;;  %v10624_v44 = vld [vmem:[#allocation339_spill] sm:$0xff] }
 0x199   :  { %2095 = vmatprep.subr.mxu0 %v10620_v39  ;;  %2257 = vmatpush1.msra.mxu1 %v10622_v2  ;;  %v10626_v39 = vld [vmem:[#allocation342_spill] sm:$0xff] }
 0x19a   :  { %2098 = vmatpush1.msra.mxu0 %v7239_v17  ;;  %2259 = vmatprep.subr.mxu1 %v10623_v32  ;;  %v10628_v17 = vld [vmem:[#allocation349_spill] sm:$0xff] }
 0x19b   :  { %2101 = vmatprep.subr.mxu0 %v7242_v52  ;;  %2261 = vmatpush1.msra.mxu1 %v7086_v55  ;;  %v10630_v52 = vld [vmem:[#allocation352_spill] sm:$0xff] }
 0x19c   :  { %2104 = vmatpush1.msra.mxu0 %v7254_v0  ;;  %2263 = vmatprep.subr.mxu1 %v10624_v44  ;;  %v10632_v0 = vld [vmem:[#allocation355_spill] sm:$0xff] }
 0x19d   :  { %2107 = vmatprep.subr.mxu0 %v7266_v21  ;;  %2265 = vmatpush1.msra.mxu1 %v10626_v39  ;;  %v10633_v21 = vld [vmem:[#allocation361_spill] sm:$0xff] }
 0x19e   :  { %2110 = vmatpush1.msra.mxu0 %v10625_v22  ;;  %2267 = vmatprep.subr.mxu1 %v10628_v17  ;;  %v10634_v22 = vld [vmem:[#allocation362_spill] sm:$0xff]  ;;  %v10636_v17 = vld [vmem:[#allocation417_spill] sm:$0xff] }
 0x19f   :  { %2113 = vmatprep.subr.mxu0 %v10627_v49  ;;  %2269 = vmatpush1.msra.mxu1 %v10630_v52  ;;  %v10635_v49 = vld [vmem:[#allocation365_spill] sm:$0xff] }
 0x1a0   :  { %2116 = vmatpush2.msra.mxu0 %v10629_v10  ;;  %2271 = vmatprep.subr.mxu1 %v10632_v0  ;;  %v10637_v10 = vld [vmem:[#allocation368_spill] sm:$0xff]  ;;  %v10638_v52 = vld [vmem:[#allocation421_spill] sm:$0xff]  ;;  %v10640_v0 = vld [vmem:[#allocation427_spill] sm:$0xff] }
 0x1a1   :  { %2119 = vmatprep.subr.mxu0 %v10631_v4  ;;  %2273 = vmatpush1.msra.mxu1 %v10633_v21  ;;  %v10639_v4 = vld [vmem:[#allocation372_spill] sm:$0xff] }
 0x1a2   :  { %2122 = vmatpush2.msra.mxu0 %v7357_v12  ;;  %2275 = vmatprep.subr.mxu1 %v10634_v22  ;;  %v10641_v12 = vld [vmem:[#allocation377_spill] sm:$0xff]  ;;  %v10643_v22 = vld [vmem:[#allocation434_spill] sm:$0xff] }
 0x1a3   :  { %2125 = vmatprep.subr.mxu0 %v7369_v11  ;;  %2277 = vmatpush1.msra.mxu1 %v10635_v49  ;;  %v10642_v11 = vld [vmem:[#allocation385_spill] sm:$0xff] }
 0x1a4   :  { %2128 = vmatpush2.msra.mxu0 %v7381_v16  ;;  %2279 = vmatprep.subr.mxu1 %v10637_v10  ;;  %v10644_v16 = vld [vmem:[#allocation387_spill] sm:$0xff]  ;;  %v10645_v49 = vld [vmem:[#allocation437_spill] sm:$0xff] }
 0x1a5   :  { %2131 = vmatprep.subr.mxu0 %v10636_v17  ;;  %2281 = vmatpush1.msra.mxu1 %v10639_v4  ;;  %v10646_v17 = vld [vmem:[#allocation394_spill] sm:$0xff] }
 0x1a6   :  { %2134 = vmatpush2.msra.mxu0 %v10638_v52  ;;  %2283 = vmatprep.subr.mxu1 %v10641_v12  ;;  %v10647_v52 = vld [vmem:[#allocation396_spill] sm:$0xff] }
 0x1a7   :  { %2137 = vmatprep.subr.mxu0 %v10640_v0  ;;  %2285 = vmatpush2.msra.mxu1 %v10642_v11  ;;  %v10648_v0 = vld [vmem:[#allocation397_spill] sm:$0xff]  ;;  %v10650_v11 = vld [vmem:[#allocation450_spill] sm:$0xff] }
 0x1a8   :  { %2140 = vmatpush2.msra.mxu0 %v7439_v53  ;;  %2287 = vmatprep.subr.mxu1 %v10644_v16  ;;  %v10649_v53 = vld [vmem:[#allocation403_spill] sm:$0xff]  ;;  %v10652_v16 = vld [vmem:[#allocation456_spill] sm:$0xff] }
 0x1a9   :  { %2143 = vmatprep.subr.mxu0 %v10643_v22  ;;  %2289 = vmatpush2.msra.mxu1 %v10646_v17  ;;  %v10651_v22 = vld [vmem:[#allocation406_spill] sm:$0xff]  ;;  %v10654_v17 = vld [vmem:[#allocation465_spill] sm:$0xff] }
 0x1aa   :  { %2146 = vmatpush2.msra.mxu0 %v10645_v49  ;;  %2291 = vmatprep.subr.mxu1 %v10647_v52  ;;  %v10653_v49 = vld [vmem:[#allocation408_spill] sm:$0xff] }
 0x1ab   :  { %2149 = vmatprep.subr.mxu0 %v7474_v15  ;;  %2293 = vmatpush2.msra.mxu1 %v10648_v0  ;;  %v10655_v15 = vld [vmem:[#allocation416_spill] sm:$0xff] }
 0x1ac   :  { %2152 = vmatpush2.msra.mxu0 %v7486_v43  ;;  %2295 = vmatprep.subr.mxu1 %v10649_v53  ;;  %v10656_v43 = vld [vmem:[#allocation419_spill] sm:$0xff] }
 0x1ad   :  { %2155 = vmatprep.subr.mxu0 %v7498_v57  ;;  %2297 = vmatpush2.msra.mxu1 %v10651_v22  ;;  %v10657_v57 = vld [vmem:[#allocation423_spill] sm:$0xff] }
 0x1ae   :  { %2158 = vmatpush2.msra.mxu0 %v10650_v11  ;;  %2299 = vmatprep.subr.mxu1 %v10653_v49  ;;  %v10658_v11 = vld [vmem:[#allocation425_spill] sm:$0xff] }
 0x1af   :  { %2161 = vmatprep.subr.mxu0 %v10652_v16  ;;  %2301 = vmatpush2.msra.mxu1 %v10655_v15  ;;  %v10659_v16 = vld [vmem:[#allocation429_spill] sm:$0xff] }
 0x1b0   :  { %2164 = vmatpush2.msra.mxu0 %v10654_v17  ;;  %2303 = vmatprep.subr.mxu1 %v10656_v43  ;;  %v10660_v17 = vld [vmem:[#allocation432_spill] sm:$0xff] }
 0x1b1   :  { %2167 = vmatprep.subr.mxu0 %v7578_v63  ;;  %2305 = vmatpush2.msra.mxu1 %v10657_v57  ;;  %v10661_v63 = vld [vmem:[#allocation436_spill] sm:$0xff] }
 0x1b2   :  { %2170 = vmatpush2.msra.mxu0 %v7589_v36  ;;  %2307 = vmatprep.subr.mxu1 %v10658_v11  ;;  %v10662_v36 = vld [vmem:[#allocation441_spill] sm:$0xff] }
 0x1b3   :  { %2173 = vmatprep.subr.mxu0 %v7600_v19  ;;  %2309 = vmatpush2.msra.mxu1 %v10659_v16  ;;  %v10663_v19 = vld [vmem:[#allocation448_spill] sm:$0xff] }
 0x1b4   :  { %2176 = vmatpush2.msra.mxu0 %v7612_v34  ;;  %2311 = vmatprep.subr.mxu1 %v10660_v17  ;;  %v10664_v34 = vld [vmem:[#allocation452_spill] sm:$0xff] }
 0x1b5   :  { %2179 = vmatprep.subr.mxu0 %v7624_v54  ;;  %2313 = vmatpush2.msra.mxu1 %v10661_v63  ;;  %v10707_v54 = vld [vmem:[#allocation413_spill] sm:$0xff] }
 0x1b6   :  { %2182 = vmatpush2.msra.mxu0 %v7636_v37  ;;  %2315 = vmatprep.subr.mxu1 %v10662_v36  ;;  %v10665_v37 = vld [vmem:[#allocation460_spill] sm:$0xff] }
 0x1b7   :  { %2185 = vmatprep.subr.mxu0 %v7648_v62  ;;  %2317 = vmatpush2.msra.mxu1 %v10663_v19  ;;  %v10666_v62 = vld [vmem:[#allocation461_spill] sm:$0xff] }
 0x1b8   :  { %2188 = vmatpush2.msra.mxu0 %v7671_v33  ;;  %2319 = vmatprep.subr.mxu1 %v10664_v34  ;;  %v10678_v33 = vld [vmem:[#allocation250_spill] sm:$0xff] }
 0x1b9   :  { %2191 = vmatprep.subr.mxu0 %v7683_v56  ;;  %2321 = vmatpush2.msra.mxu1 %v7541_v20  ;;  %v10667_v56 = vld [vmem:[#allocation246_spill] sm:$0xff] }
 0x1ba   :  { %2194 = vmatpush2.msra.mxu0 %v7695_v50  ;;  %2323 = vmatprep.subr.mxu1 %v10665_v37  ;;  %v10668_v50 = vld [vmem:[#allocation243_spill] sm:$0xff] }
 0x1bb   :  { %2197 = vmatprep.subr.mxu0 %v7704_v8  ;;  %2325 = vmatpush2.msra.mxu1 %v10666_v62  ;;  %v10669_v8 = vld [vmem:[#allocation282_spill] sm:$0xff] }
 0x1bc   :  { %2200 = vmatpush2.msra.mxu0 %v7716_v24  ;;  %2327 = vmatprep.subr.mxu1 %v7563_v47  ;;  %v10670_v24 = vld [vmem:[#allocation285_spill] sm:$0xff] }
 0x1bd   :  { %2203 = vmatprep.subr.mxu0 %v7728_v30  ;;  %2209 = vmatprep.mubr.f32.mxu0 %v10667_v56  ;;  %v10671_v30 = vld [vmem:[#allocation289_spill] sm:$0xff]  ;;  %v10673_v56 = vld [vmem:[#allocation295_spill] sm:$0xff] }
 0x1be   :  { %2206 = vmatpush2.msra.mxu0 %v7740_v29  ;;  %2329 = vmatpush2.msra.mxu1 %v7586_v45  ;;  %v10672_v29 = vld [vmem:[#allocation293_spill] sm:$0xff] }
 0x1bf   :  { %2212 = vmatmul.mubr.f32.vlgmr.msra.gmra.mxu0 %v10668_v50  ;;  %2331 = vmatprep.subr.mxu1 %v7597_v28  ;;  %v10674_v50 = vld [vmem:[#allocation296_spill] sm:$0xff] }
 0x1c0   :  { %2362 = vmatprep.subr.mxu0 %v10669_v8  ;;  %2333 = vmatpush2.msra.mxu1 %v7606_v6  ;;  %v10675_v8 = vld [vmem:[#allocation302_spill] sm:$0xff] }
 0x1c1   :  { %2366 = vmatpush1.msra.mxu0 %v10670_v24  ;;  %2335 = vmatprep.subr.mxu1 %v7630_v42  ;;  %v10676_v24 = vld [vmem:[#allocation252_spill] sm:$0xff] }
 0x1c2   :  { %2370 = vmatprep.subr.mxu0 %v10671_v30  ;;  %2337 = vmatpush2.msra.mxu1 %v7642_v27  ;;  %v10677_v30 = vld [vmem:[#allocation305_spill] sm:$0xff] }
 0x1c3   :  { %2374 = vmatpush1.msra.mxu0 %v10672_v29  ;;  %2339 = vmatprep.subr.mxu1 %v7654_v25  ;;  %v10679_v29 = vld [vmem:[#allocation310_spill] sm:$0xff] }
 0x1c4   :  { %2378 = vmatprep.subr.mxu0 %v10673_v56  ;;  %2341 = vmatpush2.msra.mxu1 %v7656_v9  ;;  %v10680_v56 = vld [vmem:[#allocation314_spill] sm:$0xff] }
 0x1c5   :  { %2382 = vmatpush1.msra.mxu0 %v10674_v50  ;;  %2343 = vmatprep.subr.mxu1 %v7677_v60  ;;  %v10681_v50 = vld [vmem:[#allocation317_spill] sm:$0xff] }
 0x1c6   :  { %2386 = vmatprep.subr.mxu0 %v10675_v8  ;;  %2345 = vmatpush2.msra.mxu1 %v7689_v40  ;;  %v10682_v8 = vld [vmem:[#allocation324_spill] sm:$0xff] }
 0x1c7   :  { %2349 = vmatprep.mubr.f32.mxu1 %v10676_v24  ;;  %2390 = vmatpush1.msra.mxu0 %v10677_v30  ;;  %v10683_v24 = vld [vmem:[#allocation325_spill] sm:$0xff] }
 0x1c8   :  { %2353 = vmatmul.mubr.f32.vlgmr.msra.gmra.mxu1 %v10678_v33  ;;  %2394 = vmatprep.subr.mxu0 %v10679_v29  ;;  %v10684_v33 = vld [vmem:[#allocation327_spill] sm:$0xff]  ;;  %v10705_v30 = vld [vmem:[#allocation409_spill] sm:$0xff] }
 0x1c9   :  { %2625 = vmatprep.subr.mxu1 %v10590_v3  ;;  %2398 = vmatpush1.msra.mxu0 %v10680_v56  ;;  %v10685_v29 = vld [vmem:[#allocation331_spill] sm:$0xff]  ;;  %v10686_v56 = vld [vmem:[#allocation334_spill] sm:$0xff]  ;;  %v10848_v3 = vld [vmem:[#allocation208_spill] sm:$0xff] }
 0x1ca   :  { %2627 = vmatpush1.msra.mxu1 %v10592_v1  ;;  %2402 = vmatprep.subr.mxu0 %v10681_v50  ;;  %v10687_v50 = vld [vmem:[#allocation340_spill] sm:$0xff] }
 0x1cb   :  { %2629 = vmatprep.subr.mxu1 %v10594_v23  ;;  %2406 = vmatpush1.msra.mxu0 %v10682_v8  ;;  %v10688_v8 = vld [vmem:[#allocation344_spill] sm:$0xff]  ;;  %v10844_v23 = vld [vmem:[#allocation201_spill] sm:$0xff] }
 0x1cc   :  { %2631 = vmatpush1.msra.mxu1 %v6877_v18  ;;  %2410 = vmatprep.subr.mxu0 %v10683_v24  ;;  %v10689_v24 = vld [vmem:[#allocation350_spill] sm:$0xff]  ;;  %v10846_v1 = vld [vmem:[#allocation204_spill] sm:$0xff] }
 0x1cd   :  { %2633 = vmatprep.subr.mxu1 %v10596_v59  ;;  %2414 = vmatpush1.msra.mxu0 %v10684_v33  ;;  %v10690_v33 = vld [vmem:[#allocation356_spill] sm:$0xff]  ;;  %v10842_v59 = vld [vmem:[#allocation198_spill] sm:$0xff] }
 0x1ce   :  { %2635 = vmatpush1.msra.mxu1 %v10598_v48  ;;  %2418 = vmatprep.subr.mxu0 %v10685_v29  ;;  %v10691_v29 = vld [vmem:[#allocation359_spill] sm:$0xff] }
 0x1cf   :  { %2637 = vmatprep.subr.mxu1 %v10600_v13  ;;  %2422 = vmatpush1.msra.mxu0 %v10686_v56  ;;  %v10692_v56 = vld [vmem:[#allocation360_spill] sm:$0xff]  ;;  %v10840_v48 = vld [vmem:[#allocation195_spill] sm:$0xff] }
 0x1d0   :  { %2639 = vmatpush1.msra.mxu1 %v10602_v26  ;;  %2426 = vmatprep.subr.mxu0 %v10687_v50  ;;  %v10693_v50 = vld [vmem:[#allocation366_spill] sm:$0xff]  ;;  %v10838_v13 = vld [vmem:[#allocation192_spill] sm:$0xff] }
 0x1d1   :  { %2641 = vmatprep.subr.mxu1 %v10604_v31  ;;  %2430 = vmatpush1.msra.mxu0 %v10688_v8  ;;  %v10694_v8 = vld [vmem:[#allocation369_spill] sm:$0xff]  ;;  %v10834_v31 = vld [vmem:[#allocation182_spill] sm:$0xff] }
 0x1d2   :  { %2643 = vmatpush1.msra.mxu1 %v10606_v35  ;;  %2434 = vmatprep.subr.mxu0 %v10689_v24  ;;  %v10695_v24 = vld [vmem:[#allocation374_spill] sm:$0xff]  ;;  %v10831_v35 = vld [vmem:[#allocation176_spill] sm:$0xff] }
 0x1d3   :  { %2645 = vmatprep.subr.mxu1 %v10608_v38  ;;  %2438 = vmatpush1.msra.mxu0 %v10690_v33  ;;  %v10696_v33 = vld [vmem:[#allocation378_spill] sm:$0xff] }
 0x1d4   :  { %2647 = vmatpush1.msra.mxu1 %v10609_v61  ;;  %2442 = vmatprep.subr.mxu0 %v10691_v29  ;;  %v10697_v29 = vld [vmem:[#allocation381_spill] sm:$0xff]  ;;  %v10823_v61 = vld [vmem:[#allocation163_spill] sm:$0xff]  ;;  %v10825_v38 = vld [vmem:[#allocation166_spill] sm:$0xff] }
 0x1d5   :  { %2649 = vmatprep.subr.mxu1 %v10610_v14  ;;  %2446 = vmatpush1.msra.mxu0 %v10692_v56  ;;  %v10698_v56 = vld [vmem:[#allocation388_spill] sm:$0xff]  ;;  %v10820_v14 = vld [vmem:[#allocation139_spill] sm:$0xff]  ;;  %v10836_v26 = vld [vmem:[#allocation186_spill] sm:$0xff] }
 0x1d6   :  { %2651 = vmatpush1.msra.mxu1 %v10612_v7  ;;  %2450 = vmatprep.subr.mxu0 %v10693_v50  ;;  %v10699_v50 = vld [vmem:[#allocation389_spill] sm:$0xff]  ;;  %v10818_v7 = vld [vmem:[#allocation135_spill] sm:$0xff] }
 0x1d7   :  { %2653 = vmatprep.subr.mxu1 %v10613_v41  ;;  %2454 = vmatpush1.msra.mxu0 %v10694_v8  ;;  %v10700_v8 = vld [vmem:[#allocation391_spill] sm:$0xff]  ;;  %v10816_v41 = vld [vmem:[#allocation130_spill] sm:$0xff] }
 0x1d8   :  { %2655 = vmatpush1.msra.mxu1 %v10615_v58  ;;  %2458 = vmatprep.subr.mxu0 %v10695_v24  ;;  %v10701_v24 = vld [vmem:[#allocation395_spill] sm:$0xff]  ;;  %v10812_v58 = vld [vmem:[#allocation121_spill] sm:$0xff] }
 0x1d9   :  { %2657 = vmatprep.subr.mxu1 %v10617_v5  ;;  %2462 = vmatpush1.msra.mxu0 %v10696_v33  ;;  %v10702_v33 = vld [vmem:[#allocation398_spill] sm:$0xff]  ;;  %v10810_v5 = vld [vmem:[#allocation117_spill] sm:$0xff] }
 0x1da   :  { %2659 = vmatpush1.msra.mxu1 %v10619_v51  ;;  %2466 = vmatprep.subr.mxu0 %v10697_v29  ;;  %v10703_v29 = vld [vmem:[#allocation404_spill] sm:$0xff]  ;;  %v10808_v51 = vld [vmem:[#allocation114_spill] sm:$0xff] }
 0x1db   :  { %2661 = vmatprep.subr.mxu1 %v10621_v46  ;;  %2470 = vmatpush1.msra.mxu0 %v10698_v56  ;;  %v10704_v56 = vld [vmem:[#allocation349_spill] sm:$0xff]  ;;  %v10805_v46 = vld [vmem:[#allocation128_spill] sm:$0xff] }
 0x1dc   :  { %2663 = vmatpush1.msra.mxu1 %v10622_v2  ;;  %2474 = vmatprep.subr.mxu0 %v10699_v50  ;;  %v10706_v50 = vld [vmem:[#allocation352_spill] sm:$0xff] }
 0x1dd   :  { %2665 = vmatprep.subr.mxu1 %v10623_v32  ;;  %2478 = vmatpush1.msra.mxu0 %v10700_v8  ;;  %v10708_v8 = vld [vmem:[#allocation355_spill] sm:$0xff] }
 0x1de   :  { %2667 = vmatpush1.msra.mxu1 %v7086_v55  ;;  %2482 = vmatprep.subr.mxu0 %v10701_v24  ;;  %v10709_v55 = vld [vmem:[#allocation420_spill] sm:$0xff]  ;;  %v10804_v32 = vld [vmem:[#allocation107_spill] sm:$0xff] }
 0x1df   :  { %2669 = vmatprep.subr.mxu1 %v10624_v44  ;;  %2486 = vmatpush1.msra.mxu0 %v10702_v33  ;;  %v10710_v24 = vld [vmem:[#allocation424_spill] sm:$0xff]  ;;  %v10711_v33 = vld [vmem:[#allocation362_spill] sm:$0xff]  ;;  %v10802_v44 = vld [vmem:[#allocation103_spill] sm:$0xff] }
 0x1e0   :  { %2671 = vmatpush1.msra.mxu1 %v10626_v39  ;;  %2490 = vmatprep.subr.mxu0 %v10703_v29  ;;  %v10712_v39 = vld [vmem:[#allocation426_spill] sm:$0xff]  ;;  %v10713_v29 = vld [vmem:[#allocation365_spill] sm:$0xff] }
 0x1e1   :  { %2673 = vmatprep.subr.mxu1 %v10704_v56  ;;  %2494 = vmatpush2.msra.mxu0 %v10705_v30  ;;  %v10714_v56 = vld [vmem:[#allocation430_spill] sm:$0xff]  ;;  %v10715_v30 = vld [vmem:[#allocation433_spill] sm:$0xff] }
 0x1e2   :  { %2675 = vmatpush1.msra.mxu1 %v10706_v50  ;;  %2498 = vmatprep.subr.mxu0 %v10707_v54  ;;  %v10716_v54 = vld [vmem:[#allocation439_spill] sm:$0xff]  ;;  %v10800_v50 = vld [vmem:[#allocation98_spill] sm:$0xff] }
 0x1e3   :  { %2677 = vmatprep.subr.mxu1 %v10708_v8  ;;  %2502 = vmatpush2.msra.mxu0 %v10709_v55  ;;  %v10717_v55 = vld [vmem:[#allocation442_spill] sm:$0xff] }
 0x1e4   :  { %2679 = vmatpush1.msra.mxu1 %v10633_v21  ;;  %2506 = vmatprep.subr.mxu0 %v10710_v24  ;;  %v10718_v24 = vld [vmem:[#allocation385_spill] sm:$0xff]  ;;  %v10797_v21 = vld [vmem:[#allocation108_spill] sm:$0xff]  ;;  %v10798_v8 = vld [vmem:[#allocation94_spill] sm:$0xff] }
 0x1e5   :  { %2681 = vmatprep.subr.mxu1 %v10711_v33  ;;  %2510 = vmatpush2.msra.mxu0 %v10712_v39  ;;  %v10719_v33 = vld [vmem:[#allocation445_spill] sm:$0xff]  ;;  %v10720_v39 = vld [vmem:[#allocation387_spill] sm:$0xff] }
 0x1e6   :  { %2683 = vmatpush1.msra.mxu1 %v10713_v29  ;;  %2514 = vmatprep.subr.mxu0 %v10714_v56  ;;  %v10721_v29 = vld [vmem:[#allocation449_spill] sm:$0xff]  ;;  %v10722_v56 = vld [vmem:[#allocation394_spill] sm:$0xff] }
 0x1e7   :  { %2685 = vmatprep.subr.mxu1 %v10637_v10  ;;  %2518 = vmatpush2.msra.mxu0 %v10715_v30  ;;  %v10723_v10 = vld [vmem:[#allocation453_spill] sm:$0xff]  ;;  %v10724_v30 = vld [vmem:[#allocation455_spill] sm:$0xff] }
 0x1e8   :  { %2687 = vmatpush1.msra.mxu1 %v10639_v4  ;;  %2522 = vmatprep.subr.mxu0 %v10716_v54  ;;  %v10725_v54 = vld [vmem:[#allocation459_spill] sm:$0xff]  ;;  %v10794_v4 = vld [vmem:[#allocation85_spill] sm:$0xff] }
 0x1e9   :  { %2689 = vmatprep.subr.mxu1 %v10641_v12  ;;  %2526 = vmatpush2.msra.mxu0 %v10717_v55  ;;  %v10726_v55 = vld [vmem:[#allocation462_spill] sm:$0xff] }
 0x1ea   :  { %2691 = vmatpush2.msra.mxu1 %v10718_v24  ;;  %2530 = vmatprep.subr.mxu0 %v10719_v33  ;;  %v10727_v33 = vld [vmem:[#allocation467_spill] sm:$0xff]  ;;  %v10792_v12 = vld [vmem:[#allocation82_spill] sm:$0xff] }
 0x1eb   :  { %2693 = vmatprep.subr.mxu1 %v10720_v39  ;;  %2534 = vmatpush2.msra.mxu0 %v10721_v29  ;;  %v333_v29 = vpop.f32.mrf.mxu0  ;;  %v10789_v39 = vld [vmem:[#allocation96_spill] sm:$0xff]  ;;  %v10791_v24 = vld [vmem:[#allocation99_spill] sm:$0xff] }
 0x1ec   :  { %2695 = vmatpush2.msra.mxu1 %v10722_v56  ;;  %2538 = vmatprep.subr.mxu0 %v10723_v10  ;;  %v10728_v10 = vld [vmem:[#allocation477_spill] sm:$0xff]  ;;  %v10787_v56 = vld [vmem:[#allocation90_spill] sm:$0xff] }
 0x1ed   :  { %2697 = vmatprep.subr.mxu1 %v10647_v52  ;;  %2542 = vmatpush2.msra.mxu0 %v10724_v30  ;;  %v10729_v30 = vld [vmem:[#allocation480_spill] sm:$0xff]  ;;  %v10786_v52 = vld [vmem:[#allocation71_spill] sm:$0xff] }
 0x1ee   :  { %2699 = vmatpush2.msra.mxu1 %v10648_v0  ;;  %2546 = vmatprep.subr.mxu0 %v10725_v54  ;;  %v10730_v54 = vld [vmem:[#allocation484_spill] sm:$0xff]  ;;  %v10784_v0 = vld [vmem:[#allocation66_spill] sm:$0xff] }
 0x1ef   :  { %2701 = vmatprep.subr.mxu1 %v10649_v53  ;;  %2550 = vmatpush2.msra.mxu0 %v10726_v55  ;;  %v10731_v55 = vld [vmem:[#allocation488_spill] sm:$0xff] }
 0x1f0   :  { %2703 = vmatpush2.msra.mxu1 %v10651_v22  ;;  %2554 = vmatprep.subr.mxu0 %v10727_v33  ;;  %v335_v33 = vpop.f32.mrf.mxu0  ;;  %v726_v22 = vpop.f32.mrf.mxu1  ;;  %v10782_v53 = vld [vmem:[#allocation60_spill] sm:$0xff] }
 0x1f1   :  { %2705 = vmatprep.subr.mxu1 %v10653_v49  ;;  %2558 = vmatpush2.msra.mxu0 %v10728_v10  ;;  %v10732_v49 = vld [vmem:[#allocation492_spill] sm:$0xff]  ;;  %v10733_v10 = vld [vmem:[#allocation494_spill] sm:$0xff] }
 0x1f2   :  { %2707 = vmatpush2.msra.mxu1 %v10655_v15  ;;  %2562 = vmatprep.subr.mxu0 %v10729_v30  ;;  %v929_v30 = vpop.f32.mrf.mxu0 }
 0x1f3   :  { %2709 = vmatprep.subr.mxu1 %v10656_v43  ;;  %2566 = vmatpush2.msra.mxu0 %v10730_v54  ;;  %v10734_v43 = vld [vmem:[#allocation497_spill] sm:$0xff]  ;;  %v10735_v54 = vld [vmem:[#allocation500_spill] sm:$0xff] }
 0x1f4   :  { %2711 = vmatpush2.msra.mxu1 %v10657_v57  ;;  %2570 = vmatprep.subr.mxu0 %v10731_v55  ;;  %v728_v55 = vpop.f32.mrf.mxu1 }
 0x1f5   :  { %2713 = vmatprep.subr.mxu1 %v10658_v11  ;;  %2574 = vmatpush2.msra.mxu0 %v10732_v49  ;;  %v10736_v11 = vld [vmem:[#allocation505_spill] sm:$0xff]  ;;  %v10737_v49 = vld [vmem:[#allocation508_spill] sm:$0xff] }
 0x1f6   :  { %2715 = vmatpush2.msra.mxu1 %v10659_v16  ;;  %2578 = vmatprep.subr.mxu0 %v10733_v10  ;;  %v931_v10 = vpop.f32.mrf.mxu0  ;;  %v10738_v16 = vld [vmem:[#allocation511_spill] sm:$0xff] }
 0x1f7   :  { %2717 = vmatprep.subr.mxu1 %v10660_v17  ;;  %2582 = vmatpush2.msra.mxu0 %v10734_v43  ;;  %v1070_v17 = vpop.f32.mrf.mxu1  ;;  %v10739_v43 = vld [vmem:[#allocation514_spill] sm:$0xff] }
 0x1f8   :  { %2719 = vmatpush2.msra.mxu1 %v10661_v63  ;;  %2586 = vmatprep.subr.mxu0 %v10735_v54  ;;  %v10740_v54 = vld [vmem:[#allocation516_spill] sm:$0xff] }
 0x1f9   :  { %2721 = vmatprep.subr.mxu1 %v10662_v36  ;;  %2590 = vmatpush2.msra.mxu0 %v10736_v11  ;;  %v1335_v11 = vpop.f32.mrf.mxu0  ;;  %v729_v36 = vadd.f32 %v728_v55, %v335_v33  ;;  %v1072_v57 = vpop.f32.mrf.mxu1  ;;  %v10745_v55 = vld [vmem:[#allocation8_spill] sm:$0xff] }
 0x1fa   :  { %2723 = vmatpush2.msra.mxu1 %v10663_v19  ;;  %2594 = vmatprep.subr.mxu0 %v10737_v49  ;;  %v727_v19 = vadd.f32 %v726_v22, %v333_v29  ;;  %v10741_v49 = vld [vmem:[#allocation518_spill] sm:$0xff] }
 0x1fb   :  { %2725 = vmatprep.subr.mxu1 %v10664_v34  ;;  %2598 = vmatpush2.msra.mxu0 %v10738_v16  ;;  %v5463_v34 = vmov 1983009808   ;;  %v2771_v16 = vlaneseq  ;;  %v932_v15 = vadd.f32 %v931_v10, %v729_v36  ;;  %v1337_v22 = vpop.f32.mrf.mxu0  ;;  %v1472_v36 = vpop.f32.mrf.mxu1 }
 0x1fc   :  { %2727 = vmatpush2.msra.mxu1 %v7541_v20  ;;  %2602 = vmatprep.subr.mxu0 %v10739_v43  ;;  %v2769_v63 = vunpack.c.l.s4 %v5463_v34  ;;  %v10742_v20 = vld [vmem:[#allocation520_spill] sm:$0xff]  ;;  %v10746_v34 = vld [vmem:[#allocation9_spill] sm:$0xff] }
 0x1fd   :  { %2729 = vmatprep.subr.mxu1 %v10665_v37  ;;  %2606 = vmatpush2.msra.mxu0 %v10740_v54  ;;  %v10743_v43 = vld [vmem:[#allocation240_spill] sm:$0xff]  ;;  %v930_v37 = vadd.f32 %v929_v30, %v727_v19  ;;  %v10744_v54 = vld [vmem:[#allocation237_spill] sm:$0xff]  ;;  %v1073_v33 = vadd.f32 %v1072_v57, %v932_v15  ;;  %v10747_v19 = vld [vmem:[#allocation10_spill] sm:$0xff] }
 0x1fe   :  { %2731 = vmatpush2.msra.mxu1 %v10666_v62  ;;  %2610 = vmatprep.subr.mxu0 %v10741_v49  ;;  %v2772_v49 = vshrl.u32 %v2771_v16, 7  ;;  %v10749_v15 = vld [vmem:[#allocation12_spill] sm:$0xff]  ;;  %v1474_v16 = vpop.f32.mrf.mxu1 }
 0x1ff   :  { %2733 = vmatprep.subr.mxu1 %v7563_v47  ;;  %2614 = vmatpush2.msra.mxu0 %v10742_v20  ;;  %v1071_v29 = vadd.f32 %v1070_v17, %v930_v37  ;;  %v2770_v20 = vunpack.c.0.s8 %v2769_v63  ;;  %v1338_v10 = vadd.f32 %v1337_v22, %v1073_v33  ;;  %v8083_v57 = vld [vmem:[%s8955_s2] sm:$0xf]  ;;  %v10751_v17 = vld [vmem:[#allocation13_spill] sm:$0xff]  ;;  %v10753_v22 = vld [vmem:[#allocation14_spill] sm:$0xff] }
 0x200   :  { %2616 = vmatprep.mubr.f32.mxu0 %v10743_v43  ;;  %2735 = vmatpush2.msra.mxu1 %v7586_v45  ;;  %10750 = vst [vmem:[#allocation246_spill] sm:$0xff] %v8083_v57  ;;  %v9852_v33 = vsub.f32 1.0, %v8083_v57  ;;  %v10778_v45 = vld [vmem:[#allocation54_spill] sm:$0xff]  ;;  %v10780_v47 = vld [vmem:[#allocation57_spill] sm:$0xff] }
 0x201   :  { %2618 = vmatmul.mubr.f32.vlgmr.msra.gmra.mxu0 %v10744_v54  ;;  %2737 = vmatprep.subr.mxu1 %v7597_v28  ;;  %v1336_v30 = vadd.f32 %v1335_v11, %v1071_v29  ;;  %v10748_v28 = vld [vmem:[#allocation11_spill] sm:$0xff]  ;;  %v1475_v63 = vadd.f32 %v1474_v16, %v1338_v10  ;;  %v8087_v37 = vsub.s32 %v2770_v20, %v2772_v49  ;;  %v180_v29 = vld [vmem:[%s8954_s1] sm:$0xf]  ;;  %v10757_v10 = vld [vmem:[#allocation18_spill] sm:$0xff] }
 0x202   :  { %2804 = vmatprep.subr.mxu0 %v10745_v55  ;;  %2739 = vmatpush2.msra.mxu1 %v7606_v6  ;;  %v10755_v20 = vld [vmem:[#allocation16_spill] sm:$0xff]  ;;  %v10756_v49 = vld [vmem:[#allocation35_spill] sm:$0xff]  ;;  %v10758_v16 = vld [vmem:[#allocation38_spill] sm:$0xff] }
 0x203   :  { %2806 = vmatpush1.msra.mxu0 %v10746_v34  ;;  %2741 = vmatprep.subr.mxu1 %v7630_v42  ;;  %v1473_v11 = vadd.f32 %v1472_v36, %v1336_v30  ;;  %10752 = vst [vmem:[#allocation243_spill] sm:$0xff] %v8087_v37  ;;  %v2764_v36 = vmul.f32 %v180_v29, %v8083_v57  ;;  %v10764_v29 = vld [vmem:[#allocation44_spill] sm:$0xff]  ;;  %v10774_v42 = vld [vmem:[#allocation67_spill] sm:$0xff]  ;;  %v10776_v6 = vld [vmem:[#allocation70_spill] sm:$0xff] }
 0x204   :  { %2808 = vmatprep.subr.mxu0 %v10747_v19  ;;  %2743 = vmatpush2.msra.mxu1 %v7642_v27  ;;  %v10766_v27 = vld [vmem:[#allocation47_spill] sm:$0xff]  ;;  %v10829_v57 = vld [vmem:[#allocation172_spill] sm:$0xff] }
 0x205   :  { %2810 = vmatpush1.msra.mxu0 %v10748_v28  ;;  %2745 = vmatprep.subr.mxu1 %v7654_v25  ;;  %v10754_v25 = vld [vmem:[#allocation15_spill] sm:$0xff] }
 0x206   :  { %2812 = vmatprep.subr.mxu0 %v10749_v15  ;;  %2747 = vmatpush2.msra.mxu1 %v7656_v9  ;;  %v2767_v9 = vcombine.low %v1473_v11, %v1475_v63  ;;  %v10759_v11 = vld [vmem:[#allocation20_spill] sm:$0xff]  ;;  %v10760_v63 = vld [vmem:[#allocation39_spill] sm:$0xff] }
 0x207   :  { %2814 = vmatpush1.msra.mxu0 %v10751_v17  ;;  %2749 = vmatprep.subr.mxu1 %v7677_v60  ;;  %v10763_v60 = vld [vmem:[#allocation25_spill] sm:$0xff] }
 0x208   :  { %2816 = vmatprep.subr.mxu0 %v10753_v22  ;;  %2751 = vmatpush2.msra.mxu1 %v7689_v40  ;;  %v2774_v30 = vrot.slane %v2767_v9, %v8087_v37  ;;  %v10762_v40 = vld [vmem:[#allocation41_spill] sm:$0xff] }
 0x209   :  { %2753 = vmatprep.mubr.f32.mxu1 %v10743_v43  ;;  %2818 = vmatpush1.msra.mxu0 %v10754_v25  ;;  %v10765_v9 = vld [vmem:[#allocation29_spill] sm:$0xff] }
 0x20a   :  { %2755 = vmatmul.mubr.f32.vlgmr.msra.gmra.mxu1 %v10744_v54  ;;  %2820 = vmatprep.subr.mxu0 %v10755_v20  ;;  %v2776_v43 = vmul.f32 %v2774_v30, %v9852_v33  ;;  %v10761_v54 = vld [vmem:[#allocation23_spill] sm:$0xff]  ;;  %v10767_v30 = vld [vmem:[#allocation32_spill] sm:$0xff]  ;;  %v10773_v33 = vld [vmem:[#allocation46_spill] sm:$0xff] }
 0x20b   :  { %2953 = vmatprep.subr.mxu1 %v10756_v49  ;;  %2822 = vmatpush1.msra.mxu0 %v10757_v10 }
 0x20c   :  { %2959 = vmatpush1.msra.mxu1 %v10758_v16  ;;  %2824 = vmatprep.subr.mxu0 %v10759_v11  ;;  %v2777_v49 = vadd.f32 %v2776_v43, %v2764_v36  ;;  %v10770_v36 = vld [vmem:[#allocation61_spill] sm:$0xff]  ;;  %v10771_v43 = vld [vmem:[#allocation43_spill] sm:$0xff] }
 0x20d   :  { %2965 = vmatprep.subr.mxu1 %v10760_v63  ;;  %2826 = vmatpush1.msra.mxu0 %v10761_v54  ;;  %v10768_v63 = vld [vmem:[#allocation51_spill] sm:$0xff] }
 0x20e   :  { %2971 = vmatpush1.msra.mxu1 %v10762_v40  ;;  %2828 = vmatprep.subr.mxu0 %v10763_v60  ;;  %v8116_v16 = vrot.slane %v2777_v49, %v8087_v37  ;;  %5396 = vst [vmem:[%s8959_s6] sm:$0xf] %v2777_v49  ;;  %v10769_v40 = vld [vmem:[#allocation37_spill] sm:$0xff]  ;;  %v10775_v49 = vld [vmem:[#allocation50_spill] sm:$0xff] }
 0x20f   :  { %2977 = vmatprep.subr.mxu1 %v10764_v29  ;;  %2830 = vmatpush1.msra.mxu0 %v10765_v9  ;;  %v10772_v29 = vld [vmem:[#allocation64_spill] sm:$0xff]  ;;  %v10827_v37 = vld [vmem:[#allocation169_spill] sm:$0xff] }
 0x210   :  { %2983 = vmatpush1.msra.mxu1 %v10766_v27  ;;  %2832 = vmatprep.subr.mxu0 %v10767_v30  ;;  %v2800_v27 = vcombine.high %v8116_v16, %v8116_v16 }
 0x211   :  { %2989 = vmatprep.subr.mxu1 %v10768_v63  ;;  %2834 = vmatpush1.msra.mxu0 %v10769_v40 }
 0x212   :  { %2995 = vmatpush1.msra.mxu1 %v10770_v36  ;;  %2836 = vmatprep.subr.mxu0 %v10771_v43  ;;  %v8133_v63 = vand.u32 4294901760, %v2800_v27  ;;  %v10779_v36 = vld [vmem:[#allocation73_spill] sm:$0xff] }
 0x213   :  { %3001 = vmatprep.subr.mxu1 %v10772_v29  ;;  %2838 = vmatpush1.msra.mxu0 %v10773_v33  ;;  %v10781_v29 = vld [vmem:[#allocation76_spill] sm:$0xff] }
 0x214   :  { %3007 = vmatpush1.msra.mxu1 %v10774_v42  ;;  %2840 = vmatprep.subr.mxu0 %v10775_v49  ;;  %10777 = vst [vmem:[#allocation252_spill] sm:$0xff] %v8133_v63  ;;  %v8140_v62 = vsub.f32 %v2800_v27, %v8133_v63  ;;  %v10783_v42 = vld [vmem:[#allocation80_spill] sm:$0xff]  ;;  %v10790_v27 = vld [vmem:[#allocation79_spill] sm:$0xff] }
 0x215   :  { %3013 = vmatprep.subr.mxu1 %v10776_v6  ;;  %2842 = vmatpush1.msra.mxu0 %v10778_v45  ;;  %v10785_v6 = vld [vmem:[#allocation86_spill] sm:$0xff] }
 0x216   :  { %3019 = vmatpush1.msra.mxu1 %v10779_v36  ;;  %2844 = vmatprep.subr.mxu0 %v10780_v47  ;;  %v10788_v36 = vld [vmem:[#allocation75_spill] sm:$0xff] }
 0x217   :  { %3025 = vmatprep.subr.mxu1 %v10781_v29  ;;  %2846 = vmatpush1.msra.mxu0 %v10782_v53  ;;  %v9872_v29 = vand.u32 4294901760, %v8140_v62 }
 0x218   :  { %3031 = vmatpush1.msra.mxu1 %v10783_v42  ;;  %2848 = vmatprep.subr.mxu0 %v10784_v0  ;;  %v10793_v42 = vld [vmem:[#allocation102_spill] sm:$0xff] }
 0x219   :  { %3037 = vmatprep.subr.mxu1 %v10785_v6  ;;  %2850 = vmatpush1.msra.mxu0 %v10786_v52  ;;  %v10795_v6 = vld [vmem:[#allocation105_spill] sm:$0xff] }
 0x21a   :  { %3043 = vmatpush1.msra.mxu1 %v10787_v56  ;;  %2852 = vmatprep.subr.mxu0 %v10788_v36  ;;  %v10796_v56 = vld [vmem:[#allocation89_spill] sm:$0xff] }
 0x21b   :  { %3049 = vmatprep.subr.mxu1 %v10789_v39  ;;  %2854 = vmatpush1.msra.mxu0 %v10790_v27  ;;  %v2934_v39 = vsub.f32 %v8140_v62, %v9872_v29  ;;  %v10806_v29 = vld [vmem:[#allocation111_spill] sm:$0xff] }
 0x21c   :  { %3055 = vmatpush1.msra.mxu1 %v10791_v24  ;;  %2856 = vmatprep.subr.mxu0 %v10792_v12  ;;  %v10799_v24 = vld [vmem:[#allocation112_spill] sm:$0xff] }
 0x21d   :  { %3061 = vmatprep.subr.mxu1 %v10793_v42  ;;  %2858 = vmatpush1.msra.mxu0 %v10794_v4  ;;  %v10801_v42 = vld [vmem:[#allocation118_spill] sm:$0xff]  ;;  %v2935_v2 = vand.u32 4294901760, %v2934_v39 }
 0x21e   :  { %3067 = vmatpush1.msra.mxu1 %v10795_v6  ;;  %3333 = vmatprep.mubr.f32.mxu1 %v8133_v63  ;;  %v10803_v6 = vld [vmem:[#allocation122_spill] sm:$0xff] }
 0x21f   :  { %2860 = vmatprep.subr.mxu0 %v10796_v56  ;;  %3073 = vmatprep.subr.mxu1 %v10797_v21  ;;  %v10807_v21 = vld [vmem:[#allocation131_spill] sm:$0xff]  ;;  %v10814_v39 = vld [vmem:[#allocation126_spill] sm:$0xff] }
 0x220   :  { %2862 = vmatpush1.msra.mxu0 %v10798_v8  ;;  %3079 = vmatpush1.msra.mxu1 %v10799_v24  ;;  %v10809_v24 = vld [vmem:[#allocation134_spill] sm:$0xff] }
 0x221   :  { %2864 = vmatprep.subr.mxu0 %v10800_v50  ;;  %3085 = vmatprep.subr.mxu1 %v10801_v42  ;;  %v10811_v42 = vld [vmem:[#allocation137_spill] sm:$0xff]  ;;  %v10850_v63 = vld [vmem:[#allocation214_spill] sm:$0xff] }
 0x222   :  { %2866 = vmatpush1.msra.mxu0 %v10802_v44  ;;  %3091 = vmatpush1.msra.mxu1 %v10803_v6  ;;  %v10813_v6 = vld [vmem:[#allocation140_spill] sm:$0xff] }
 0x223   :  { %2868 = vmatprep.subr.mxu0 %v10804_v32  ;;  %3097 = vmatprep.subr.mxu1 %v10805_v46  ;;  %v10815_v46 = vld [vmem:[#allocation144_spill] sm:$0xff] }
 0x224   :  { %2870 = vmatpush2.msra.mxu0 %v10806_v29  ;;  %3103 = vmatpush1.msra.mxu1 %v10807_v21  ;;  %v10817_v21 = vld [vmem:[#allocation150_spill] sm:$0xff] }
 0x225   :  { %2872 = vmatprep.subr.mxu0 %v10808_v51  ;;  %3109 = vmatprep.subr.mxu1 %v10809_v24  ;;  %v10819_v24 = vld [vmem:[#allocation154_spill] sm:$0xff] }
 0x226   :  { %2874 = vmatpush2.msra.mxu0 %v10810_v5  ;;  %2936 = vmatprep.mubr.f32.mxu0 %v2935_v2  ;;  %v10821_v2 = vld [vmem:[#allocation160_spill] sm:$0xff] }
 0x227   :  { %3115 = vmatpush1.msra.mxu1 %v10811_v42  ;;  %2876 = vmatprep.subr.mxu0 %v10812_v58  ;;  %v10822_v42 = vld [vmem:[#allocation143_spill] sm:$0xff] }
 0x228   :  { %3121 = vmatprep.subr.mxu1 %v10813_v6  ;;  %2878 = vmatpush2.msra.mxu0 %v10814_v39  ;;  %v10824_v6 = vld [vmem:[#allocation146_spill] sm:$0xff] }
 0x229   :  { %3127 = vmatpush1.msra.mxu1 %v10815_v46  ;;  %2880 = vmatprep.subr.mxu0 %v10816_v41  ;;  %v10826_v46 = vld [vmem:[#allocation149_spill] sm:$0xff] }
 0x22a   :  { %3133 = vmatprep.subr.mxu1 %v10817_v21  ;;  %2882 = vmatpush2.msra.mxu0 %v10818_v7  ;;  %v10828_v21 = vld [vmem:[#allocation153_spill] sm:$0xff] }
 0x22b   :  { %3139 = vmatpush1.msra.mxu1 %v10819_v24  ;;  %2884 = vmatprep.subr.mxu0 %v10820_v14  ;;  %v10830_v24 = vld [vmem:[#allocation158_spill] sm:$0xff] }
 0x22c   :  { %3145 = vmatprep.subr.mxu1 %v10821_v2  ;;  %2886 = vmatpush2.msra.mxu0 %v10822_v42  ;;  %v8198_v2 = vand.u32 4294901760, %v8116_v16 }
 0x22d   :  { %3151 = vmatpush2.msra.mxu1 %v10823_v61  ;;  %2888 = vmatprep.subr.mxu0 %v10824_v6  ;;  %v10833_v61 = vld [vmem:[#allocation162_spill] sm:$0xff] }
 0x22e   :  { %3157 = vmatprep.subr.mxu1 %v10825_v38  ;;  %2890 = vmatpush2.msra.mxu0 %v10826_v46  ;;  %10832 = vst [vmem:[#allocation250_spill] sm:$0xff] %v8198_v2  ;;  %v10835_v38 = vld [vmem:[#allocation167_spill] sm:$0xff]  ;;  %v8212_v18 = vsub.f32 %v8116_v16, %v8198_v2 }
 0x22f   :  { %3163 = vmatpush2.msra.mxu1 %v10827_v37  ;;  %2892 = vmatprep.subr.mxu0 %v10828_v21  ;;  %v10837_v37 = vld [vmem:[#allocation171_spill] sm:$0xff] }
 0x230   :  { %3169 = vmatprep.subr.mxu1 %v10829_v57  ;;  %2894 = vmatpush2.msra.mxu0 %v10830_v24  ;;  %v10839_v57 = vld [vmem:[#allocation175_spill] sm:$0xff] }
 0x231   :  { %3175 = vmatpush2.msra.mxu1 %v10831_v35  ;;  %2896 = vmatprep.subr.mxu0 %v10833_v61  ;;  %v10841_v35 = vld [vmem:[#allocation178_spill] sm:$0xff]  ;;  %v10851_v16 = vld [vmem:[#allocation199_spill] sm:$0xff] }
 0x232   :  { %3181 = vmatprep.subr.mxu1 %v10834_v31  ;;  %2898 = vmatpush2.msra.mxu0 %v10835_v38  ;;  %v10843_v31 = vld [vmem:[#allocation181_spill] sm:$0xff] }
 0x233   :  { %3187 = vmatpush2.msra.mxu1 %v10836_v26  ;;  %2900 = vmatprep.subr.mxu0 %v10837_v37  ;;  %v10845_v26 = vld [vmem:[#allocation185_spill] sm:$0xff] }
 0x234   :  { %3193 = vmatprep.subr.mxu1 %v10838_v13  ;;  %2902 = vmatpush2.msra.mxu0 %v10839_v57  ;;  %v10847_v13 = vld [vmem:[#allocation190_spill] sm:$0xff]  ;;  %v10867_v57 = vld [vmem:[#allocation231_spill] sm:$0xff] }
 0x235   :  { %3199 = vmatpush2.msra.mxu1 %v10840_v48  ;;  %2904 = vmatprep.subr.mxu0 %v10841_v35  ;;  %v10849_v48 = vld [vmem:[#allocation194_spill] sm:$0xff] }
 0x236   :  { %3205 = vmatprep.subr.mxu1 %v10842_v59  ;;  %2906 = vmatpush2.msra.mxu0 %v10843_v31  ;;  %v9898_v59 = vand.u32 4294901760, %v8212_v18  ;;  %v10852_v35 = vld [vmem:[#allocation218_spill] sm:$0xff]  ;;  %v10853_v31 = vld [vmem:[#allocation203_spill] sm:$0xff] }
 0x237   :  { %3211 = vmatpush2.msra.mxu1 %v10844_v23  ;;  %2908 = vmatprep.subr.mxu0 %v10845_v26  ;;  %v10854_v23 = vld [vmem:[#allocation224_spill] sm:$0xff]  ;;  %v10855_v26 = vld [vmem:[#allocation207_spill] sm:$0xff] }
 0x238   :  { %3217 = vmatprep.subr.mxu1 %v10846_v1  ;;  %2910 = vmatpush2.msra.mxu0 %v10847_v13  ;;  %v10856_v1 = vld [vmem:[#allocation227_spill] sm:$0xff]  ;;  %v10857_v13 = vld [vmem:[#allocation210_spill] sm:$0xff] }
 0x239   :  { %3223 = vmatpush2.msra.mxu1 %v10848_v3  ;;  %2912 = vmatprep.subr.mxu0 %v10849_v48  ;;  %v10858_v3 = vld [vmem:[#allocation230_spill] sm:$0xff]  ;;  %v10859_v48 = vld [vmem:[#allocation213_spill] sm:$0xff] }
 0x23a   :  { %3229 = vmatprep.subr.mxu1 %v10850_v63  ;;  %2914 = vmatpush2.msra.mxu0 %v10851_v16  ;;  %v2940_v63 = vsub.f32 %v8212_v18, %v9898_v59  ;;  %v10860_v16 = vld [vmem:[#allocation233_spill] sm:$0xff] }
 0x23b   :  { %3235 = vmatpush2.msra.mxu1 %v10852_v35  ;;  %2916 = vmatprep.subr.mxu0 %v10853_v31  ;;  %v10861_v35 = vld [vmem:[#allocation217_spill] sm:$0xff]  ;;  %v10862_v31 = vld [vmem:[#allocation235_spill] sm:$0xff] }
 0x23c   :  { %3241 = vmatprep.subr.mxu1 %v10854_v23  ;;  %2918 = vmatpush2.msra.mxu0 %v10855_v26  ;;  %v10863_v23 = vld [vmem:[#allocation222_spill] sm:$0xff]  ;;  %v10864_v26 = vld [vmem:[#allocation239_spill] sm:$0xff]  ;;  %v10868_v59 = vld [vmem:[#allocation249_spill] sm:$0xff] }
 0x23d   :  { %3247 = vmatpush2.msra.mxu1 %v10856_v1  ;;  %2920 = vmatprep.subr.mxu0 %v10857_v13  ;;  %v10865_v1 = vld [vmem:[#allocation226_spill] sm:$0xff]  ;;  %v10866_v13 = vld [vmem:[#allocation245_spill] sm:$0xff] }
 0x23e   :  { %3253 = vmatprep.subr.mxu1 %v10858_v3  ;;  %2922 = vmatpush2.msra.mxu0 %v10859_v48  ;;  %v2941_v3 = vand.u32 4294901760, %v2940_v63  ;;  %v10869_v48 = vld [vmem:[#allocation255_spill] sm:$0xff]  ;;  %v10876_v63 = vld [vmem:[#allocation24_spill] sm:$0xff] }
 0x23f   :  { %3259 = vmatpush2.msra.mxu1 %v10860_v16  ;;  %2924 = vmatprep.subr.mxu0 %v10861_v35  ;;  %v10870_v16 = vld [vmem:[#allocation17_spill] sm:$0xff] }
 0x240   :  { %3265 = vmatprep.subr.mxu1 %v10862_v31  ;;  %2926 = vmatpush2.msra.mxu0 %v10863_v23  ;;  %v10871_v35 = vld [vmem:[#allocation257_spill] sm:$0xff]  ;;  %v10872_v31 = vld [vmem:[#allocation19_spill] sm:$0xff] }
 0x241   :  { %3271 = vmatpush2.msra.mxu1 %v10864_v26  ;;  %2928 = vmatprep.subr.mxu0 %v10865_v1  ;;  %v10873_v26 = vld [vmem:[#allocation260_spill] sm:$0xff]  ;;  %v10874_v1 = vld [vmem:[#allocation21_spill] sm:$0xff] }
 0x242   :  { %3277 = vmatprep.subr.mxu1 %v10866_v13  ;;  %2930 = vmatpush2.msra.mxu0 %v10867_v57  ;;  %v10875_v13 = vld [vmem:[#allocation264_spill] sm:$0xff]  ;;  %v10883_v57 = vld [vmem:[#allocation271_spill] sm:$0xff] }
 0x243   :  { %3283 = vmatpush2.msra.mxu1 %v10868_v59  ;;  %2942 = vmatmul.mubr.f32.vlgmr.msra.gmra.mxu0 %v2941_v3  ;;  %v10877_v59 = vld [vmem:[#allocation267_spill] sm:$0xff]  ;;  %v10878_v3 = vld [vmem:[#allocation28_spill] sm:$0xff] }
 0x244   :  { %3289 = vmatprep.subr.mxu1 %v10869_v48  ;;  %3343 = vmatprep.subr.mxu0 %v10870_v16  ;;  %v10879_v48 = vld [vmem:[#allocation269_spill] sm:$0xff]  ;;  %v10880_v16 = vld [vmem:[#allocation31_spill] sm:$0xff] }
 0x245   :  { %3295 = vmatpush2.msra.mxu1 %v10871_v35  ;;  %3346 = vmatpush1.msra.mxu0 %v10872_v31  ;;  %v10881_v35 = vld [vmem:[#allocation270_spill] sm:$0xff] }
 0x246   :  { %3535 = vmatprep.mubr.f32.mxu0 %v8140_v62  ;;  %3301 = vmatprep.subr.mxu1 %v10873_v26  ;;  %v10882_v31 = vld [vmem:[#allocation34_spill] sm:$0xff] }
 0x247   :  { %3349 = vmatprep.subr.mxu0 %v10874_v1  ;;  %3307 = vmatpush2.msra.mxu1 %v10875_v13  ;;  %v10884_v26 = vld [vmem:[#allocation42_spill] sm:$0xff]  ;;  %v10885_v1 = vld [vmem:[#allocation45_spill] sm:$0xff] }
 0x248   :  { %3352 = vmatpush1.msra.mxu0 %v10876_v63  ;;  %3313 = vmatprep.subr.mxu1 %v10877_v59  ;;  %v10886_v13 = vld [vmem:[#allocation49_spill] sm:$0xff]  ;;  %v10887_v63 = vand.u32 4294901760, %v8140_v62  ;;  %v10893_v62 = vld [vmem:[#allocation72_spill] sm:$0xff] }
 0x249   :  { %3355 = vmatprep.subr.mxu0 %v10878_v3  ;;  %3319 = vmatpush2.msra.mxu1 %v10879_v48  ;;  %v10888_v59 = vld [vmem:[#allocation53_spill] sm:$0xff]  ;;  %v10890_v3 = vld [vmem:[#allocation59_spill] sm:$0xff] }
 0x24a   :  { %3358 = vmatpush1.msra.mxu0 %v10880_v16  ;;  %3325 = vmatprep.subr.mxu1 %v10881_v35  ;;  %v10891_v48 = vld [vmem:[#allocation63_spill] sm:$0xff]  ;;  %v10892_v16 = vld [vmem:[#allocation69_spill] sm:$0xff]  ;;  %v10894_v35 = vld [vmem:[#allocation78_spill] sm:$0xff] }
 0x24b   :  { %3361 = vmatprep.subr.mxu0 %v10882_v31  ;;  %3331 = vmatpush2.msra.mxu1 %v10883_v57  ;;  %v10889_v57 = vld [vmem:[#allocation56_spill] sm:$0xff]  ;;  %v10895_v31 = vld [vmem:[#allocation81_spill] sm:$0xff] }
 0x24c   :  { %3364 = vmatpush1.msra.mxu0 %v10884_v26  ;;  %3335 = vmatmul.mubr.f32.vlgmr.msra.gmra.mxu1 %v8198_v2  ;;  %v10896_v26 = vld [vmem:[#allocation84_spill] sm:$0xff]  ;;  %v10950_v2 = vld [vmem:[#allocation22_spill] sm:$0xff] }
 0x24d   :  { %3367 = vmatprep.subr.mxu0 %v10885_v1  ;;  %3545 = vmatprep.subr.mxu1 %v10745_v55  ;;  %v10897_v1 = vld [vmem:[#allocation88_spill] sm:$0xff] }
 0x24e   :  { %3370 = vmatpush1.msra.mxu0 %v10886_v13  ;;  %3547 = vmatpush1.msra.mxu1 %v10746_v34  ;;  %v10898_v13 = vld [vmem:[#allocation92_spill] sm:$0xff] }
 0x24f   :  { %3675 = vmatprep.mubr.f32.mxu1 %v10887_v63  ;;  %3373 = vmatprep.subr.mxu0 %v10888_v59  ;;  %v10899_v63 = vld [vmem:[#allocation95_spill] sm:$0xff]  ;;  %v10900_v59 = vld [vmem:[#allocation101_spill] sm:$0xff] }
 0x250   :  { %3549 = vmatprep.subr.mxu1 %v10747_v19  ;;  %3376 = vmatpush1.msra.mxu0 %v10889_v57  ;;  %v10901_v57 = vld [vmem:[#allocation104_spill] sm:$0xff] }
 0x251   :  { %3551 = vmatpush1.msra.mxu1 %v10748_v28  ;;  %3379 = vmatprep.subr.mxu0 %v10890_v3  ;;  %v10902_v3 = vld [vmem:[#allocation110_spill] sm:$0xff] }
 0x252   :  { %3553 = vmatprep.subr.mxu1 %v10749_v15  ;;  %3382 = vmatpush1.msra.mxu0 %v10891_v48  ;;  %v10903_v48 = vld [vmem:[#allocation113_spill] sm:$0xff] }
 0x253   :  { %3555 = vmatpush1.msra.mxu1 %v10751_v17  ;;  %3385 = vmatprep.subr.mxu0 %v10892_v16  ;;  %v10904_v16 = vld [vmem:[#allocation116_spill] sm:$0xff] }
 0x254   :  { %3557 = vmatprep.subr.mxu1 %v10753_v22  ;;  %3388 = vmatpush1.msra.mxu0 %v10893_v62  ;;  %v10905_v62 = vld [vmem:[#allocation120_spill] sm:$0xff] }
 0x255   :  { %3559 = vmatpush1.msra.mxu1 %v10754_v25  ;;  %3391 = vmatprep.subr.mxu0 %v10894_v35  ;;  %v10906_v35 = vld [vmem:[#allocation124_spill] sm:$0xff] }
 0x256   :  { %3561 = vmatprep.subr.mxu1 %v10755_v20  ;;  %3394 = vmatpush1.msra.mxu0 %v10895_v31  ;;  %v10907_v31 = vld [vmem:[#allocation127_spill] sm:$0xff] }
 0x257   :  { %3563 = vmatpush1.msra.mxu1 %v10757_v10  ;;  %3397 = vmatprep.subr.mxu0 %v10896_v26  ;;  %v10908_v26 = vld [vmem:[#allocation133_spill] sm:$0xff] }
 0x258   :  { %3565 = vmatprep.subr.mxu1 %v10759_v11  ;;  %3400 = vmatpush1.msra.mxu0 %v10897_v1  ;;  %v10909_v1 = vld [vmem:[#allocation136_spill] sm:$0xff] }
 0x259   :  { %3567 = vmatpush1.msra.mxu1 %v10761_v54  ;;  %3403 = vmatprep.subr.mxu0 %v10898_v13  ;;  %v10910_v13 = vld [vmem:[#allocation142_spill] sm:$0xff] }
 0x25a   :  { %3569 = vmatprep.subr.mxu1 %v10763_v60  ;;  %3406 = vmatpush1.msra.mxu0 %v10899_v63  ;;  %v10911_v63 = vld [vmem:[#allocation145_spill] sm:$0xff] }
 0x25b   :  { %3571 = vmatpush1.msra.mxu1 %v10765_v9  ;;  %3409 = vmatprep.subr.mxu0 %v10900_v59  ;;  %v10912_v59 = vld [vmem:[#allocation148_spill] sm:$0xff] }
 0x25c   :  { %3573 = vmatprep.subr.mxu1 %v10767_v30  ;;  %3412 = vmatpush1.msra.mxu0 %v10901_v57  ;;  %v10913_v57 = vld [vmem:[#allocation152_spill] sm:$0xff] }
 0x25d   :  { %3575 = vmatpush1.msra.mxu1 %v10769_v40  ;;  %3415 = vmatprep.subr.mxu0 %v10902_v3  ;;  %v10914_v3 = vld [vmem:[#allocation156_spill] sm:$0xff] }
 0x25e   :  { %3577 = vmatprep.subr.mxu1 %v10771_v43  ;;  %3418 = vmatpush1.msra.mxu0 %v10903_v48  ;;  %v10915_v48 = vld [vmem:[#allocation159_spill] sm:$0xff] }
 0x25f   :  { %3579 = vmatpush1.msra.mxu1 %v10773_v33  ;;  %3421 = vmatprep.subr.mxu0 %v10904_v16  ;;  %v10916_v16 = vld [vmem:[#allocation165_spill] sm:$0xff] }
 0x260   :  { %3581 = vmatprep.subr.mxu1 %v10775_v49  ;;  %3424 = vmatpush1.msra.mxu0 %v10905_v62  ;;  %v10917_v62 = vld [vmem:[#allocation168_spill] sm:$0xff] }
 0x261   :  { %3583 = vmatpush1.msra.mxu1 %v10778_v45  ;;  %3427 = vmatprep.subr.mxu0 %v10906_v35  ;;  %v10918_v35 = vld [vmem:[#allocation174_spill] sm:$0xff] }
 0x262   :  { %3585 = vmatprep.subr.mxu1 %v10780_v47  ;;  %3430 = vmatpush1.msra.mxu0 %v10907_v31  ;;  %v10919_v31 = vld [vmem:[#allocation177_spill] sm:$0xff] }
 0x263   :  { %3587 = vmatpush1.msra.mxu1 %v10782_v53  ;;  %3433 = vmatprep.subr.mxu0 %v10908_v26  ;;  %v10920_v26 = vld [vmem:[#allocation180_spill] sm:$0xff] }
 0x264   :  { %3589 = vmatprep.subr.mxu1 %v10784_v0  ;;  %3436 = vmatpush1.msra.mxu0 %v10909_v1  ;;  %v10921_v1 = vld [vmem:[#allocation184_spill] sm:$0xff] }
 0x265   :  { %3591 = vmatpush1.msra.mxu1 %v10786_v52  ;;  %3439 = vmatprep.subr.mxu0 %v10910_v13  ;;  %v10922_v13 = vld [vmem:[#allocation188_spill] sm:$0xff] }
 0x266   :  { %3593 = vmatprep.subr.mxu1 %v10788_v36  ;;  %3442 = vmatpush2.msra.mxu0 %v10911_v63  ;;  %v10923_v63 = vld [vmem:[#allocation191_spill] sm:$0xff] }
 0x267   :  { %3595 = vmatpush1.msra.mxu1 %v10790_v27  ;;  %3445 = vmatprep.subr.mxu0 %v10912_v59  ;;  %v10924_v59 = vld [vmem:[#allocation197_spill] sm:$0xff] }
 0x268   :  { %3597 = vmatprep.subr.mxu1 %v10792_v12  ;;  %3448 = vmatpush2.msra.mxu0 %v10913_v57  ;;  %v10925_v57 = vld [vmem:[#allocation200_spill] sm:$0xff] }
 0x269   :  { %3599 = vmatpush1.msra.mxu1 %v10794_v4  ;;  %3451 = vmatprep.subr.mxu0 %v10914_v3  ;;  %v10926_v3 = vld [vmem:[#allocation206_spill] sm:$0xff] }
 0x26a   :  { %3601 = vmatprep.subr.mxu1 %v10796_v56  ;;  %3454 = vmatpush2.msra.mxu0 %v10915_v48  ;;  %v10927_v48 = vld [vmem:[#allocation209_spill] sm:$0xff] }
 0x26b   :  { %3603 = vmatpush1.msra.mxu1 %v10798_v8  ;;  %3457 = vmatprep.subr.mxu0 %v10916_v16  ;;  %v10928_v16 = vld [vmem:[#allocation212_spill] sm:$0xff] }
 0x26c   :  { %3605 = vmatprep.subr.mxu1 %v10800_v50  ;;  %3460 = vmatpush2.msra.mxu0 %v10917_v62  ;;  %v10929_v62 = vld [vmem:[#allocation216_spill] sm:$0xff] }
 0x26d   :  { %3607 = vmatpush1.msra.mxu1 %v10802_v44  ;;  %3463 = vmatprep.subr.mxu0 %v10918_v35  ;;  %v10930_v35 = vld [vmem:[#allocation220_spill] sm:$0xff] }
 0x26e   :  { %3609 = vmatprep.subr.mxu1 %v10804_v32  ;;  %3466 = vmatpush2.msra.mxu0 %v10919_v31  ;;  %v10931_v31 = vld [vmem:[#allocation223_spill] sm:$0xff] }
 0x26f   :  { %3611 = vmatpush2.msra.mxu1 %v10806_v29  ;;  %3469 = vmatprep.subr.mxu0 %v10920_v26  ;;  %v10932_v26 = vld [vmem:[#allocation229_spill] sm:$0xff] }
 0x270   :  { %3613 = vmatprep.subr.mxu1 %v10808_v51  ;;  %3472 = vmatpush2.msra.mxu0 %v10921_v1  ;;  %v10933_v1 = vld [vmem:[#allocation232_spill] sm:$0xff] }
 0x271   :  { %3615 = vmatpush2.msra.mxu1 %v10810_v5  ;;  %3475 = vmatprep.subr.mxu0 %v10922_v13  ;;  %v10934_v13 = vld [vmem:[#allocation238_spill] sm:$0xff] }
 0x272   :  { %3617 = vmatprep.subr.mxu1 %v10812_v58  ;;  %3478 = vmatpush2.msra.mxu0 %v10923_v63  ;;  %v10935_v63 = vld [vmem:[#allocation241_spill] sm:$0xff] }
 0x273   :  { %3619 = vmatpush2.msra.mxu1 %v10814_v39  ;;  %3481 = vmatprep.subr.mxu0 %v10924_v59  ;;  %v10936_v59 = vld [vmem:[#allocation175_spill] sm:$0xff] }
 0x274   :  { %3621 = vmatprep.subr.mxu1 %v10816_v41  ;;  %3484 = vmatpush2.msra.mxu0 %v10925_v57  ;;  %v10937_v57 = vld [vmem:[#allocation244_spill] sm:$0xff] }
 0x275   :  { %3623 = vmatpush2.msra.mxu1 %v10818_v7  ;;  %3487 = vmatprep.subr.mxu0 %v10926_v3  ;;  %v10938_v3 = vld [vmem:[#allocation178_spill] sm:$0xff] }
 0x276   :  { %3625 = vmatprep.subr.mxu1 %v10820_v14  ;;  %3490 = vmatpush2.msra.mxu0 %v10927_v48  ;;  %v10939_v48 = vld [vmem:[#allocation248_spill] sm:$0xff] }
 0x277   :  { %3627 = vmatpush2.msra.mxu1 %v10822_v42  ;;  %3493 = vmatprep.subr.mxu0 %v10928_v16  ;;  %v10940_v16 = vld [vmem:[#allocation181_spill] sm:$0xff] }
 0x278   :  { %3629 = vmatprep.subr.mxu1 %v10824_v6  ;;  %3496 = vmatpush2.msra.mxu0 %v10929_v62  ;;  %v10941_v62 = vld [vmem:[#allocation254_spill] sm:$0xff] }
 0x279   :  { %3631 = vmatpush2.msra.mxu1 %v10826_v46  ;;  %3499 = vmatprep.subr.mxu0 %v10930_v35  ;;  %v10942_v35 = vld [vmem:[#allocation185_spill] sm:$0xff] }
 0x27a   :  { %3633 = vmatprep.subr.mxu1 %v10828_v21  ;;  %3502 = vmatpush2.msra.mxu0 %v10931_v31  ;;  %v10943_v31 = vld [vmem:[#allocation256_spill] sm:$0xff] }
 0x27b   :  { %3635 = vmatpush2.msra.mxu1 %v10830_v24  ;;  %3505 = vmatprep.subr.mxu0 %v10932_v26  ;;  %v10944_v26 = vld [vmem:[#allocation190_spill] sm:$0xff] }
 0x27c   :  { %3637 = vmatprep.subr.mxu1 %v10833_v61  ;;  %3508 = vmatpush2.msra.mxu0 %v10933_v1  ;;  %v10945_v1 = vld [vmem:[#allocation262_spill] sm:$0xff] }
 0x27d   :  { %3639 = vmatpush2.msra.mxu1 %v10835_v38  ;;  %3511 = vmatprep.subr.mxu0 %v10934_v13  ;;  %v10946_v13 = vld [vmem:[#allocation194_spill] sm:$0xff] }
 0x27e   :  { %3641 = vmatprep.subr.mxu1 %v10837_v37  ;;  %3514 = vmatpush2.msra.mxu0 %v10935_v63  ;;  %v10947_v63 = vld [vmem:[#allocation265_spill] sm:$0xff] }
 0x27f   :  { %3643 = vmatpush2.msra.mxu1 %v10936_v59  ;;  %3517 = vmatprep.subr.mxu0 %v10937_v57  ;;  %v10948_v57 = vld [vmem:[#allocation199_spill] sm:$0xff] }
 0x280   :  { %3645 = vmatprep.subr.mxu1 %v10938_v3  ;;  %3520 = vmatpush2.msra.mxu0 %v10939_v48  ;;  %v10949_v48 = vld [vmem:[#allocation203_spill] sm:$0xff] }
 0x281   :  { %3647 = vmatpush2.msra.mxu1 %v10940_v16  ;;  %3523 = vmatprep.subr.mxu0 %v10941_v62  ;;  %v10951_v62 = vld [vmem:[#allocation207_spill] sm:$0xff]  ;;  %v10959_v16 = vld [vmem:[#allocation33_spill] sm:$0xff] }
 0x282   :  { %3649 = vmatprep.subr.mxu1 %v10942_v35  ;;  %3526 = vmatpush2.msra.mxu0 %v10943_v31  ;;  %v10952_v35 = vld [vmem:[#allocation26_spill] sm:$0xff]  ;;  %v10953_v31 = vld [vmem:[#allocation252_spill] sm:$0xff] }
 0x283   :  { %3651 = vmatpush2.msra.mxu1 %v10944_v26  ;;  %3529 = vmatprep.subr.mxu0 %v10945_v1  ;;  %v10954_v26 = vld [vmem:[#allocation210_spill] sm:$0xff]  ;;  %v10955_v1 = vld [vmem:[#allocation27_spill] sm:$0xff] }
 0x284   :  { %3653 = vmatprep.subr.mxu1 %v10946_v13  ;;  %3532 = vmatpush2.msra.mxu0 %v10947_v63  ;;  %v10956_v13 = vld [vmem:[#allocation213_spill] sm:$0xff]  ;;  %v10957_v63 = vld [vmem:[#allocation30_spill] sm:$0xff] }
 0x285   :  { %3655 = vmatpush2.msra.mxu1 %v10948_v57  ;;  %3538 = vmatmul.mubr.f32.vlgmr.msra.gmra.mxu0 %v8212_v18  ;;  %v10958_v57 = vld [vmem:[#allocation217_spill] sm:$0xff] }
 0x286   :  { %3657 = vmatprep.subr.mxu1 %v10949_v48  ;;  %3688 = vmatprep.subr.mxu0 %v10950_v2  ;;  %v10960_v2 = vld [vmem:[#allocation36_spill] sm:$0xff]  ;;  %v10963_v48 = vld [vmem:[#allocation231_spill] sm:$0xff] }
 0x287   :  { %3659 = vmatpush2.msra.mxu1 %v10951_v62  ;;  %3692 = vmatpush1.msra.mxu0 %v10952_v35  ;;  %v10961_v62 = vld [vmem:[#allocation226_spill] sm:$0xff]  ;;  %v10962_v35 = vld [vmem:[#allocation40_spill] sm:$0xff] }
 0x288   :  { %3942 = vmatprep.mubr.f32.mxu0 %v10953_v31  ;;  %3661 = vmatprep.subr.mxu1 %v10954_v26  ;;  %v10964_v26 = vld [vmem:[#allocation48_spill] sm:$0xff] }
 0x289   :  { %3696 = vmatprep.subr.mxu0 %v10955_v1  ;;  %3663 = vmatpush2.msra.mxu1 %v10956_v13  ;;  %v10965_v1 = vand.u32 4294901760, %v8212_v18  ;;  %v10970_v18 = vld [vmem:[#allocation65_spill] sm:$0xff] }
 0x28a   :  { %3700 = vmatpush1.msra.mxu0 %v10957_v63  ;;  %3665 = vmatprep.subr.mxu1 %v10958_v57  ;;  %v10966_v63 = vld [vmem:[#allocation52_spill] sm:$0xff] }
 0x28b   :  { %3704 = vmatprep.subr.mxu0 %v10959_v16  ;;  %3667 = vmatpush2.msra.mxu1 %v10863_v23  ;;  %v10967_v16 = vld [vmem:[#allocation55_spill] sm:$0xff] }
 0x28c   :  { %3708 = vmatpush1.msra.mxu0 %v10960_v2  ;;  %3669 = vmatprep.subr.mxu1 %v10961_v62  ;;  %v10968_v2 = vld [vmem:[#allocation58_spill] sm:$0xff] }
 0x28d   :  { %3712 = vmatprep.subr.mxu0 %v10962_v35  ;;  %3671 = vmatpush2.msra.mxu1 %v10963_v48  ;;  %v10969_v35 = vld [vmem:[#allocation62_spill] sm:$0xff] }
 0x28e   :  { %3716 = vmatpush1.msra.mxu0 %v10964_v26  ;;  %3679 = vmatmul.mubr.f32.vlgmr.msra.gmra.mxu1 %v10965_v1  ;;  %v10971_v26 = vld [vmem:[#allocation68_spill] sm:$0xff]  ;;  %v2010_v1 = vpop.f32.mrf.mxu1 }
 0x28f   :  { %3720 = vmatprep.subr.mxu0 %v10966_v63  ;;  %3951 = vmatprep.subr.mxu1 %v10745_v55  ;;  %v10972_v55 = vld [vmem:[#allocation74_spill] sm:$0xff]  ;;  %v11011_v63 = vld [vmem:[#allocation228_spill] sm:$0xff] }
 0x290   :  { %3724 = vmatpush1.msra.mxu0 %v10967_v16  ;;  %3953 = vmatpush1.msra.mxu1 %v10746_v34  ;;  %v10973_v34 = vld [vmem:[#allocation77_spill] sm:$0xff]  ;;  %v11014_v16 = vld [vmem:[#allocation242_spill] sm:$0xff] }
 0x291   :  { %4079 = vmatprep.mubr.f32.mxu1 %v10953_v31  ;;  %3728 = vmatprep.subr.mxu0 %v10968_v2  ;;  %v11006_v31 = vld [vmem:[#allocation211_spill] sm:$0xff] }
 0x292   :  { %3955 = vmatprep.subr.mxu1 %v10747_v19  ;;  %3732 = vmatpush1.msra.mxu0 %v10969_v35  ;;  %v10974_v19 = vld [vmem:[#allocation83_spill] sm:$0xff] }
 0x293   :  { %3957 = vmatpush1.msra.mxu1 %v10748_v28  ;;  %3736 = vmatprep.subr.mxu0 %v10970_v18  ;;  %v10975_v28 = vld [vmem:[#allocation87_spill] sm:$0xff]  ;;  %v11017_v18 = vld [vmem:[#allocation253_spill] sm:$0xff] }
 0x294   :  { %3959 = vmatprep.subr.mxu1 %v10749_v15  ;;  %3740 = vmatpush1.msra.mxu0 %v10971_v26  ;;  %v10976_v15 = vld [vmem:[#allocation91_spill] sm:$0xff]  ;;  %v11018_v26 = vld [vmem:[#allocation181_spill] sm:$0xff] }
 0x295   :  { %3961 = vmatpush1.msra.mxu1 %v10751_v17  ;;  %3744 = vmatprep.subr.mxu0 %v10972_v55  ;;  %v10977_v17 = vld [vmem:[#allocation93_spill] sm:$0xff]  ;;  %v11015_v2 = vld [vmem:[#allocation247_spill] sm:$0xff] }
 0x296   :  { %3963 = vmatprep.subr.mxu1 %v10753_v22  ;;  %3748 = vmatpush1.msra.mxu0 %v10973_v34  ;;  %v10978_v22 = vld [vmem:[#allocation97_spill] sm:$0xff]  ;;  %v11016_v35 = vld [vmem:[#allocation251_spill] sm:$0xff] }
 0x297   :  { %3965 = vmatpush1.msra.mxu1 %v10754_v25  ;;  %3752 = vmatprep.subr.mxu0 %v10974_v19  ;;  %v10979_v25 = vld [vmem:[#allocation100_spill] sm:$0xff]  ;;  %v11020_v55 = vld [vmem:[#allocation185_spill] sm:$0xff] }
 0x298   :  { %3967 = vmatprep.subr.mxu1 %v10755_v20  ;;  %3756 = vmatpush1.msra.mxu0 %v10975_v28  ;;  %v10980_v20 = vld [vmem:[#allocation106_spill] sm:$0xff]  ;;  %v11021_v28 = vld [vmem:[#allocation261_spill] sm:$0xff] }
 0x299   :  { %3969 = vmatpush1.msra.mxu1 %v10757_v10  ;;  %3760 = vmatprep.subr.mxu0 %v10976_v15  ;;  %v10981_v10 = vld [vmem:[#allocation109_spill] sm:$0xff] }
 0x29a   :  { %3971 = vmatprep.subr.mxu1 %v10759_v11  ;;  %3764 = vmatpush1.msra.mxu0 %v10977_v17  ;;  %v10982_v11 = vld [vmem:[#allocation115_spill] sm:$0xff]  ;;  %v11023_v17 = vld [vmem:[#allocation266_spill] sm:$0xff] }
 0x29b   :  { %3973 = vmatpush1.msra.mxu1 %v10761_v54  ;;  %3768 = vmatprep.subr.mxu0 %v10978_v22  ;;  %v10983_v54 = vld [vmem:[#allocation119_spill] sm:$0xff] }
 0x29c   :  { %3975 = vmatprep.subr.mxu1 %v10763_v60  ;;  %3772 = vmatpush1.msra.mxu0 %v10979_v25  ;;  %v10984_v60 = vld [vmem:[#allocation123_spill] sm:$0xff] }
 0x29d   :  { %3977 = vmatpush1.msra.mxu1 %v10765_v9  ;;  %3776 = vmatprep.subr.mxu0 %v10980_v20  ;;  %v10985_v9 = vld [vmem:[#allocation125_spill] sm:$0xff]  ;;  %v11025_v20 = vld [vmem:[#allocation268_spill] sm:$0xff] }
 0x29e   :  { %3979 = vmatprep.subr.mxu1 %v10767_v30  ;;  %3780 = vmatpush1.msra.mxu0 %v10981_v10  ;;  %v10986_v30 = vld [vmem:[#allocation129_spill] sm:$0xff]  ;;  %v11026_v10 = vld [vmem:[#allocation199_spill] sm:$0xff] }
 0x29f   :  { %3981 = vmatpush1.msra.mxu1 %v10769_v40  ;;  %3784 = vmatprep.subr.mxu0 %v10982_v11  ;;  %v10987_v40 = vld [vmem:[#allocation132_spill] sm:$0xff]  ;;  %v11027_v11 = vld [vmem:[#allocation250_spill] sm:$0xff] }
 0x2a0   :  { %3983 = vmatprep.subr.mxu1 %v10771_v43  ;;  %3788 = vmatpush1.msra.mxu0 %v10983_v54  ;;  %v10988_v43 = vld [vmem:[#allocation138_spill] sm:$0xff]  ;;  %v11028_v54 = vld [vmem:[#allocation203_spill] sm:$0xff] }
 0x2a1   :  { %3985 = vmatpush1.msra.mxu1 %v10773_v33  ;;  %3792 = vmatprep.subr.mxu0 %v10984_v60  ;;  %v10989_v33 = vld [vmem:[#allocation141_spill] sm:$0xff] }
 0x2a2   :  { %3987 = vmatprep.subr.mxu1 %v10775_v49  ;;  %3796 = vmatpush1.msra.mxu0 %v10985_v9  ;;  %v10990_v49 = vld [vmem:[#allocation147_spill] sm:$0xff] }
 0x2a3   :  { %3989 = vmatpush1.msra.mxu1 %v10778_v45  ;;  %3800 = vmatprep.subr.mxu0 %v10986_v30  ;;  %v10991_v45 = vld [vmem:[#allocation151_spill] sm:$0xff] }
 0x2a4   :  { %3991 = vmatprep.subr.mxu1 %v10780_v47  ;;  %3804 = vmatpush1.msra.mxu0 %v10987_v40  ;;  %v10992_v47 = vld [vmem:[#allocation155_spill] sm:$0xff]  ;;  %v11029_v40 = vld [vmem:[#allocation272_spill] sm:$0xff] }
 0x2a5   :  { %3993 = vmatpush1.msra.mxu1 %v10782_v53  ;;  %3808 = vmatprep.subr.mxu0 %v10988_v43  ;;  %v10993_v53 = vld [vmem:[#allocation157_spill] sm:$0xff]  ;;  %v11030_v43 = vld [vmem:[#allocation207_spill] sm:$0xff] }
 0x2a6   :  { %3995 = vmatprep.subr.mxu1 %v10784_v0  ;;  %3812 = vmatpush1.msra.mxu0 %v10989_v33  ;;  %v10994_v0 = vld [vmem:[#allocation161_spill] sm:$0xff] }
 0x2a7   :  { %3997 = vmatpush1.msra.mxu1 %v10786_v52  ;;  %3816 = vmatprep.subr.mxu0 %v10990_v49  ;;  %v10995_v52 = vld [vmem:[#allocation164_spill] sm:$0xff]  ;;  %v11031_v33 = vld [vmem:[#allocation273_spill] sm:$0xff]  ;;  %v11032_v49 = vld [vmem:[#allocation210_spill] sm:$0xff] }
 0x2a8   :  { %3999 = vmatprep.subr.mxu1 %v10788_v36  ;;  %3820 = vmatpush2.msra.mxu0 %v10991_v45  ;;  %v10996_v36 = vld [vmem:[#allocation170_spill] sm:$0xff] }
 0x2a9   :  { %4001 = vmatpush1.msra.mxu1 %v10790_v27  ;;  %3824 = vmatprep.subr.mxu0 %v10992_v47  ;;  %v10997_v27 = vld [vmem:[#allocation173_spill] sm:$0xff] }
 0x2aa   :  { %4003 = vmatprep.subr.mxu1 %v10792_v12  ;;  %3828 = vmatpush2.msra.mxu0 %v10993_v53  ;;  %v10998_v12 = vld [vmem:[#allocation179_spill] sm:$0xff]  ;;  %v11033_v53 = vld [vmem:[#allocation274_spill] sm:$0xff] }
 0x2ab   :  { %4005 = vmatpush1.msra.mxu1 %v10794_v4  ;;  %3832 = vmatprep.subr.mxu0 %v10994_v0  ;;  %v10999_v4 = vld [vmem:[#allocation183_spill] sm:$0xff] }
 0x2ac   :  { %4007 = vmatprep.subr.mxu1 %v10796_v56  ;;  %3836 = vmatpush2.msra.mxu0 %v10995_v52  ;;  %v11000_v56 = vld [vmem:[#allocation187_spill] sm:$0xff]  ;;  %v11034_v52 = vld [vmem:[#allocation276_spill] sm:$0xff] }
 0x2ad   :  { %4009 = vmatpush1.msra.mxu1 %v10798_v8  ;;  %3840 = vmatprep.subr.mxu0 %v10996_v36  ;;  %v11001_v8 = vld [vmem:[#allocation189_spill] sm:$0xff] }
 0x2ae   :  { %4011 = vmatprep.subr.mxu1 %v10800_v50  ;;  %3844 = vmatpush2.msra.mxu0 %v10997_v27  ;;  %v11002_v50 = vld [vmem:[#allocation193_spill] sm:$0xff] }
 0x2af   :  { %4013 = vmatpush1.msra.mxu1 %v10802_v44  ;;  %3848 = vmatprep.subr.mxu0 %v10998_v12  ;;  %v11003_v44 = vld [vmem:[#allocation196_spill] sm:$0xff]  ;;  %v11035_v27 = vld [vmem:[#allocation277_spill] sm:$0xff] }
 0x2b0   :  { %4015 = vmatprep.subr.mxu1 %v10804_v32  ;;  %3852 = vmatpush2.msra.mxu0 %v10999_v4  ;;  %v11004_v32 = vld [vmem:[#allocation202_spill] sm:$0xff] }
 0x2b1   :  { %4017 = vmatpush2.msra.mxu1 %v10806_v29  ;;  %3856 = vmatprep.subr.mxu0 %v11000_v56  ;;  %v11005_v29 = vld [vmem:[#allocation205_spill] sm:$0xff]  ;;  %v11036_v4 = vld [vmem:[#allocation278_spill] sm:$0xff] }
 0x2b2   :  { %4019 = vmatprep.subr.mxu1 %v10808_v51  ;;  %3860 = vmatpush2.msra.mxu0 %v11001_v8  ;;  %v1617_v51 = vpop.f32.mrf.mxu0  ;;  %v11037_v56 = vld [vmem:[#allocation281_spill] sm:$0xff] }
 0x2b3   :  { %4021 = vmatpush2.msra.mxu1 %v10810_v5  ;;  %3864 = vmatprep.subr.mxu0 %v11002_v50  ;;  %v11007_v5 = vld [vmem:[#allocation215_spill] sm:$0xff] }
 0x2b4   :  { %4023 = vmatprep.subr.mxu1 %v10812_v58  ;;  %3868 = vmatpush2.msra.mxu0 %v11003_v44  ;;  %v11008_v58 = vld [vmem:[#allocation219_spill] sm:$0xff]  ;;  %v11040_v44 = vld [vmem:[#allocation300_spill] sm:$0xff] }
 0x2b5   :  { %4025 = vmatpush2.msra.mxu1 %v10814_v39  ;;  %3872 = vmatprep.subr.mxu0 %v11004_v32  ;;  %v11009_v39 = vld [vmem:[#allocation221_spill] sm:$0xff]  ;;  %v11038_v50 = vld [vmem:[#allocation283_spill] sm:$0xff] }
 0x2b6   :  { %4027 = vmatprep.subr.mxu1 %v10816_v41  ;;  %3876 = vmatpush2.msra.mxu0 %v11005_v29  ;;  %v1619_v41 = vpop.f32.mrf.mxu0  ;;  %v11042_v29 = vld [vmem:[#allocation307_spill] sm:$0xff] }
 0x2b7   :  { %4029 = vmatpush2.msra.mxu1 %v10818_v7  ;;  %3880 = vmatprep.subr.mxu0 %v11006_v31  ;;  %v11010_v7 = vld [vmem:[#allocation225_spill] sm:$0xff]  ;;  %v11044_v31 = vld [vmem:[#allocation243_spill] sm:$0xff] }
 0x2b8   :  { %4031 = vmatprep.subr.mxu1 %v10820_v14  ;;  %3884 = vmatpush2.msra.mxu0 %v11007_v5  ;;  %v2213_v14 = vpop.f32.mrf.mxu0 }
 0x2b9   :  { %4033 = vmatpush2.msra.mxu1 %v10822_v42  ;;  %3888 = vmatprep.subr.mxu0 %v11008_v58  ;;  %v11012_v42 = vld [vmem:[#allocation234_spill] sm:$0xff]  ;;  %v11045_v58 = vld [vmem:[#allocation292_spill] sm:$0xff] }
 0x2ba   :  { %4035 = vmatprep.subr.mxu1 %v10824_v6  ;;  %3892 = vmatpush2.msra.mxu0 %v11009_v39  ;;  %v11013_v6 = vld [vmem:[#allocation236_spill] sm:$0xff]  ;;  %v11046_v39 = vld [vmem:[#allocation309_spill] sm:$0xff] }
 0x2bb   :  { %4037 = vmatpush2.msra.mxu1 %v10826_v46  ;;  %3896 = vmatprep.subr.mxu0 %v11010_v7  ;;  %v2012_v46 = vpop.f32.mrf.mxu1 }
 0x2bc   :  { %4039 = vmatprep.subr.mxu1 %v10828_v21  ;;  %3900 = vmatpush2.msra.mxu0 %v11011_v63  ;;  %v2215_v21 = vpop.f32.mrf.mxu0  ;;  %v2013_v34 = vadd.f32 %v2012_v46, %v1619_v41  ;;  %v11047_v41 = vld [vmem:[#allocation297_spill] sm:$0xff]  ;;  %v11053_v46 = vld [vmem:[#allocation320_spill] sm:$0xff] }
 0x2bd   :  { %4041 = vmatpush2.msra.mxu1 %v10830_v24  ;;  %3904 = vmatprep.subr.mxu0 %v11012_v42  ;;  %v2354_v24 = vpop.f32.mrf.mxu1  ;;  %v11051_v42 = vld [vmem:[#allocation319_spill] sm:$0xff] }
 0x2be   :  { %4043 = vmatprep.subr.mxu1 %v10833_v61  ;;  %3908 = vmatpush2.msra.mxu0 %v11013_v6  ;;  %v2011_v61 = vadd.f32 %v2010_v1, %v1617_v51  ;;  %v2216_v22 = vadd.f32 %v2215_v21, %v2013_v34  ;;  %v11048_v1 = vld [vmem:[#allocation316_spill] sm:$0xff]  ;;  %v11052_v6 = vld [vmem:[#allocation301_spill] sm:$0xff]  ;;  %v11055_v21 = vld [vmem:[#allocation326_spill] sm:$0xff] }
 0x2bf   :  { %4045 = vmatpush2.msra.mxu1 %v10835_v38  ;;  %3912 = vmatprep.subr.mxu0 %v11014_v16  ;;  %v11019_v38 = vld [vmem:[#allocation258_spill] sm:$0xff]  ;;  %v2356_v15 = vpop.f32.mrf.mxu1  ;;  %v11063_v34 = vld [vmem:[#allocation341_spill] sm:$0xff] }
 0x2c0   :  { %4047 = vmatprep.subr.mxu1 %v10837_v37  ;;  %3916 = vmatpush2.msra.mxu0 %v11015_v2  ;;  %v2214_v19 = vadd.f32 %v2213_v14, %v2011_v61  ;;  %v2357_v9 = vadd.f32 %v2356_v15, %v2216_v22  ;;  %v11050_v14 = vld [vmem:[#allocation298_spill] sm:$0xff]  ;;  %v11054_v2 = vld [vmem:[#allocation304_spill] sm:$0xff]  ;;  %v11069_v22 = vld [vmem:[#allocation333_spill] sm:$0xff] }
 0x2c1   :  { %4049 = vmatpush2.msra.mxu1 %v10936_v59  ;;  %3920 = vmatprep.subr.mxu0 %v11016_v35  ;;  %v2619_v37 = vpop.f32.mrf.mxu0  ;;  %v11022_v59 = vld [vmem:[#allocation190_spill] sm:$0xff]  ;;  %v11057_v35 = vld [vmem:[#allocation329_spill] sm:$0xff]  ;;  %v11066_v15 = vld [vmem:[#allocation332_spill] sm:$0xff] }
 0x2c2   :  { %4051 = vmatprep.subr.mxu1 %v10938_v3  ;;  %3924 = vmatpush2.msra.mxu0 %v11017_v18  ;;  %v11024_v3 = vld [vmem:[#allocation194_spill] sm:$0xff]  ;;  %v2355_v25 = vadd.f32 %v2354_v24, %v2214_v19  ;;  %v11056_v24 = vld [vmem:[#allocation308_spill] sm:$0xff]  ;;  %v11058_v18 = vld [vmem:[#allocation313_spill] sm:$0xff] }
 0x2c3   :  { %4053 = vmatpush2.msra.mxu1 %v11018_v26  ;;  %3928 = vmatprep.subr.mxu0 %v11019_v38  ;;  %v2621_v60 = vpop.f32.mrf.mxu0  ;;  %v11059_v26 = vld [vmem:[#allocation336_spill] sm:$0xff]  ;;  %v11060_v38 = vld [vmem:[#allocation321_spill] sm:$0xff] }
 0x2c4   :  { %4055 = vmatprep.subr.mxu1 %v11020_v55  ;;  %3932 = vmatpush2.msra.mxu0 %v11021_v28  ;;  %v2620_v30 = vadd.f32 %v2619_v37, %v2355_v25  ;;  %v2622_v47 = vadd.f32 %v2621_v60, %v2357_v9  ;;  %v11061_v55 = vld [vmem:[#allocation338_spill] sm:$0xff]  ;;  %v11062_v37 = vld [vmem:[#allocation323_spill] sm:$0xff]  ;;  %v11075_v9 = vld [vmem:[#allocation349_spill] sm:$0xff] }
 0x2c5   :  { %4057 = vmatpush2.msra.mxu1 %v11022_v59  ;;  %3936 = vmatprep.subr.mxu0 %v11023_v17  ;;  %v11064_v28 = vld [vmem:[#allocation330_spill] sm:$0xff]  ;;  %v11065_v59 = vld [vmem:[#allocation347_spill] sm:$0xff]  ;;  %v11067_v17 = vld [vmem:[#allocation348_spill] sm:$0xff] }
 0x2c6   :  { %4059 = vmatprep.subr.mxu1 %v11024_v3  ;;  %3940 = vmatpush2.msra.mxu0 %v11025_v20  ;;  %v11070_v25 = vld [vmem:[#allocation351_spill] sm:$0xff]  ;;  %v11074_v60 = vld [vmem:[#allocation358_spill] sm:$0xff] }
 0x2c7   :  { %4061 = vmatpush2.msra.mxu1 %v11026_v10  ;;  %3944 = vmatmul.mubr.f32.vlgmr.msra.gmra.mxu0 %v11027_v11  ;;  %v11071_v20 = vld [vmem:[#allocation339_spill] sm:$0xff]  ;;  %v11072_v10 = vld [vmem:[#allocation354_spill] sm:$0xff] }
 0x2c8   :  { %4063 = vmatprep.subr.mxu1 %v11028_v54  ;;  %4099 = vmatprep.subr.mxu0 %v11029_v40  ;;  %v11073_v54 = vld [vmem:[#allocation342_spill] sm:$0xff] }
 0x2c9   :  { %4065 = vmatpush2.msra.mxu1 %v11030_v43  ;;  %4101 = vmatpush1.msra.mxu0 %v11031_v33  ;;  %v11077_v43 = vld [vmem:[#allocation352_spill] sm:$0xff] }
 0x2ca   :  { %4067 = vmatprep.subr.mxu1 %v11032_v49  ;;  %v2756_v45 = vpop.f32.mrf.mxu1  ;;  %4103 = vmatprep.subr.mxu0 %v11033_v53  ;;  %v11078_v49 = vld [vmem:[#allocation371_spill] sm:$0xff] }
 0x2cb   :  { %4069 = vmatpush2.msra.mxu1 %v10956_v13  ;;  %v2757_v0 = vadd.f32 %v2756_v45, %v2620_v30  ;;  %4105 = vmatpush1.msra.mxu0 %v11034_v52  ;;  %v11076_v30 = vld [vmem:[#allocation364_spill] sm:$0xff]  ;;  %v11079_v45 = vld [vmem:[#allocation355_spill] sm:$0xff] }
 0x2cc   :  { %4071 = vmatprep.subr.mxu1 %v10958_v57  ;;  %v2758_v36 = vpop.f32.mrf.mxu1  ;;  %4107 = vmatprep.subr.mxu0 %v11035_v27  ;;  %v181_v57 = vld [vmem:[%s8954_s1 + $0x4] sm:$0xf] }
 0x2cd   :  { %4073 = vmatpush2.msra.mxu1 %v10863_v23  ;;  %v2759_v12 = vadd.f32 %v2758_v36, %v2622_v47  ;;  %4109 = vmatpush1.msra.mxu0 %v11036_v4  ;;  %v2761_v13 = vsub.f32 0.0, %v2757_v0  ;;  %v11039_v23 = vld [vmem:[#allocation288_spill] sm:$0xff]  ;;  %v11080_v47 = vld [vmem:[#allocation373_spill] sm:$0xff] }
 0x2ce   :  { %4075 = vmatprep.subr.mxu1 %v10961_v62  ;;  %4111 = vmatprep.subr.mxu0 %v11037_v56  ;;  %v11041_v62 = vld [vmem:[#allocation290_spill] sm:$0xff]  ;;  %v11081_v36 = vld [vmem:[#allocation361_spill] sm:$0xff] }
 0x2cf   :  { %4077 = vmatpush2.msra.mxu1 %v10963_v48  ;;  %v2762_v8 = vsub.f32 0.0, %v2759_v12  ;;  %4113 = vmatpush1.msra.mxu0 %v11038_v50  ;;  %v11043_v48 = vld [vmem:[#allocation246_spill] sm:$0xff]  ;;  %v11082_v12 = vld [vmem:[#allocation380_spill] sm:$0xff] }
 0x2d0   :  { %4081 = vmatmul.mubr.f32.vlgmr.msra.gmra.mxu1 %v11027_v11  ;;  %4115 = vmatprep.subr.mxu0 %v11039_v23  ;;  %v2778_v51 = vmul.f32 %v181_v57, %v11043_v48  ;;  %v11049_v7 = vsub.f32 1.0, %v11043_v48  ;;  %v11085_v57 = vld [vmem:[#allocation365_spill] sm:$0xff]  ;;  %v11088_v48 = vld [vmem:[#allocation390_spill] sm:$0xff] }
 0x2d1   :  { %4248 = vmatprep.subr.mxu1 %v11040_v44  ;;  %v2781_v32 = vcombine.low %v2761_v13, %v2762_v8  ;;  %4117 = vmatpush1.msra.mxu0 %v11041_v62  ;;  %v11083_v13 = vld [vmem:[#allocation362_spill] sm:$0xff]  ;;  %v11084_v8 = vld [vmem:[#allocation383_spill] sm:$0xff]  ;;  %v11086_v44 = vld [vmem:[#allocation384_spill] sm:$0xff] }
 0x2d2   :  { %4254 = vmatpush1.msra.mxu1 %v11042_v29  ;;  %4119 = vmatprep.subr.mxu0 %v11045_v58 }
 0x2d3   :  { %v2788_v5 = vrot.slane %v2781_v32, %v11044_v31  ;;  %4260 = vmatprep.subr.mxu1 %v11046_v39  ;;  %4121 = vmatpush1.msra.mxu0 %v11047_v41  ;;  %v11087_v32 = vld [vmem:[#allocation368_spill] sm:$0xff] }
 0x2d4   :  { %4266 = vmatpush1.msra.mxu1 %v11048_v1  ;;  %4123 = vmatprep.subr.mxu0 %v11050_v14  ;;  %v11092_v39 = vld [vmem:[#allocation400_spill] sm:$0xff]  ;;  %v11093_v1 = vld [vmem:[#allocation385_spill] sm:$0xff] }
 0x2d5   :  { %v2790_v63 = vmul.f32 %v2788_v5, %v11049_v7  ;;  %4272 = vmatprep.subr.mxu1 %v11051_v42  ;;  %4125 = vmatpush1.msra.mxu0 %v11052_v6  ;;  %v11091_v5 = vld [vmem:[#allocation377_spill] sm:$0xff]  ;;  %v11094_v7 = vld [vmem:[#allocation402_spill] sm:$0xff] }
 0x2d6   :  { %4278 = vmatpush1.msra.mxu1 %v11053_v46  ;;  %4127 = vmatprep.subr.mxu0 %v11054_v2  ;;  %v11096_v46 = vld [vmem:[#allocation405_spill] sm:$0xff] }
 0x2d7   :  { %v2791_v16 = vadd.f32 %v2790_v63, %v2778_v51  ;;  %4284 = vmatprep.subr.mxu1 %v11055_v21  ;;  %4129 = vmatpush1.msra.mxu0 %v11056_v24  ;;  %v11089_v51 = vld [vmem:[#allocation372_spill] sm:$0xff]  ;;  %v11095_v63 = vld [vmem:[#allocation387_spill] sm:$0xff] }
 0x2d8   :  { %4290 = vmatpush1.msra.mxu1 %v11057_v35  ;;  %4131 = vmatprep.subr.mxu0 %v11058_v18  ;;  %v11098_v21 = vld [vmem:[#allocation411_spill] sm:$0xff]  ;;  %v11099_v35 = vld [vmem:[#allocation396_spill] sm:$0xff] }
 0x2d9   :  { %v8551_v61 = vrot.slane %v2791_v16, %v11044_v31  ;;  %5397 = vst [vmem:[%s8959_s6 + $0x4] sm:$0xf] %v2791_v16  ;;  %4296 = vmatprep.subr.mxu1 %v11059_v26  ;;  %4133 = vmatpush1.msra.mxu0 %v11060_v38  ;;  %v11090_v31 = vld [vmem:[#allocation393_spill] sm:$0xff]  ;;  %v11097_v16 = vld [vmem:[#allocation394_spill] sm:$0xff]  ;;  %v11100_v26 = vld [vmem:[#allocation412_spill] sm:$0xff] }
 0x2da   :  { %4302 = vmatpush1.msra.mxu1 %v11061_v55  ;;  %4135 = vmatprep.subr.mxu0 %v11062_v37  ;;  %v11101_v55 = vld [vmem:[#allocation397_spill] sm:$0xff] }
 0x2db   :  { %4308 = vmatprep.subr.mxu1 %v11063_v34  ;;  %v4095_v19 = vcombine.high %v8551_v61, %v8551_v61  ;;  %4137 = vmatpush1.msra.mxu0 %v11064_v28  ;;  %v11102_v34 = vld [vmem:[#allocation415_spill] sm:$0xff] }
 0x2dc   :  { %4314 = vmatpush1.msra.mxu1 %v11065_v59  ;;  %4139 = vmatprep.subr.mxu0 %v11066_v15  ;;  %v11104_v59 = vld [vmem:[#allocation418_spill] sm:$0xff] }
 0x2dd   :  { %4320 = vmatprep.subr.mxu1 %v11067_v17  ;;  %v8568_v3 = vand.u32 4294901760, %v4095_v19  ;;  %4141 = vmatpush1.msra.mxu0 %v11069_v22  ;;  %v11105_v17 = vld [vmem:[#allocation406_spill] sm:$0xff] }
 0x2de   :  { %4326 = vmatpush1.msra.mxu1 %v11070_v25  ;;  %4143 = vmatprep.subr.mxu0 %v11071_v20  ;;  %v11106_v25 = vld [vmem:[#allocation422_spill] sm:$0xff] }
 0x2df   :  { %11068 = vst [vmem:[#allocation240_spill] sm:$0xff] %v8568_v3  ;;  %4332 = vmatprep.subr.mxu1 %v11072_v10  ;;  %v8575_v11 = vsub.f32 %v4095_v19, %v8568_v3  ;;  %4145 = vmatpush1.msra.mxu0 %v11073_v54  ;;  %v11103_v19 = vld [vmem:[#allocation403_spill] sm:$0xff]  ;;  %v11107_v10 = vld [vmem:[#allocation408_spill] sm:$0xff] }
 0x2e0   :  { %4338 = vmatpush1.msra.mxu1 %v11074_v60  ;;  %4147 = vmatprep.subr.mxu0 %v11075_v9  ;;  %v11108_v60 = vld [vmem:[#allocation428_spill] sm:$0xff] }
 0x2e1   :  { %4344 = vmatprep.subr.mxu1 %v11076_v30  ;;  %4149 = vmatpush1.msra.mxu0 %v11077_v43  ;;  %v9901_v0 = vand.u32 4294901760, %v8575_v11  ;;  %v11109_v30 = vld [vmem:[#allocation416_spill] sm:$0xff] }
 0x2e2   :  { %4350 = vmatpush1.msra.mxu1 %v11078_v49  ;;  %4151 = vmatprep.subr.mxu0 %v11079_v45  ;;  %v11110_v49 = vld [vmem:[#allocation435_spill] sm:$0xff] }
 0x2e3   :  { %4356 = vmatprep.subr.mxu1 %v11080_v47  ;;  %4153 = vmatpush1.msra.mxu0 %v11081_v36  ;;  %v4229_v29 = vsub.f32 %v8575_v11, %v9901_v0  ;;  %v11111_v47 = vld [vmem:[#allocation419_spill] sm:$0xff] }
 0x2e4   :  { %4362 = vmatpush1.msra.mxu1 %v11082_v12  ;;  %4155 = vmatprep.subr.mxu0 %v11083_v13  ;;  %v11112_v12 = vld [vmem:[#allocation438_spill] sm:$0xff]  ;;  %v11135_v0 = vld [vmem:[#allocation479_spill] sm:$0xff] }
 0x2e5   :  { %4368 = vmatprep.subr.mxu1 %v11084_v8  ;;  %4157 = vmatpush1.msra.mxu0 %v11085_v57  ;;  %v4230_v42 = vand.u32 4294901760, %v4229_v29  ;;  %v11113_v8 = vld [vmem:[#allocation423_spill] sm:$0xff]  ;;  %v11115_v29 = vld [vmem:[#allocation425_spill] sm:$0xff] }
 0x2e6   :  { %4374 = vmatpush1.msra.mxu1 %v11086_v44  ;;  %4628 = vmatprep.mubr.f32.mxu1 %v8568_v3  ;;  %v11114_v44 = vld [vmem:[#allocation444_spill] sm:$0xff]  ;;  %v11137_v3 = vld [vmem:[#allocation482_spill] sm:$0xff] }
 0x2e7   :  { %4159 = vmatprep.subr.mxu0 %v11087_v32  ;;  %4380 = vmatprep.subr.mxu1 %v11088_v48  ;;  %v11116_v48 = vld [vmem:[#allocation447_spill] sm:$0xff] }
 0x2e8   :  { %4161 = vmatpush1.msra.mxu0 %v11089_v51  ;;  %4386 = vmatpush1.msra.mxu1 %v11090_v31  ;;  %v11117_v31 = vld [vmem:[#allocation429_spill] sm:$0xff] }
 0x2e9   :  { %4163 = vmatprep.subr.mxu0 %v11091_v5  ;;  %4392 = vmatprep.subr.mxu1 %v11092_v39  ;;  %v11118_v39 = vld [vmem:[#allocation451_spill] sm:$0xff] }
 0x2ea   :  { %4165 = vmatpush2.msra.mxu0 %v11093_v1  ;;  %4398 = vmatpush1.msra.mxu1 %v11094_v7  ;;  %v8629_v7 = vand.u32 4294901760, %v8551_v61 }
 0x2eb   :  { %4167 = vmatprep.subr.mxu0 %v11095_v63  ;;  %4404 = vmatprep.subr.mxu1 %v11096_v46  ;;  %v11121_v46 = vld [vmem:[#allocation454_spill] sm:$0xff] }
 0x2ec   :  { %4169 = vmatpush2.msra.mxu0 %v11097_v16  ;;  %4410 = vmatpush1.msra.mxu1 %v11098_v21  ;;  %11119 = vst [vmem:[#allocation237_spill] sm:$0xff] %v8629_v7  ;;  %v11122_v21 = vld [vmem:[#allocation436_spill] sm:$0xff] }
 0x2ed   :  { %4171 = vmatprep.subr.mxu0 %v11099_v35  ;;  %4416 = vmatprep.subr.mxu1 %v11100_v26  ;;  %v11123_v26 = vld [vmem:[#allocation457_spill] sm:$0xff] }
 0x2ee   :  { %4173 = vmatpush2.msra.mxu0 %v11101_v55  ;;  %4231 = vmatprep.mubr.f32.mxu0 %v4230_v42  ;;  %v11120_v42 = vld [vmem:[#allocation432_spill] sm:$0xff] }
 0x2ef   :  { %4422 = vmatpush1.msra.mxu1 %v11102_v34  ;;  %4175 = vmatprep.subr.mxu0 %v11103_v19  ;;  %v11124_v34 = vld [vmem:[#allocation441_spill] sm:$0xff] }
 0x2f0   :  { %4428 = vmatprep.subr.mxu1 %v11104_v59  ;;  %4177 = vmatpush2.msra.mxu0 %v11105_v17  ;;  %v11125_v59 = vld [vmem:[#allocation463_spill] sm:$0xff] }
 0x2f1   :  { %4434 = vmatpush1.msra.mxu1 %v11106_v25  ;;  %4179 = vmatprep.subr.mxu0 %v11107_v10  ;;  %v11126_v25 = vld [vmem:[#allocation448_spill] sm:$0xff] }
 0x2f2   :  { %4440 = vmatprep.subr.mxu1 %v11108_v60  ;;  %4181 = vmatpush2.msra.mxu0 %v11109_v30  ;;  %v11127_v60 = vld [vmem:[#allocation466_spill] sm:$0xff] }
 0x2f3   :  { %4446 = vmatpush2.msra.mxu1 %v11110_v49  ;;  %4183 = vmatprep.subr.mxu0 %v11111_v47  ;;  %v11128_v49 = vld [vmem:[#allocation452_spill] sm:$0xff] }
 0x2f4   :  { %4452 = vmatprep.subr.mxu1 %v11112_v12  ;;  %4185 = vmatpush2.msra.mxu0 %v11113_v8  ;;  %v11129_v12 = vld [vmem:[#allocation469_spill] sm:$0xff] }
 0x2f5   :  { %4458 = vmatpush2.msra.mxu1 %v11114_v44  ;;  %4187 = vmatprep.subr.mxu0 %v11115_v29  ;;  %v8643_v44 = vsub.f32 %v8551_v61, %v8629_v7  ;;  %v11138_v61 = vld [vmem:[#allocation470_spill] sm:$0xff] }
 0x2f6   :  { %4464 = vmatprep.subr.mxu1 %v11116_v48  ;;  %4189 = vmatpush2.msra.mxu0 %v11117_v31  ;;  %v11130_v48 = vld [vmem:[#allocation458_spill] sm:$0xff] }
 0x2f7   :  { %4470 = vmatpush2.msra.mxu1 %v11118_v39  ;;  %4191 = vmatprep.subr.mxu0 %v11120_v42  ;;  %v11131_v39 = vld [vmem:[#allocation472_spill] sm:$0xff] }
 0x2f8   :  { %4476 = vmatprep.subr.mxu1 %v11121_v46  ;;  %4193 = vmatpush2.msra.mxu0 %v11122_v21  ;;  %v11132_v46 = vld [vmem:[#allocation460_spill] sm:$0xff] }
 0x2f9   :  { %4482 = vmatpush2.msra.mxu1 %v11123_v26  ;;  %4195 = vmatprep.subr.mxu0 %v11124_v34  ;;  %v11133_v26 = vld [vmem:[#allocation475_spill] sm:$0xff] }
 0x2fa   :  { %4488 = vmatprep.subr.mxu1 %v11125_v59  ;;  %4197 = vmatpush2.msra.mxu0 %v11126_v25  ;;  %v11134_v59 = vld [vmem:[#allocation461_spill] sm:$0xff]  ;;  %v11154_v25 = vld [vmem:[#allocation499_spill] sm:$0xff] }
 0x2fb   :  { %4494 = vmatpush2.msra.mxu1 %v11127_v60  ;;  %4199 = vmatprep.subr.mxu0 %v11128_v49  ;;  %v11136_v60 = vld [vmem:[#allocation464_spill] sm:$0xff]  ;;  %v11139_v49 = vld [vmem:[#allocation486_spill] sm:$0xff] }
 0x2fc   :  { %4500 = vmatprep.subr.mxu1 %v11129_v12  ;;  %4201 = vmatpush2.msra.mxu0 %v11130_v48  ;;  %v9904_v12 = vand.u32 4294901760, %v8643_v44  ;;  %v11140_v48 = vld [vmem:[#allocation473_spill] sm:$0xff] }
 0x2fd   :  { %4506 = vmatpush2.msra.mxu1 %v11131_v39  ;;  %4203 = vmatprep.subr.mxu0 %v11132_v46  ;;  %v11141_v39 = vld [vmem:[#allocation493_spill] sm:$0xff]  ;;  %v11142_v46 = vld [vmem:[#allocation476_spill] sm:$0xff] }
 0x2fe   :  { %4512 = vmatprep.subr.mxu1 %v11133_v26  ;;  %4205 = vmatpush2.msra.mxu0 %v11134_v59  ;;  %v11143_v26 = vld [vmem:[#allocation502_spill] sm:$0xff]  ;;  %v11144_v59 = vld [vmem:[#allocation483_spill] sm:$0xff] }
 0x2ff   :  { %4518 = vmatpush2.msra.mxu1 %v11135_v0  ;;  %4207 = vmatprep.subr.mxu0 %v11136_v60  ;;  %v11145_v0 = vld [vmem:[#allocation504_spill] sm:$0xff]  ;;  %v11146_v60 = vld [vmem:[#allocation487_spill] sm:$0xff] }
 0x300   :  { %4524 = vmatprep.subr.mxu1 %v11137_v3  ;;  %4209 = vmatpush2.msra.mxu0 %v11138_v61  ;;  %v4235_v3 = vsub.f32 %v8643_v44, %v9904_v12  ;;  %v11147_v61 = vld [vmem:[#allocation507_spill] sm:$0xff]  ;;  %v11155_v12 = vld [vmem:[#allocation517_spill] sm:$0xff] }
 0x301   :  { %4530 = vmatpush2.msra.mxu1 %v11139_v49  ;;  %4211 = vmatprep.subr.mxu0 %v11140_v48  ;;  %v11148_v49 = vld [vmem:[#allocation490_spill] sm:$0xff] }
 0x302   :  { %4536 = vmatprep.subr.mxu1 %v11141_v39  ;;  %4213 = vmatpush2.msra.mxu0 %v11142_v46  ;;  %v11149_v48 = vld [vmem:[#allocation510_spill] sm:$0xff]  ;;  %v11150_v39 = vld [vmem:[#allocation491_spill] sm:$0xff]  ;;  %v11151_v46 = vld [vmem:[#allocation513_spill] sm:$0xff] }
 0x303   :  { %4542 = vmatpush2.msra.mxu1 %v11143_v26  ;;  %4215 = vmatprep.subr.mxu0 %v11144_v59  ;;  %v11152_v26 = vld [vmem:[#allocation496_spill] sm:$0xff]  ;;  %v11153_v59 = vld [vmem:[#allocation515_spill] sm:$0xff] }
 0x304   :  { %4548 = vmatprep.subr.mxu1 %v11145_v0  ;;  %4217 = vmatpush2.msra.mxu0 %v11146_v60  ;;  %v4236_v0 = vand.u32 4294901760, %v4235_v3  ;;  %v11156_v60 = vld [vmem:[#allocation519_spill] sm:$0xff]  ;;  %v11163_v3 = vld [vmem:[#allocation284_spill] sm:$0xff] }
 0x305   :  { %4554 = vmatpush2.msra.mxu1 %v11147_v61  ;;  %4219 = vmatprep.subr.mxu0 %v11148_v49  ;;  %v11157_v61 = vld [vmem:[#allocation275_spill] sm:$0xff]  ;;  %v11158_v49 = vld [vmem:[#allocation521_spill] sm:$0xff] }
 0x306   :  { %4560 = vmatprep.subr.mxu1 %v11149_v48  ;;  %4221 = vmatpush2.msra.mxu0 %v11150_v39  ;;  %v11159_v48 = vld [vmem:[#allocation279_spill] sm:$0xff] }
 0x307   :  { %4566 = vmatpush2.msra.mxu1 %v11151_v46  ;;  %4223 = vmatprep.subr.mxu0 %v11152_v26  ;;  %v11160_v46 = vld [vmem:[#allocation522_spill] sm:$0xff]  ;;  %v11161_v26 = vld [vmem:[#allocation280_spill] sm:$0xff] }
 0x308   :  { %4572 = vmatprep.subr.mxu1 %v11153_v59  ;;  %4225 = vmatpush2.msra.mxu0 %v11154_v25  ;;  %v11162_v59 = vld [vmem:[#allocation263_spill] sm:$0xff]  ;;  %v11170_v25 = vld [vmem:[#allocation525_spill] sm:$0xff] }
 0x309   :  { %4578 = vmatpush2.msra.mxu1 %v11155_v12  ;;  %4237 = vmatmul.mubr.f32.vlgmr.msra.gmra.mxu0 %v4236_v0  ;;  %v11164_v12 = vld [vmem:[#allocation259_spill] sm:$0xff]  ;;  %v11165_v0 = vld [vmem:[#allocation286_spill] sm:$0xff] }
 0x30a   :  { %4584 = vmatprep.subr.mxu1 %v11156_v60  ;;  %4638 = vmatprep.subr.mxu0 %v11157_v61  ;;  %v11166_v60 = vld [vmem:[#allocation523_spill] sm:$0xff] }
 0x30b   :  { %4590 = vmatpush2.msra.mxu1 %v11158_v49  ;;  %4641 = vmatpush1.msra.mxu0 %v11159_v48  ;;  %v11167_v61 = vld [vmem:[#allocation287_spill] sm:$0xff]  ;;  %v11168_v49 = vld [vmem:[#allocation524_spill] sm:$0xff] }
 0x30c   :  { %4830 = vmatprep.mubr.f32.mxu0 %v8575_v11  ;;  %4596 = vmatprep.subr.mxu1 %v11160_v46  ;;  %v11169_v48 = vld [vmem:[#allocation291_spill] sm:$0xff]  ;;  %v11171_v46 = vld [vmem:[#allocation294_spill] sm:$0xff] }
 0x30d   :  { %4644 = vmatprep.subr.mxu0 %v11161_v26  ;;  %4602 = vmatpush2.msra.mxu1 %v11162_v59  ;;  %v11172_v26 = vld [vmem:[#allocation299_spill] sm:$0xff] }
 0x30e   :  { %4647 = vmatpush1.msra.mxu0 %v11163_v3  ;;  %4608 = vmatprep.subr.mxu1 %v11164_v12  ;;  %v11173_v59 = vld [vmem:[#allocation303_spill] sm:$0xff]  ;;  %v11174_v3 = vand.u32 4294901760, %v8575_v11  ;;  %v11175_v12 = vld [vmem:[#allocation306_spill] sm:$0xff] }
 0x30f   :  { %4650 = vmatprep.subr.mxu0 %v11165_v0  ;;  %4614 = vmatpush2.msra.mxu1 %v11166_v60  ;;  %v11177_v0 = vld [vmem:[#allocation312_spill] sm:$0xff]  ;;  %v11178_v60 = vld [vmem:[#allocation315_spill] sm:$0xff]  ;;  %v11180_v11 = vld [vmem:[#allocation322_spill] sm:$0xff] }
 0x310   :  { %4653 = vmatpush1.msra.mxu0 %v11167_v61  ;;  %4620 = vmatprep.subr.mxu1 %v11168_v49  ;;  %v11179_v61 = vld [vmem:[#allocation318_spill] sm:$0xff]  ;;  %v11181_v49 = vld [vmem:[#allocation328_spill] sm:$0xff] }
 0x311   :  { %4656 = vmatprep.subr.mxu0 %v11169_v48  ;;  %4626 = vmatpush2.msra.mxu1 %v11170_v25  ;;  %v11176_v25 = vld [vmem:[#allocation311_spill] sm:$0xff] }
 0x312   :  { %4659 = vmatpush1.msra.mxu0 %v11171_v46  ;;  %4630 = vmatmul.mubr.f32.vlgmr.msra.gmra.mxu1 %v8629_v7  ;;  %v11182_v48 = vld [vmem:[#allocation335_spill] sm:$0xff]  ;;  %v11183_v46 = vld [vmem:[#allocation337_spill] sm:$0xff]  ;;  %v11237_v7 = vld [vmem:[#allocation282_spill] sm:$0xff] }
 0x313   :  { %4662 = vmatprep.subr.mxu0 %v11172_v26  ;;  %4840 = vmatprep.subr.mxu1 %v11029_v40  ;;  %v11184_v26 = vld [vmem:[#allocation343_spill] sm:$0xff] }
 0x314   :  { %4665 = vmatpush1.msra.mxu0 %v11173_v59  ;;  %4842 = vmatpush1.msra.mxu1 %v11031_v33  ;;  %v11185_v59 = vld [vmem:[#allocation345_spill] sm:$0xff] }
 0x315   :  { %4970 = vmatprep.mubr.f32.mxu1 %v11174_v3  ;;  %4668 = vmatprep.subr.mxu0 %v11175_v12  ;;  %v11186_v3 = vld [vmem:[#allocation346_spill] sm:$0xff]  ;;  %v11187_v12 = vld [vmem:[#allocation353_spill] sm:$0xff] }
 0x316   :  { %4844 = vmatprep.subr.mxu1 %v11033_v53  ;;  %4671 = vmatpush1.msra.mxu0 %v11176_v25  ;;  %v11188_v25 = vld [vmem:[#allocation357_spill] sm:$0xff] }
 0x317   :  { %4846 = vmatpush1.msra.mxu1 %v11034_v52  ;;  %4674 = vmatprep.subr.mxu0 %v11177_v0  ;;  %v11189_v0 = vld [vmem:[#allocation363_spill] sm:$0xff] }
 0x318   :  { %4848 = vmatprep.subr.mxu1 %v11035_v27  ;;  %4677 = vmatpush1.msra.mxu0 %v11178_v60  ;;  %v11190_v60 = vld [vmem:[#allocation367_spill] sm:$0xff] }
 0x319   :  { %4850 = vmatpush1.msra.mxu1 %v11036_v4  ;;  %4680 = vmatprep.subr.mxu0 %v11179_v61  ;;  %v11191_v61 = vld [vmem:[#allocation370_spill] sm:$0xff] }
 0x31a   :  { %4852 = vmatprep.subr.mxu1 %v11037_v56  ;;  %4683 = vmatpush1.msra.mxu0 %v11180_v11  ;;  %v11192_v11 = vld [vmem:[#allocation375_spill] sm:$0xff] }
 0x31b   :  { %4854 = vmatpush1.msra.mxu1 %v11038_v50  ;;  %4686 = vmatprep.subr.mxu0 %v11181_v49  ;;  %v11193_v49 = vld [vmem:[#allocation376_spill] sm:$0xff] }
 0x31c   :  { %4856 = vmatprep.subr.mxu1 %v11039_v23  ;;  %4689 = vmatpush1.msra.mxu0 %v11182_v48  ;;  %v11194_v48 = vld [vmem:[#allocation379_spill] sm:$0xff] }
 0x31d   :  { %4858 = vmatpush1.msra.mxu1 %v11041_v62  ;;  %4692 = vmatprep.subr.mxu0 %v11183_v46  ;;  %v11195_v46 = vld [vmem:[#allocation382_spill] sm:$0xff] }
 0x31e   :  { %4860 = vmatprep.subr.mxu1 %v11045_v58  ;;  %4695 = vmatpush1.msra.mxu0 %v11184_v26  ;;  %v11196_v26 = vld [vmem:[#allocation386_spill] sm:$0xff] }
 0x31f   :  { %4862 = vmatpush1.msra.mxu1 %v11047_v41  ;;  %4698 = vmatprep.subr.mxu0 %v11185_v59  ;;  %v11197_v59 = vld [vmem:[#allocation392_spill] sm:$0xff] }
 0x320   :  { %4864 = vmatprep.subr.mxu1 %v11050_v14  ;;  %4701 = vmatpush1.msra.mxu0 %v11186_v3  ;;  %v11198_v3 = vld [vmem:[#allocation399_spill] sm:$0xff] }
 0x321   :  { %4866 = vmatpush1.msra.mxu1 %v11052_v6  ;;  %4704 = vmatprep.subr.mxu0 %v11187_v12  ;;  %v11199_v12 = vld [vmem:[#allocation401_spill] sm:$0xff] }
 0x322   :  { %4868 = vmatprep.subr.mxu1 %v11054_v2  ;;  %4707 = vmatpush1.msra.mxu0 %v11188_v25  ;;  %v11200_v25 = vld [vmem:[#allocation407_spill] sm:$0xff] }
 0x323   :  { %4870 = vmatpush1.msra.mxu1 %v11056_v24  ;;  %4710 = vmatprep.subr.mxu0 %v11189_v0  ;;  %v11201_v0 = vld [vmem:[#allocation410_spill] sm:$0xff] }
 0x324   :  { %4872 = vmatprep.subr.mxu1 %v11058_v18  ;;  %4713 = vmatpush1.msra.mxu0 %v11190_v60  ;;  %v11202_v60 = vld [vmem:[#allocation414_spill] sm:$0xff] }
 0x325   :  { %4874 = vmatpush1.msra.mxu1 %v11060_v38  ;;  %4716 = vmatprep.subr.mxu0 %v11191_v61  ;;  %v11203_v61 = vld [vmem:[#allocation417_spill] sm:$0xff] }
 0x326   :  { %4876 = vmatprep.subr.mxu1 %v11062_v37  ;;  %4719 = vmatpush1.msra.mxu0 %v11192_v11  ;;  %v11204_v11 = vld [vmem:[#allocation421_spill] sm:$0xff] }
 0x327   :  { %4878 = vmatpush1.msra.mxu1 %v11064_v28  ;;  %4722 = vmatprep.subr.mxu0 %v11193_v49  ;;  %v11205_v49 = vld [vmem:[#allocation427_spill] sm:$0xff] }
 0x328   :  { %4880 = vmatprep.subr.mxu1 %v11066_v15  ;;  %4725 = vmatpush1.msra.mxu0 %v11194_v48  ;;  %v11206_v48 = vld [vmem:[#allocation431_spill] sm:$0xff] }
 0x329   :  { %4882 = vmatpush1.msra.mxu1 %v11069_v22  ;;  %4728 = vmatprep.subr.mxu0 %v11195_v46  ;;  %v11207_v46 = vld [vmem:[#allocation434_spill] sm:$0xff] }
 0x32a   :  { %4884 = vmatprep.subr.mxu1 %v11071_v20  ;;  %4731 = vmatpush1.msra.mxu0 %v11196_v26  ;;  %v11208_v26 = vld [vmem:[#allocation437_spill] sm:$0xff] }
 0x32b   :  { %4886 = vmatpush1.msra.mxu1 %v11073_v54  ;;  %4734 = vmatprep.subr.mxu0 %v11197_v59  ;;  %v11209_v59 = vld [vmem:[#allocation440_spill] sm:$0xff] }
 0x32c   :  { %4888 = vmatprep.subr.mxu1 %v11075_v9  ;;  %4737 = vmatpush2.msra.mxu0 %v11198_v3  ;;  %v11210_v3 = vld [vmem:[#allocation443_spill] sm:$0xff] }
 0x32d   :  { %4890 = vmatpush1.msra.mxu1 %v11077_v43  ;;  %4740 = vmatprep.subr.mxu0 %v11199_v12  ;;  %v11211_v12 = vld [vmem:[#allocation446_spill] sm:$0xff] }
 0x32e   :  { %4892 = vmatprep.subr.mxu1 %v11079_v45  ;;  %4743 = vmatpush2.msra.mxu0 %v11200_v25  ;;  %v11212_v25 = vld [vmem:[#allocation450_spill] sm:$0xff] }
 0x32f   :  { %4894 = vmatpush1.msra.mxu1 %v11081_v36  ;;  %4746 = vmatprep.subr.mxu0 %v11201_v0  ;;  %v11213_v0 = vld [vmem:[#allocation456_spill] sm:$0xff] }
 0x330   :  { %4896 = vmatprep.subr.mxu1 %v11083_v13  ;;  %4749 = vmatpush2.msra.mxu0 %v11202_v60  ;;  %v11214_v60 = vld [vmem:[#allocation465_spill] sm:$0xff] }
 0x331   :  { %4898 = vmatpush1.msra.mxu1 %v11085_v57  ;;  %4752 = vmatprep.subr.mxu0 %v11203_v61  ;;  %v11215_v61 = vld [vmem:[#allocation468_spill] sm:$0xff] }
 0x332   :  { %4900 = vmatprep.subr.mxu1 %v11087_v32  ;;  %4755 = vmatpush2.msra.mxu0 %v11204_v11  ;;  %v11216_v11 = vld [vmem:[#allocation471_spill] sm:$0xff] }
 0x333   :  { %4902 = vmatpush1.msra.mxu1 %v11089_v51  ;;  %4758 = vmatprep.subr.mxu0 %v11205_v49  ;;  %v11217_v49 = vld [vmem:[#allocation474_spill] sm:$0xff] }
 0x334   :  { %4904 = vmatprep.subr.mxu1 %v11091_v5  ;;  %4761 = vmatpush2.msra.mxu0 %v11206_v48  ;;  %v11218_v48 = vld [vmem:[#allocation478_spill] sm:$0xff] }
 0x335   :  { %4906 = vmatpush2.msra.mxu1 %v11093_v1  ;;  %4764 = vmatprep.subr.mxu0 %v11207_v46  ;;  %v11219_v46 = vld [vmem:[#allocation481_spill] sm:$0xff] }
 0x336   :  { %4908 = vmatprep.subr.mxu1 %v11095_v63  ;;  %4767 = vmatpush2.msra.mxu0 %v11208_v26  ;;  %v11220_v26 = vld [vmem:[#allocation485_spill] sm:$0xff] }
 0x337   :  { %4910 = vmatpush2.msra.mxu1 %v11097_v16  ;;  %4770 = vmatprep.subr.mxu0 %v11209_v59  ;;  %v11221_v59 = vld [vmem:[#allocation489_spill] sm:$0xff] }
 0x338   :  { %4912 = vmatprep.subr.mxu1 %v11099_v35  ;;  %4773 = vmatpush2.msra.mxu0 %v11210_v3  ;;  %v11222_v3 = vld [vmem:[#allocation495_spill] sm:$0xff] }
 0x339   :  { %4914 = vmatpush2.msra.mxu1 %v11101_v55  ;;  %4776 = vmatprep.subr.mxu0 %v11211_v12  ;;  %v11223_v12 = vld [vmem:[#allocation448_spill] sm:$0xff] }
 0x33a   :  { %4916 = vmatprep.subr.mxu1 %v11103_v19  ;;  %4779 = vmatpush2.msra.mxu0 %v11212_v25  ;;  %v11224_v25 = vld [vmem:[#allocation498_spill] sm:$0xff] }
 0x33b   :  { %4918 = vmatpush2.msra.mxu1 %v11105_v17  ;;  %4782 = vmatprep.subr.mxu0 %v11213_v0  ;;  %v11225_v0 = vld [vmem:[#allocation452_spill] sm:$0xff] }
 0x33c   :  { %4920 = vmatprep.subr.mxu1 %v11107_v10  ;;  %4785 = vmatpush2.msra.mxu0 %v11214_v60  ;;  %v11226_v60 = vld [vmem:[#allocation501_spill] sm:$0xff] }
 0x33d   :  { %4922 = vmatpush2.msra.mxu1 %v11109_v30  ;;  %4788 = vmatprep.subr.mxu0 %v11215_v61  ;;  %v11227_v61 = vld [vmem:[#allocation458_spill] sm:$0xff] }
 0x33e   :  { %4924 = vmatprep.subr.mxu1 %v11111_v47  ;;  %4791 = vmatpush2.msra.mxu0 %v11216_v11  ;;  %v11228_v11 = vld [vmem:[#allocation503_spill] sm:$0xff] }
 0x33f   :  { %4926 = vmatpush2.msra.mxu1 %v11113_v8  ;;  %4794 = vmatprep.subr.mxu0 %v11217_v49  ;;  %v11229_v49 = vld [vmem:[#allocation460_spill] sm:$0xff] }
 0x340   :  { %4928 = vmatprep.subr.mxu1 %v11115_v29  ;;  %4797 = vmatpush2.msra.mxu0 %v11218_v48  ;;  %v11230_v48 = vld [vmem:[#allocation506_spill] sm:$0xff] }
 0x341   :  { %4930 = vmatpush2.msra.mxu1 %v11117_v31  ;;  %4800 = vmatprep.subr.mxu0 %v11219_v46  ;;  %v11231_v46 = vld [vmem:[#allocation461_spill] sm:$0xff] }
 0x342   :  { %4932 = vmatprep.subr.mxu1 %v11120_v42  ;;  %4803 = vmatpush2.msra.mxu0 %v11220_v26  ;;  %v11232_v26 = vld [vmem:[#allocation509_spill] sm:$0xff] }
 0x343   :  { %4934 = vmatpush2.msra.mxu1 %v11122_v21  ;;  %4806 = vmatprep.subr.mxu0 %v11221_v59  ;;  %v11233_v59 = vld [vmem:[#allocation464_spill] sm:$0xff] }
 0x344   :  { %4936 = vmatprep.subr.mxu1 %v11124_v34  ;;  %4809 = vmatpush2.msra.mxu0 %v11222_v3  ;;  %v11234_v3 = vld [vmem:[#allocation512_spill] sm:$0xff] }
 0x345   :  { %4938 = vmatpush2.msra.mxu1 %v11223_v12  ;;  %4812 = vmatprep.subr.mxu0 %v11224_v25  ;;  %v11235_v25 = vld [vmem:[#allocation470_spill] sm:$0xff] }
 0x346   :  { %4940 = vmatprep.subr.mxu1 %v11225_v0  ;;  %4815 = vmatpush2.msra.mxu0 %v11226_v60  ;;  %v11236_v60 = vld [vmem:[#allocation473_spill] sm:$0xff] }
 0x347   :  { %4942 = vmatpush2.msra.mxu1 %v11227_v61  ;;  %4818 = vmatprep.subr.mxu0 %v11228_v11  ;;  %v11238_v11 = vld [vmem:[#allocation476_spill] sm:$0xff]  ;;  %v11246_v61 = vld [vmem:[#allocation295_spill] sm:$0xff] }
 0x348   :  { %4944 = vmatprep.subr.mxu1 %v11229_v49  ;;  %4821 = vmatpush2.msra.mxu0 %v11230_v48  ;;  %v11239_v49 = vld [vmem:[#allocation285_spill] sm:$0xff]  ;;  %v11240_v48 = vld [vmem:[#allocation240_spill] sm:$0xff] }
 0x349   :  { %4946 = vmatpush2.msra.mxu1 %v11231_v46  ;;  %4824 = vmatprep.subr.mxu0 %v11232_v26  ;;  %v11241_v46 = vld [vmem:[#allocation483_spill] sm:$0xff]  ;;  %v11242_v26 = vld [vmem:[#allocation289_spill] sm:$0xff] }
 0x34a   :  { %4948 = vmatprep.subr.mxu1 %v11233_v59  ;;  %4827 = vmatpush2.msra.mxu0 %v11234_v3  ;;  %v11243_v59 = vld [vmem:[#allocation487_spill] sm:$0xff]  ;;  %v11244_v3 = vld [vmem:[#allocation293_spill] sm:$0xff] }
 0x34b   :  { %4950 = vmatpush2.msra.mxu1 %v11235_v25  ;;  %4833 = vmatmul.mubr.f32.vlgmr.msra.gmra.mxu0 %v8643_v44  ;;  %v11245_v25 = vld [vmem:[#allocation490_spill] sm:$0xff] }
 0x34c   :  { %4952 = vmatprep.subr.mxu1 %v11236_v60  ;;  %4983 = vmatprep.subr.mxu0 %v11237_v7  ;;  %v11247_v7 = vld [vmem:[#allocation296_spill] sm:$0xff]  ;;  %v11250_v60 = vld [vmem:[#allocation499_spill] sm:$0xff] }
 0x34d   :  { %4954 = vmatpush2.msra.mxu1 %v11238_v11  ;;  %4987 = vmatpush1.msra.mxu0 %v11239_v49  ;;  %v11248_v11 = vld [vmem:[#allocation496_spill] sm:$0xff]  ;;  %v11249_v49 = vld [vmem:[#allocation302_spill] sm:$0xff] }
 0x34e   :  { %5237 = vmatprep.mubr.f32.mxu0 %v11240_v48  ;;  %4956 = vmatprep.subr.mxu1 %v11241_v46  ;;  %v11251_v46 = vld [vmem:[#allocation305_spill] sm:$0xff] }
 0x34f   :  { %4991 = vmatprep.subr.mxu0 %v11242_v26  ;;  %4958 = vmatpush2.msra.mxu1 %v11243_v59  ;;  %v11252_v26 = vand.u32 4294901760, %v8643_v44  ;;  %v11257_v44 = vld [vmem:[#allocation325_spill] sm:$0xff] }
 0x350   :  { %4995 = vmatpush1.msra.mxu0 %v11244_v3  ;;  %4960 = vmatprep.subr.mxu1 %v11245_v25  ;;  %v11253_v3 = vld [vmem:[#allocation310_spill] sm:$0xff] }
 0x351   :  { %4999 = vmatprep.subr.mxu0 %v11246_v61  ;;  %4962 = vmatpush2.msra.mxu1 %v11150_v39  ;;  %v11254_v61 = vld [vmem:[#allocation314_spill] sm:$0xff] }
 0x352   :  { %5003 = vmatpush1.msra.mxu0 %v11247_v7  ;;  %4964 = vmatprep.subr.mxu1 %v11248_v11  ;;  %v11255_v7 = vld [vmem:[#allocation317_spill] sm:$0xff] }
 0x353   :  { %5007 = vmatprep.subr.mxu0 %v11249_v49  ;;  %4966 = vmatpush2.msra.mxu1 %v11250_v60  ;;  %v11256_v49 = vld [vmem:[#allocation324_spill] sm:$0xff] }
 0x354   :  { %5011 = vmatpush1.msra.mxu0 %v11251_v46  ;;  %4974 = vmatmul.mubr.f32.vlgmr.msra.gmra.mxu1 %v11252_v26  ;;  %v11258_v46 = vld [vmem:[#allocation327_spill] sm:$0xff]  ;;  %v11307_v26 = vld [vmem:[#allocation460_spill] sm:$0xff] }
 0x355   :  { %5015 = vmatprep.subr.mxu0 %v11253_v3  ;;  %5246 = vmatprep.subr.mxu1 %v11029_v40  ;;  %v11259_v40 = vld [vmem:[#allocation331_spill] sm:$0xff]  ;;  %v11309_v3 = vld [vmem:[#allocation461_spill] sm:$0xff] }
 0x356   :  { %5019 = vmatpush1.msra.mxu0 %v11254_v61  ;;  %5248 = vmatpush1.msra.mxu1 %v11031_v33  ;;  %v11260_v33 = vld [vmem:[#allocation334_spill] sm:$0xff]  ;;  %v11311_v61 = vld [vmem:[#allocation464_spill] sm:$0xff] }
 0x357   :  { %5374 = vmatprep.mubr.f32.mxu1 %v11240_v48  ;;  %5023 = vmatprep.subr.mxu0 %v11255_v7  ;;  %v11305_v48 = vld [vmem:[#allocation458_spill] sm:$0xff] }
 0x358   :  { %5250 = vmatprep.subr.mxu1 %v11033_v53  ;;  %5027 = vmatpush1.msra.mxu0 %v11256_v49  ;;  %v11261_v53 = vld [vmem:[#allocation340_spill] sm:$0xff]  ;;  %v11313_v7 = vld [vmem:[#allocation470_spill] sm:$0xff]  ;;  %v11315_v49 = vld [vmem:[#allocation473_spill] sm:$0xff] }
 0x359   :  { %5252 = vmatpush1.msra.mxu1 %v11034_v52  ;;  %5031 = vmatprep.subr.mxu0 %v11257_v44  ;;  %v11262_v52 = vld [vmem:[#allocation344_spill] sm:$0xff] }
 0x35a   :  { %5254 = vmatprep.subr.mxu1 %v11035_v27  ;;  %5035 = vmatpush1.msra.mxu0 %v11258_v46  ;;  %v11263_v27 = vld [vmem:[#allocation350_spill] sm:$0xff]  ;;  %v11316_v44 = vld [vmem:[#allocation476_spill] sm:$0xff]  ;;  %v11317_v46 = vld [vmem:[#allocation483_spill] sm:$0xff] }
 0x35b   :  { %5256 = vmatpush1.msra.mxu1 %v11036_v4  ;;  %5039 = vmatprep.subr.mxu0 %v11259_v40  ;;  %v11264_v4 = vld [vmem:[#allocation356_spill] sm:$0xff]  ;;  %v2943_v40 = vpop.f32.mrf.mxu0 }
 0x35c   :  { %5258 = vmatprep.subr.mxu1 %v11037_v56  ;;  %5043 = vmatpush1.msra.mxu0 %v11260_v33  ;;  %v11265_v56 = vld [vmem:[#allocation359_spill] sm:$0xff] }
 0x35d   :  { %5260 = vmatpush1.msra.mxu1 %v11038_v50  ;;  %5047 = vmatprep.subr.mxu0 %v11261_v53  ;;  %v11266_v50 = vld [vmem:[#allocation360_spill] sm:$0xff]  ;;  %v2945_v33 = vpop.f32.mrf.mxu0  ;;  %v3336_v53 = vpop.f32.mrf.mxu1 }
 0x35e   :  { %5262 = vmatprep.subr.mxu1 %v11039_v23  ;;  %5051 = vmatpush1.msra.mxu0 %v11262_v52  ;;  %v11267_v23 = vld [vmem:[#allocation366_spill] sm:$0xff] }
 0x35f   :  { %5264 = vmatpush1.msra.mxu1 %v11041_v62  ;;  %5055 = vmatprep.subr.mxu0 %v11263_v27  ;;  %v11268_v62 = vld [vmem:[#allocation369_spill] sm:$0xff]  ;;  %v3539_v52 = vpop.f32.mrf.mxu0  ;;  %v3338_v27 = vpop.f32.mrf.mxu1 }
 0x360   :  { %5266 = vmatprep.subr.mxu1 %v11045_v58  ;;  %5059 = vmatpush1.msra.mxu0 %v11264_v4  ;;  %v11269_v58 = vld [vmem:[#allocation374_spill] sm:$0xff] }
 0x361   :  { %5268 = vmatpush1.msra.mxu1 %v11047_v41  ;;  %5063 = vmatprep.subr.mxu0 %v11265_v56  ;;  %v11270_v41 = vld [vmem:[#allocation378_spill] sm:$0xff]  ;;  %v3541_v4 = vpop.f32.mrf.mxu0  ;;  %v3680_v56 = vpop.f32.mrf.mxu1 }
 0x362   :  { %5270 = vmatprep.subr.mxu1 %v11050_v14  ;;  %5067 = vmatpush1.msra.mxu0 %v11266_v50  ;;  %v11271_v14 = vld [vmem:[#allocation381_spill] sm:$0xff] }
 0x363   :  { %5272 = vmatpush1.msra.mxu1 %v11052_v6  ;;  %5071 = vmatprep.subr.mxu0 %v11267_v23  ;;  %v11272_v6 = vld [vmem:[#allocation388_spill] sm:$0xff]  ;;  %v3682_v23 = vpop.f32.mrf.mxu1 }
 0x364   :  { %5274 = vmatprep.subr.mxu1 %v11054_v2  ;;  %5075 = vmatpush1.msra.mxu0 %v11268_v62  ;;  %v11273_v2 = vld [vmem:[#allocation389_spill] sm:$0xff] }
 0x365   :  { %5276 = vmatpush1.msra.mxu1 %v11056_v24  ;;  %5079 = vmatprep.subr.mxu0 %v11269_v58  ;;  %v11274_v24 = vld [vmem:[#allocation391_spill] sm:$0xff] }
 0x366   :  { %5278 = vmatprep.subr.mxu1 %v11058_v18  ;;  %5083 = vmatpush1.msra.mxu0 %v11270_v41  ;;  %v11275_v18 = vld [vmem:[#allocation395_spill] sm:$0xff] }
 0x367   :  { %5280 = vmatpush1.msra.mxu1 %v11060_v38  ;;  %5087 = vmatprep.subr.mxu0 %v11271_v14  ;;  %v11276_v38 = vld [vmem:[#allocation398_spill] sm:$0xff] }
 0x368   :  { %5282 = vmatprep.subr.mxu1 %v11062_v37  ;;  %5091 = vmatpush1.msra.mxu0 %v11272_v6  ;;  %v11277_v37 = vld [vmem:[#allocation404_spill] sm:$0xff] }
 0x369   :  { %5284 = vmatpush1.msra.mxu1 %v11064_v28  ;;  %5095 = vmatprep.subr.mxu0 %v11273_v2  ;;  %v11278_v28 = vld [vmem:[#allocation409_spill] sm:$0xff] }
 0x36a   :  { %5286 = vmatprep.subr.mxu1 %v11066_v15  ;;  %5099 = vmatpush1.msra.mxu0 %v11274_v24  ;;  %v11279_v15 = vld [vmem:[#allocation413_spill] sm:$0xff] }
 0x36b   :  { %5288 = vmatpush1.msra.mxu1 %v11069_v22  ;;  %5103 = vmatprep.subr.mxu0 %v11275_v18  ;;  %v11280_v22 = vld [vmem:[#allocation420_spill] sm:$0xff]  ;;  %v3337_v18 = vadd.f32 %v3336_v53, %v2943_v40 }
 0x36c   :  { %5290 = vmatprep.subr.mxu1 %v11071_v20  ;;  %5107 = vmatpush1.msra.mxu0 %v11276_v38  ;;  %v11281_v20 = vld [vmem:[#allocation424_spill] sm:$0xff]  ;;  %v3339_v38 = vadd.f32 %v3338_v27, %v2945_v33 }
 0x36d   :  { %5292 = vmatpush1.msra.mxu1 %v11073_v54  ;;  %5111 = vmatprep.subr.mxu0 %v11277_v37  ;;  %v11282_v54 = vld [vmem:[#allocation426_spill] sm:$0xff] }
 0x36e   :  { %5294 = vmatprep.subr.mxu1 %v11075_v9  ;;  %5115 = vmatpush2.msra.mxu0 %v11278_v28  ;;  %v11283_v9 = vld [vmem:[#allocation430_spill] sm:$0xff] }
 0x36f   :  { %5296 = vmatpush1.msra.mxu1 %v11077_v43  ;;  %5119 = vmatprep.subr.mxu0 %v11279_v15  ;;  %v11284_v43 = vld [vmem:[#allocation433_spill] sm:$0xff] }
 0x370   :  { %5298 = vmatprep.subr.mxu1 %v11079_v45  ;;  %5123 = vmatpush2.msra.mxu0 %v11280_v22  ;;  %v11285_v45 = vld [vmem:[#allocation439_spill] sm:$0xff]  ;;  %v3540_v22 = vadd.f32 %v3539_v52, %v3337_v18 }
 0x371   :  { %5300 = vmatpush1.msra.mxu1 %v11081_v36  ;;  %5127 = vmatprep.subr.mxu0 %v11281_v20  ;;  %v11286_v36 = vld [vmem:[#allocation442_spill] sm:$0xff]  ;;  %v3542_v20 = vadd.f32 %v3541_v4, %v3339_v38 }
 0x372   :  { %5302 = vmatprep.subr.mxu1 %v11083_v13  ;;  %5131 = vmatpush2.msra.mxu0 %v11282_v54  ;;  %v11287_v13 = vld [vmem:[#allocation445_spill] sm:$0xff] }
 0x373   :  { %5304 = vmatpush1.msra.mxu1 %v11085_v57  ;;  %5135 = vmatprep.subr.mxu0 %v11283_v9  ;;  %v11288_v57 = vld [vmem:[#allocation449_spill] sm:$0xff] }
 0x374   :  { %5306 = vmatprep.subr.mxu1 %v11087_v32  ;;  %5139 = vmatpush2.msra.mxu0 %v11284_v43  ;;  %v11289_v32 = vld [vmem:[#allocation453_spill] sm:$0xff] }
 0x375   :  { %5308 = vmatpush1.msra.mxu1 %v11089_v51  ;;  %5143 = vmatprep.subr.mxu0 %v11285_v45  ;;  %v11290_v51 = vld [vmem:[#allocation455_spill] sm:$0xff]  ;;  %v3681_v45 = vadd.f32 %v3680_v56, %v3540_v22 }
 0x376   :  { %5310 = vmatprep.subr.mxu1 %v11091_v5  ;;  %5147 = vmatpush2.msra.mxu0 %v11286_v36  ;;  %v11291_v5 = vld [vmem:[#allocation459_spill] sm:$0xff]  ;;  %v3683_v36 = vadd.f32 %v3682_v23, %v3542_v20 }
 0x377   :  { %5312 = vmatpush2.msra.mxu1 %v11093_v1  ;;  %5151 = vmatprep.subr.mxu0 %v11287_v13  ;;  %v11292_v1 = vld [vmem:[#allocation462_spill] sm:$0xff] }
 0x378   :  { %5314 = vmatprep.subr.mxu1 %v11095_v63  ;;  %5155 = vmatpush2.msra.mxu0 %v11288_v57  ;;  %v11293_v63 = vld [vmem:[#allocation467_spill] sm:$0xff] }
 0x379   :  { %5316 = vmatpush2.msra.mxu1 %v11097_v16  ;;  %5159 = vmatprep.subr.mxu0 %v11289_v32  ;;  %v11294_v16 = vld [vmem:[#allocation477_spill] sm:$0xff] }
 0x37a   :  { %5318 = vmatprep.subr.mxu1 %v11099_v35  ;;  %5163 = vmatpush2.msra.mxu0 %v11290_v51  ;;  %v11295_v35 = vld [vmem:[#allocation480_spill] sm:$0xff] }
 0x37b   :  { %5320 = vmatpush2.msra.mxu1 %v11101_v55  ;;  %5167 = vmatprep.subr.mxu0 %v11291_v5  ;;  %v11296_v55 = vld [vmem:[#allocation484_spill] sm:$0xff] }
 0x37c   :  { %5322 = vmatprep.subr.mxu1 %v11103_v19  ;;  %5171 = vmatpush2.msra.mxu0 %v11292_v1  ;;  %v11297_v19 = vld [vmem:[#allocation488_spill] sm:$0xff] }
 0x37d   :  { %5324 = vmatpush2.msra.mxu1 %v11105_v17  ;;  %5175 = vmatprep.subr.mxu0 %v11293_v63  ;;  %v11298_v17 = vld [vmem:[#allocation492_spill] sm:$0xff] }
 0x37e   :  { %5326 = vmatprep.subr.mxu1 %v11107_v10  ;;  %5179 = vmatpush2.msra.mxu0 %v11294_v16  ;;  %v11299_v10 = vld [vmem:[#allocation494_spill] sm:$0xff] }
 0x37f   :  { %5328 = vmatpush2.msra.mxu1 %v11109_v30  ;;  %5183 = vmatprep.subr.mxu0 %v11295_v35  ;;  %v11300_v30 = vld [vmem:[#allocation497_spill] sm:$0xff] }
 0x380   :  { %5330 = vmatprep.subr.mxu1 %v11111_v47  ;;  %5187 = vmatpush2.msra.mxu0 %v11296_v55  ;;  %v11301_v47 = vld [vmem:[#allocation500_spill] sm:$0xff] }
 0x381   :  { %5332 = vmatpush2.msra.mxu1 %v11113_v8  ;;  %5191 = vmatprep.subr.mxu0 %v11297_v19  ;;  %v11302_v8 = vld [vmem:[#allocation505_spill] sm:$0xff] }
 0x382   :  { %5334 = vmatprep.subr.mxu1 %v11115_v29  ;;  %5195 = vmatpush2.msra.mxu0 %v11298_v17  ;;  %v11303_v29 = vld [vmem:[#allocation508_spill] sm:$0xff] }
 0x383   :  { %5336 = vmatpush2.msra.mxu1 %v11117_v31  ;;  %5199 = vmatprep.subr.mxu0 %v11299_v10  ;;  %v11304_v31 = vld [vmem:[#allocation511_spill] sm:$0xff] }
 0x384   :  { %5338 = vmatprep.subr.mxu1 %v11120_v42  ;;  %5203 = vmatpush2.msra.mxu0 %v11300_v30  ;;  %v11306_v42 = vld [vmem:[#allocation514_spill] sm:$0xff] }
 0x385   :  { %5340 = vmatpush2.msra.mxu1 %v11122_v21  ;;  %5207 = vmatprep.subr.mxu0 %v11301_v47  ;;  %v11308_v21 = vld [vmem:[#allocation516_spill] sm:$0xff] }
 0x386   :  { %5342 = vmatprep.subr.mxu1 %v11124_v34  ;;  %5211 = vmatpush2.msra.mxu0 %v11302_v8  ;;  %v11310_v34 = vld [vmem:[#allocation518_spill] sm:$0xff] }
 0x387   :  { %5344 = vmatpush2.msra.mxu1 %v11223_v12  ;;  %5215 = vmatprep.subr.mxu0 %v11303_v29  ;;  %v11312_v12 = vld [vmem:[#allocation520_spill] sm:$0xff]  ;;  %v3945_v50 = vpop.f32.mrf.mxu0 }
 0x388   :  { %5346 = vmatprep.subr.mxu1 %v11225_v0  ;;  %5219 = vmatpush2.msra.mxu0 %v11304_v31  ;;  %v11314_v0 = vld [vmem:[#allocation237_spill] sm:$0xff]  ;;  %v3946_v51 = vadd.f32 %v3945_v50, %v3681_v45 }
 0x389   :  { %5348 = vmatpush2.msra.mxu1 %v11305_v48  ;;  %5223 = vmatprep.subr.mxu0 %v11306_v42 }
 0x38a   :  { %5350 = vmatprep.subr.mxu1 %v11307_v26  ;;  %5227 = vmatpush2.msra.mxu0 %v11308_v21 }
 0x38b   :  { %5352 = vmatpush2.msra.mxu1 %v11309_v3  ;;  %5231 = vmatprep.subr.mxu0 %v11310_v34 }
 0x38c   :  { %5354 = vmatprep.subr.mxu1 %v11311_v61  ;;  %5235 = vmatpush2.msra.mxu0 %v11312_v12 }
 0x38d   :  { %5356 = vmatpush2.msra.mxu1 %v11313_v7  ;;  %5239 = vmatmul.mubr.f32.vlgmr.msra.gmra.mxu0 %v11314_v0 }
 0x38e   :  { %5358 = vmatprep.subr.mxu1 %v11315_v49 }
 0x38f   :  { %5360 = vmatpush2.msra.mxu1 %v11316_v44 }
 0x390   :  { %5362 = vmatprep.subr.mxu1 %v11317_v46  ;;  %v4082_v62 = vpop.f32.mrf.mxu1 }
 0x391   :  { %5364 = vmatpush2.msra.mxu1 %v11243_v59  ;;  %v3947_v59 = vpop.f32.mrf.mxu0  ;;  %v4083_v35 = vadd.f32 %v4082_v62, %v3946_v51 }
 0x392   :  { %5366 = vmatprep.subr.mxu1 %v11245_v25  ;;  %v4084_v58 = vpop.f32.mrf.mxu1  ;;  %v3948_v5 = vadd.f32 %v3947_v59, %v3683_v36 }
 0x393   :  { %5368 = vmatpush2.msra.mxu1 %v11150_v39 }
 0x394   :  { %5370 = vmatprep.subr.mxu1 %v11248_v11  ;;  %v4085_v55 = vadd.f32 %v4084_v58, %v3948_v5 }
 0x395   :  { %5372 = vmatpush2.msra.mxu1 %v11250_v60 }
 0x396   :  { %5376 = vmatmul.mubr.f32.vlgmr.msra.gmra.mxu1 %v11314_v0 }
 0x3c9   :  { %v4238_v25 = vpop.f32.mrf.mxu0 }
 0x3cb   :  { %v4240_v39 = vpop.f32.mrf.mxu0 }
 0x3d2   :  { %v4631_v41 = vpop.f32.mrf.mxu1 }
 0x3d3   :  { %v4632_v2 = vadd.f32 %v4631_v41, %v4238_v25 }
 0x3d4   :  { %v4633_v14 = vpop.f32.mrf.mxu1 }
 0x3d5   :  { %v4634_v37 = vadd.f32 %v4633_v14, %v4240_v39 }
 0x40b   :  { %v4834_v11 = vpop.f32.mrf.mxu0 }
 0x40c   :  { %v4835_v28 = vadd.f32 %v4834_v11, %v4632_v2 }
 0x40d   :  { %v4836_v60 = vpop.f32.mrf.mxu0 }
 0x40e   :  { %v4837_v54 = vadd.f32 %v4836_v60, %v4634_v37 }
 0x414   :  { %v4975_v6 = vpop.f32.mrf.mxu1 }
 0x415   :  { %v4976_v9 = vadd.f32 %v4975_v6, %v4835_v28 }
 0x416   :  { %v4977_v15 = vpop.f32.mrf.mxu1 }
 0x417   :  { %v4978_v13 = vadd.f32 %v4977_v15, %v4837_v54 }
 0x44d   :  { %v5240_v24 = vpop.f32.mrf.mxu0 }
 0x44e   :  { %v5241_v57 = vadd.f32 %v5240_v24, %v4976_v9 }
 0x44f   :  { %v5242_v43 = vpop.f32.mrf.mxu0 }
 0x450   :  { %v5243_v1 = vadd.f32 %v5242_v43, %v4978_v13 }
 0x456   :  { %v5377_v32 = vpop.f32.mrf.mxu1 }
 0x457   :  { %v5378_v63 = vadd.f32 %v5377_v32, %v5241_v57 }
 0x458   :  { %v5379_v16 = vpop.f32.mrf.mxu1 }
 0x459   :  { %v5380_v19 = vadd.f32 %v5379_v16, %v5243_v1  ;;  %v5382_v17 = vsub.f32 %v4083_v35, %v5378_v63 }
 0x45b   :  { %v5383_v10 = vsub.f32 %v4085_v55, %v5380_v19 }
 0x45d   :  { %v5386_v30 = vcombine.low %v5382_v17, %v5383_v10 }
 0x45f   :  { %5409 = vst.sshfl [vmem:[%s8958_s5] sm:$0x33 pattern:$0x76325410] %v5386_v30 }
 0x460   :  { %5406 = vsyncpa [#allocation3], 1 }
 0x461   :  { %5407 = vsyncpa [#allocation5], 1 }

</bundles_post_ra>
